<compile_context>
chip_gen: v6e
topology: v6e:2x2x1
jax: 0.10.0
libtpu: 0.0.40
codegen_flags: <defaults>
</compile_context>

<pallas_src>
import functools
import math

import jax
import jax.numpy as jnp
from jax.experimental import pallas as pl
from jax.experimental.pallas import tpu as pltpu

_LN_EPS = 1e-5
_BN_EPS = 1e-5
_VMEM_LIMIT = 32 * 1024 * 1024


def _round_up(a, m):
    return (a + m - 1) // m * m


def _cparams(n_axes):
    return pltpu.CompilerParams(
        dimension_semantics=("parallel",) * n_axes,
        vmem_limit_bytes=_VMEM_LIMIT,
    )


# ----------------------------------------------------------------------------
# Kernel 1: fused matmul + per-column affine (folded bias/BN) + optional ReLU
# ----------------------------------------------------------------------------
def _matmul_affine_kernel(x_ref, w_ref, s_ref, t_ref, o_ref, *, relu):
    y = jnp.dot(x_ref[...], w_ref[...], preferred_element_type=jnp.float32)
    y = y * s_ref[...] + t_ref[...]
    if relu:
        y = jnp.maximum(y, 0.0)
    o_ref[...] = y


def matmul_affine(x, w_bf16, scale, shift, relu=False):
    """x:(M,K) f32 -> (x_bf16 @ w_bf16) * scale + shift  [ + ReLU ],  f32 out."""
    M, K = x.shape
    N = w_bf16.shape[1]
    tm = min(128, _round_up(M, 8))
    Mp = _round_up(M, tm)
    xb = x.astype(jnp.bfloat16)
    if Mp != M:
        xb = jnp.pad(xb, ((0, Mp - M), (0, 0)))
    out = pl.pallas_call(
        functools.partial(_matmul_affine_kernel, relu=relu),
        out_shape=jax.ShapeDtypeStruct((Mp, N), jnp.float32),
        grid=(Mp // tm,),
        in_specs=[
            pl.BlockSpec((tm, K), lambda i: (i, 0)),
            pl.BlockSpec((K, N), lambda i: (0, 0)),
            pl.BlockSpec((1, N), lambda i: (0, 0)),
            pl.BlockSpec((1, N), lambda i: (0, 0)),
        ],
        out_specs=pl.BlockSpec((tm, N), lambda i: (i, 0)),
        compiler_params=_cparams(1),
    )(xb, w_bf16, scale, shift)
    return out[:M] if Mp != M else out


# ----------------------------------------------------------------------------
# Kernel 2: fused attention block
#   per-head QKV projection + softmax attention + out-proj + residual + LN1
# ----------------------------------------------------------------------------
def _attn_block_kernel(x_ref, wq_ref, wk_ref, wv_ref, bq_ref, bk_ref, bv_ref,
                       wo_ref, bo_ref, g_ref, b_ref, o_ref, *, nhead, eps):
    x = x_ref[0]                      # (S, D) f32
    S, D = x.shape
    dh = D // nhead
    scale = 1.0 / math.sqrt(dh)
    xb = x.astype(jnp.bfloat16)

    acc = jnp.zeros((S, D), jnp.float32)
    for h in range(nhead):            # small static unroll; per-head ref indexing
        qh = jnp.dot(xb, wq_ref[h], preferred_element_type=jnp.float32) + bq_ref[h]
        kh = jnp.dot(xb, wk_ref[h], preferred_element_type=jnp.float32) + bk_ref[h]
        vh = jnp.dot(xb, wv_ref[h], preferred_element_type=jnp.float32) + bv_ref[h]
        s = jnp.dot(qh, kh.T, preferred_element_type=jnp.float32) * scale
        s = s - jnp.max(s, axis=-1, keepdims=True)
        p = jnp.exp(s)
        p = p * pl.reciprocal(jnp.sum(p, axis=-1, keepdims=True), approx=True)
        oh = jnp.dot(p, vh, preferred_element_type=jnp.float32)      # (S, dh)
        acc = acc + jnp.dot(oh.astype(jnp.bfloat16), wo_ref[h],
                            preferred_element_type=jnp.float32)
    a = acc + bo_ref[...]

    r = x + a
    mu = jnp.mean(r, axis=-1, keepdims=True)
    var = jnp.mean(jnp.square(r - mu), axis=-1, keepdims=True)
    o_ref[0] = (r - mu) * jax.lax.rsqrt(var + eps) * g_ref[...] + b_ref[...]


# ----------------------------------------------------------------------------
# Kernel 3: fused feed-forward block
#   lin1 + ReLU + lin2 + residual + LN2
# ----------------------------------------------------------------------------
def _ffn_block_kernel(x_ref, w1_ref, b1_ref, w2_ref, b2_ref, g_ref, b_ref,
                      o_ref, *, eps):
    x = x_ref[0]                      # (S, D) f32
    h = jnp.dot(x.astype(jnp.bfloat16), w1_ref[...],
                preferred_element_type=jnp.float32) + b1_ref[...]
    h = jnp.maximum(h, 0.0)
    y = jnp.dot(h.astype(jnp.bfloat16), w2_ref[...],
                preferred_element_type=jnp.float32) + b2_ref[...]
    r = x + y
    mu = jnp.mean(r, axis=-1, keepdims=True)
    var = jnp.mean(jnp.square(r - mu), axis=-1, keepdims=True)
    o_ref[0] = (r - mu) * jax.lax.rsqrt(var + eps) * g_ref[...] + b_ref[...]


def encoder_layer(x, lp, *, nhead):
    B, S, D = x.shape
    dh = D // nhead
    dff = lp['w1'].shape[1]

    attn = pl.pallas_call(
        functools.partial(_attn_block_kernel, nhead=nhead, eps=_LN_EPS),
        out_shape=jax.ShapeDtypeStruct((B, S, D), jnp.float32),
        grid=(B,),
        in_specs=[
            pl.BlockSpec((1, S, D), lambda b: (b, 0, 0)),
            pl.BlockSpec((nhead, D, dh), lambda b: (0, 0, 0)),   # wq
            pl.BlockSpec((nhead, D, dh), lambda b: (0, 0, 0)),   # wk
            pl.BlockSpec((nhead, D, dh), lambda b: (0, 0, 0)),   # wv
            pl.BlockSpec((nhead, 1, dh), lambda b: (0, 0, 0)),   # bq
            pl.BlockSpec((nhead, 1, dh), lambda b: (0, 0, 0)),   # bk
            pl.BlockSpec((nhead, 1, dh), lambda b: (0, 0, 0)),   # bv
            pl.BlockSpec((nhead, dh, D), lambda b: (0, 0, 0)),   # wo
            pl.BlockSpec((1, D), lambda b: (0, 0)),              # bo
            pl.BlockSpec((1, D), lambda b: (0, 0)),              # ln1 gamma
            pl.BlockSpec((1, D), lambda b: (0, 0)),              # ln1 beta
        ],
        out_specs=pl.BlockSpec((1, S, D), lambda b: (b, 0, 0)),
        compiler_params=_cparams(1),
    )(x, lp['wq'], lp['wk'], lp['wv'], lp['bq'], lp['bk'], lp['bv'],
      lp['wo'], lp['bo'], lp['ln1_g'], lp['ln1_b'])

    out = pl.pallas_call(
        functools.partial(_ffn_block_kernel, eps=_LN_EPS),
        out_shape=jax.ShapeDtypeStruct((B, S, D), jnp.float32),
        grid=(B,),
        in_specs=[
            pl.BlockSpec((1, S, D), lambda b: (b, 0, 0)),
            pl.BlockSpec((D, dff), lambda b: (0, 0)),
            pl.BlockSpec((1, dff), lambda b: (0, 0)),
            pl.BlockSpec((dff, D), lambda b: (0, 0)),
            pl.BlockSpec((1, D), lambda b: (0, 0)),
            pl.BlockSpec((1, D), lambda b: (0, 0)),
            pl.BlockSpec((1, D), lambda b: (0, 0)),
        ],
        out_specs=pl.BlockSpec((1, S, D), lambda b: (b, 0, 0)),
        compiler_params=_cparams(1),
    )(attn, lp['w1'], lp['b1'], lp['w2'], lp['b2'], lp['ln2_g'], lp['ln2_b'])
    return out


# ----------------------------------------------------------------------------
# JAX glue: channels-last conv via im2col + fused matmul kernel, pool, PE
# ----------------------------------------------------------------------------
def conv_bn_relu_pool(x, wmat, scale, shift):
    """x: (B, H, W, C) channels-last.  3x3 conv(pad=1) + BN(eval) + ReLU,
    then MaxPool2d((2,1)) over the freq (H) axis."""
    B, H, W, C = x.shape
    Cout = wmat.shape[1]
    xp = jnp.pad(x, ((0, 0), (1, 1), (1, 1), (0, 0)))
    cols = jnp.concatenate(
        [xp[:, i:i + H, j:j + W, :] for i in range(3) for j in range(3)],
        axis=-1)                                           # (B,H,W,9C) (kh,kw,c)
    out = matmul_affine(cols.reshape(B * H * W, 9 * C), wmat, scale, shift,
                        relu=True)                         # (B*H*W, Cout)
    out = out.reshape(B, H, W, Cout)
    return out.reshape(B, H // 2, 2, W, Cout).max(axis=2)  # pool over freq


def positional_encoding(length, d_model):
    pos = jnp.arange(length, dtype=jnp.float32)[:, None]
    div = jnp.exp(jnp.arange(0, d_model, 2, dtype=jnp.float32)
                  * (-math.log(10000.0) / d_model))
    pe = jnp.zeros((length, d_model), jnp.float32)
    pe = pe.at[:, 0::2].set(jnp.sin(pos * div))
    pe = pe.at[:, 1::2].set(jnp.cos(pos * div))
    return pe


# ----------------------------------------------------------------------------
# Full forward pass (expects prepared params)
# ----------------------------------------------------------------------------
def forward(x, pp, *, nhead):
    B = x.shape[0]
    T = x.shape[3]

    h = jnp.transpose(x, (0, 2, 3, 1))        # NCHW -> (B, freq, time, C)
    for i in range(3):
        cp = pp[f'conv{i + 1}']
        h = conv_bn_relu_pool(h, cp['w'], cp['scale'], cp['shift'])

    # (B, F', T, C) -> (B, T, C, F') -> (B, T, C*F')  (matches permute(0,3,1,2))
    _, Fp, _, C = h.shape
    h = jnp.transpose(h, (0, 2, 3, 1)).reshape(B, T, C * Fp)

    d_model = pp['fc_proj']['w'].shape[1]
    y = matmul_affine(h.reshape(B * T, C * Fp), pp['fc_proj']['w'],
                      pp['fc_proj']['scale'], pp['fc_proj']['shift'])
    y = y.reshape(B, T, d_model)
    y = y + positional_encoding(T, d_model)[None]   # dropout: identity (eval)

    for lp in pp['layers']:
        y = encoder_layer(y, lp, nhead=nhead)

    nc = pp['fc_out']['w'].shape[1]
    logits = matmul_affine(y.reshape(B * T, d_model), pp['fc_out']['w'],
                           pp['fc_out']['scale'], pp['fc_out']['shift'])
    return logits.reshape(B, T, nc)


# ----------------------------------------------------------------------------
# One-time parameter preparation (outside jit): transpose / fold / cast
# ----------------------------------------------------------------------------
def prepare_params(p, *, nhead):
    pp = {}
    for i in range(3):
        w = p[f'conv{i + 1}_w']                       # (Cout, Cin, 3, 3)
        cout = w.shape[0]
        wmat = jnp.transpose(w, (2, 3, 1, 0)).reshape(-1, cout)   # (9*Cin, Cout)
        scale = p[f'bn{i + 1}_gamma'] / jnp.sqrt(p[f'bn{i + 1}_var'] + _BN_EPS)
        shift = p[f'bn{i + 1}_beta'] + (p[f'conv{i + 1}_b'] - p[f'bn{i + 1}_mean']) * scale
        pp[f'conv{i + 1}'] = dict(
            w=wmat.astype(jnp.bfloat16),
            scale=scale.reshape(1, cout).astype(jnp.float32),
            shift=shift.reshape(1, cout).astype(jnp.float32))

    d_model = p['fc_proj_w'].shape[0]
    pp['fc_proj'] = dict(
        w=p['fc_proj_w'].T.astype(jnp.bfloat16),
        scale=jnp.ones((1, d_model), jnp.float32),
        shift=p['fc_proj_b'].reshape(1, d_model).astype(jnp.float32))

    layers = []
    for lp in p['layers']:
        D = lp['out_proj_w'].shape[0]
        dh = D // nhead
        in_w = lp['in_proj_w']                        # (3D, D) torch layout
        in_b = lp['in_proj_b']

        def per_head(mat):                            # (D, D) -> (nhead, D, dh)
            return jnp.transpose(mat.T.reshape(D, nhead, dh), (1, 0, 2))

        layers.append(dict(
            wq=per_head(in_w[:D]).astype(jnp.bfloat16),
            wk=per_head(in_w[D:2 * D]).astype(jnp.bfloat16),
            wv=per_head(in_w[2 * D:]).astype(jnp.bfloat16),
            bq=in_b[:D].reshape(nhead, 1, dh).astype(jnp.float32),
            bk=in_b[D:2 * D].reshape(nhead, 1, dh).astype(jnp.float32),
            bv=in_b[2 * D:].reshape(nhead, 1, dh).astype(jnp.float32),
            wo=lp['out_proj_w'].T.reshape(nhead, dh, D).astype(jnp.bfloat16),
            bo=lp['out_proj_b'].reshape(1, D).astype(jnp.float32),
            ln1_g=lp['ln1_g'].reshape(1, D).astype(jnp.float32),
            ln1_b=lp['ln1_b'].reshape(1, D).astype(jnp.float32),
            w1=lp['lin1_w'].T.astype(jnp.bfloat16),
            b1=lp['lin1_b'].reshape(1, -1).astype(jnp.float32),
            w2=lp['lin2_w'].T.astype(jnp.bfloat16),
            b2=lp['lin2_b'].reshape(1, D).astype(jnp.float32),
            ln2_g=lp['ln2_g'].reshape(1, D).astype(jnp.float32),
            ln2_b=lp['ln2_b'].reshape(1, D).astype(jnp.float32)))
    pp['layers'] = layers

    nc = p['fc_out_w'].shape[0]
    pp['fc_out'] = dict(
        w=p['fc_out_w'].T.astype(jnp.bfloat16),
        scale=jnp.ones((1, nc), jnp.float32),
        shift=p['fc_out_b'].reshape(1, nc).astype(jnp.float32))
    return pp


# ----------------------------------------------------------------------------
# Deterministic PyTorch-shaped synthetic parameters
# ----------------------------------------------------------------------------
def init_params(key, *, n_mels, num_classes, d_model, num_layers, dff):
    keys = iter(jax.random.split(key, 64))

    def nrm(shape, s=0.05):
        return jax.random.normal(next(keys), shape, dtype=jnp.float32) * s

    p = {}
    chans = [1, 32, 64, 128]
    for i in range(3):
        cin, cout = chans[i], chans[i + 1]
        p[f'conv{i + 1}_w'] = nrm((cout, cin, 3, 3), 0.1)
        p[f'conv{i + 1}_b'] = nrm((cout,), 0.05)
        p[f'bn{i + 1}_gamma'] = 1.0 + nrm((cout,), 0.05)
        p[f'bn{i + 1}_beta'] = nrm((cout,), 0.05)
        p[f'bn{i + 1}_mean'] = nrm((cout,), 0.05)
        p[f'bn{i + 1}_var'] = 1.0 + jnp.abs(nrm((cout,), 0.05))

    cnn_dim = 128 * (n_mels // 8)
    p['fc_proj_w'] = nrm((d_model, cnn_dim), 0.05)
    p['fc_proj_b'] = nrm((d_model,), 0.05)

    layers = []
    for _ in range(num_layers):
        layers.append({
            'in_proj_w': nrm((3 * d_model, d_model), 0.05),
            'in_proj_b': nrm((3 * d_model,), 0.05),
            'out_proj_w': nrm((d_model, d_model), 0.05),
            'out_proj_b': nrm((d_model,), 0.05),
            'ln1_g': 1.0 + nrm((d_model,), 0.02),
            'ln1_b': nrm((d_model,), 0.02),
            'lin1_w': nrm((dff, d_model), 0.05),
            'lin1_b': nrm((dff,), 0.05),
            'lin2_w': nrm((d_model, dff), 0.05),
            'lin2_b': nrm((d_model,), 0.05),
            'ln2_g': 1.0 + nrm((d_model,), 0.02),
            'ln2_b': nrm((d_model,), 0.02),
        })
    p['layers'] = layers

    p['fc_out_w'] = nrm((num_classes, d_model), 0.05)
    p['fc_out_b'] = nrm((num_classes,), 0.05)
    return p


# ----------------------------------------------------------------------------
if __name__ == "__main__":
    B, n_mels, T = 2, 16, 8          # small shapes; n_mels divisible by 8
    d_model, nhead, num_classes, num_layers = 32, 4, 3, 2
    dff = 2048                       # torch TransformerEncoderLayer default

    key = jax.random.PRNGKey(0)
    kx, kp = jax.random.split(key)
    x = jax.random.normal(kx, (B, 1, n_mels, T), dtype=jnp.float32)  # NCHW
    raw = init_params(kp, n_mels=n_mels, num_classes=num_classes,
                      d_model=d_model, num_layers=num_layers, dff=dff)
    params = prepare_params(raw, nhead=nhead)   # one-time transpose/fold/cast

    fwd = jax.jit(functools.partial(forward, nhead=nhead))
    logits = fwd(x, params)
    jax.block_until_ready(logits)

    assert logits.shape == (B, T, num_classes), logits.shape
    assert bool(jnp.all(jnp.isfinite(logits)))
    print("KERNEL_OK")
</pallas_src>

<mosaic_0001>
module attributes {stable_mosaic.version = 11 : i64} {
  func.func @_matmul_affine_kernel(%arg0: i32, %arg1: memref<128x9xbf16, #tpu.memory_space<vmem>>, %arg2: memref<9x32xbf16, #tpu.memory_space<vmem>>, %arg3: memref<1x32xf32, #tpu.memory_space<vmem>>, %arg4: memref<1x32xf32, #tpu.memory_space<vmem>>, %arg5: memref<128x32xf32, #tpu.memory_space<vmem>>) attributes {dimension_semantics = [#tpu.dimension_semantics<parallel>], iteration_bounds = array<i64: 2>, scalar_prefetch = 0 : i64, scratch_operands = 0 : i64, tpu.core_type = #tpu.core_type<tc>, window_params = [{transform_indices = @transform_0, window_bounds = array<i64: 128, 9>}, {pipeline_mode = #tpu.pipeline_mode<synchronous>, transform_indices = @transform_1, window_bounds = array<i64: 9, 32>}, {pipeline_mode = #tpu.pipeline_mode<synchronous>, transform_indices = @transform_2, window_bounds = array<i64: 1, 32>}, {pipeline_mode = #tpu.pipeline_mode<synchronous>, transform_indices = @transform_3, window_bounds = array<i64: 1, 32>}, {transform_indices = @transform_4, window_bounds = array<i64: 128, 32>}]} {
    %c0 = arith.constant 0 : index
    %c0_0 = arith.constant 0 : index
    %0 = vector.load %arg1[%c0, %c0_0] : memref<128x9xbf16, #tpu.memory_space<vmem>>, vector<128x9xbf16>
    %c0_1 = arith.constant 0 : index
    %c0_2 = arith.constant 0 : index
    %1 = vector.load %arg2[%c0_1, %c0_2] : memref<9x32xbf16, #tpu.memory_space<vmem>>, vector<9x32xbf16>
    %cst = arith.constant dense<0.000000e+00> : vector<128x32xf32>
    %2 = tpu.matmul %0, %1, %cst {dimension_numbers = #tpu.dot_dimension_numbers<[1], [0], [0], [1], [0, 0, 1, 1], [], []>} : vector<128x9xbf16>, vector<9x32xbf16>, vector<128x32xf32> -> vector<128x32xf32>
    %c0_3 = arith.constant 0 : index
    %c0_4 = arith.constant 0 : index
    %3 = vector.load %arg3[%c0_3, %c0_4] : memref<1x32xf32, #tpu.memory_space<vmem>>, vector<1x32xf32>
    %4 = vector.broadcast %3 : vector<1x32xf32> to vector<128x32xf32>
    %5 = arith.mulf %2, %4 : vector<128x32xf32>
    %c0_5 = arith.constant 0 : index
    %c0_6 = arith.constant 0 : index
    %6 = vector.load %arg4[%c0_5, %c0_6] : memref<1x32xf32, #tpu.memory_space<vmem>>, vector<1x32xf32>
    %7 = vector.broadcast %6 : vector<1x32xf32> to vector<128x32xf32>
    %8 = arith.addf %5, %7 : vector<128x32xf32>
    %cst_7 = arith.constant 0.000000e+00 : f32
    %9 = vector.broadcast %cst_7 : f32 to vector<128x32xf32>
    %10 = arith.maximumf %8, %9 : vector<128x32xf32>
    %c0_8 = arith.constant 0 : index
    %c0_9 = arith.constant 0 : index
    %11 = vector.load %arg5[%c0_8, %c0_9] : memref<128x32xf32, #tpu.memory_space<vmem>>, vector<128x32xf32>
    tpu.vector_store %arg5[%c0_8, %c0_9], %10 {strides = array<i32>} : memref<128x32xf32, #tpu.memory_space<vmem>>, vector<128x32xf32>,
    return
  }
  func.func @transform_0(%arg0: i32) -> (i32, i32) {
    %c0_i32 = arith.constant 0 : i32
    %c0_i32_0 = arith.constant 0 : i32
    return %arg0, %c0_i32 : i32, i32
  }
  func.func @transform_1(%arg0: i32) -> (i32, i32) {
    %c0_i32 = arith.constant 0 : i32
    %c0_i32_0 = arith.constant 0 : i32
    %c0_i32_1 = arith.constant 0 : i32
    return %c0_i32, %c0_i32_0 : i32, i32
  }
  func.func @transform_2(%arg0: i32) -> (i32, i32) {
    %c0_i32 = arith.constant 0 : i32
    %c0_i32_0 = arith.constant 0 : i32
    %c0_i32_1 = arith.constant 0 : i32
    return %c0_i32, %c0_i32_0 : i32, i32
  }
  func.func @transform_3(%arg0: i32) -> (i32, i32) {
    %c0_i32 = arith.constant 0 : i32
    %c0_i32_0 = arith.constant 0 : i32
    %c0_i32_1 = arith.constant 0 : i32
    return %c0_i32, %c0_i32_0 : i32, i32
  }
  func.func @transform_4(%arg0: i32) -> (i32, i32) {
    %c0_i32 = arith.constant 0 : i32
    %c0_i32_0 = arith.constant 0 : i32
    return %arg0, %c0_i32 : i32, i32
  }
}

module attributes {stable_mosaic.version = 11 : i64} {
  func.func @_matmul_affine_kernel(%arg0: i32, %arg1: memref<128x288xbf16, #tpu.memory_space<vmem>>, %arg2: memref<288x64xbf16, #tpu.memory_space<vmem>>, %arg3: memref<1x64xf32, #tpu.memory_space<vmem>>, %arg4: memref<1x64xf32, #tpu.memory_space<vmem>>, %arg5: memref<128x64xf32, #tpu.memory_space<vmem>>) attributes {dimension_semantics = [#tpu.dimension_semantics<parallel>], iteration_bounds = array<i64: 1>, scalar_prefetch = 0 : i64, scratch_operands = 0 : i64, tpu.core_type = #tpu.core_type<tc>, window_params = [{transform_indices = @transform_0, window_bounds = array<i64: 128, 288>}, {pipeline_mode = #tpu.pipeline_mode<synchronous>, transform_indices = @transform_1, window_bounds = array<i64: 288, 64>}, {pipeline_mode = #tpu.pipeline_mode<synchronous>, transform_indices = @transform_2, window_bounds = array<i64: 1, 64>}, {pipeline_mode = #tpu.pipeline_mode<synchronous>, transform_indices = @transform_3, window_bounds = array<i64: 1, 64>}, {transform_indices = @transform_4, window_bounds = array<i64: 128, 64>}]} {
    %c0 = arith.constant 0 : index
    %c0_0 = arith.constant 0 : index
    %0 = vector.load %arg1[%c0, %c0_0] : memref<128x288xbf16, #tpu.memory_space<vmem>>, vector<128x288xbf16>
    %c0_1 = arith.constant 0 : index
    %c0_2 = arith.constant 0 : index
    %1 = vector.load %arg2[%c0_1, %c0_2] : memref<288x64xbf16, #tpu.memory_space<vmem>>, vector<288x64xbf16>
    %cst = arith.constant dense<0.000000e+00> : vector<128x64xf32>
    %2 = tpu.matmul %0, %1, %cst {dimension_numbers = #tpu.dot_dimension_numbers<[1], [0], [0], [1], [0, 0, 1, 1], [], []>} : vector<128x288xbf16>, vector<288x64xbf16>, vector<128x64xf32> -> vector<128x64xf32>
    %c0_3 = arith.constant 0 : index
    %c0_4 = arith.constant 0 : index
    %3 = vector.load %arg3[%c0_3, %c0_4] : memref<1x64xf32, #tpu.memory_space<vmem>>, vector<1x64xf32>
    %4 = vector.broadcast %3 : vector<1x64xf32> to vector<128x64xf32>
    %5 = arith.mulf %2, %4 : vector<128x64xf32>
    %c0_5 = arith.constant 0 : index
    %c0_6 = arith.constant 0 : index
    %6 = vector.load %arg4[%c0_5, %c0_6] : memref<1x64xf32, #tpu.memory_space<vmem>>, vector<1x64xf32>
    %7 = vector.broadcast %6 : vector<1x64xf32> to vector<128x64xf32>
    %8 = arith.addf %5, %7 : vector<128x64xf32>
    %cst_7 = arith.constant 0.000000e+00 : f32
    %9 = vector.broadcast %cst_7 : f32 to vector<128x64xf32>
    %10 = arith.maximumf %8, %9 : vector<128x64xf32>
    %c0_8 = arith.constant 0 : index
    %c0_9 = arith.constant 0 : index
    %11 = vector.load %arg5[%c0_8, %c0_9] : memref<128x64xf32, #tpu.memory_space<vmem>>, vector<128x64xf32>
    tpu.vector_store %arg5[%c0_8, %c0_9], %10 {strides = array<i32>} : memref<128x64xf32, #tpu.memory_space<vmem>>, vector<128x64xf32>,
    return
  }
  func.func @transform_0(%arg0: i32) -> (i32, i32) {
    %c0_i32 = arith.constant 0 : i32
    %c0_i32_0 = arith.constant 0 : i32
    return %arg0, %c0_i32 : i32, i32
  }
  func.func @transform_1(%arg0: i32) -> (i32, i32) {
    %c0_i32 = arith.constant 0 : i32
    %c0_i32_0 = arith.constant 0 : i32
    %c0_i32_1 = arith.constant 0 : i32
    return %c0_i32, %c0_i32_0 : i32, i32
  }
  func.func @transform_2(%arg0: i32) -> (i32, i32) {
    %c0_i32 = arith.constant 0 : i32
    %c0_i32_0 = arith.constant 0 : i32
    %c0_i32_1 = arith.constant 0 : i32
    return %c0_i32, %c0_i32_0 : i32, i32
  }
  func.func @transform_3(%arg0: i32) -> (i32, i32) {
    %c0_i32 = arith.constant 0 : i32
    %c0_i32_0 = arith.constant 0 : i32
    %c0_i32_1 = arith.constant 0 : i32
    return %c0_i32, %c0_i32_0 : i32, i32
  }
  func.func @transform_4(%arg0: i32) -> (i32, i32) {
    %c0_i32 = arith.constant 0 : i32
    %c0_i32_0 = arith.constant 0 : i32
    return %arg0, %c0_i32 : i32, i32
  }
}

module attributes {stable_mosaic.version = 11 : i64} {
  func.func @_matmul_affine_kernel(%arg0: i32, %arg1: memref<64x576xbf16, #tpu.memory_space<vmem>>, %arg2: memref<576x128xbf16, #tpu.memory_space<vmem>>, %arg3: memref<1x128xf32, #tpu.memory_space<vmem>>, %arg4: memref<1x128xf32, #tpu.memory_space<vmem>>, %arg5: memref<64x128xf32, #tpu.memory_space<vmem>>) attributes {dimension_semantics = [#tpu.dimension_semantics<parallel>], iteration_bounds = array<i64: 1>, scalar_prefetch = 0 : i64, scratch_operands = 0 : i64, tpu.core_type = #tpu.core_type<tc>, window_params = [{transform_indices = @transform_0, window_bounds = array<i64: 64, 576>}, {pipeline_mode = #tpu.pipeline_mode<synchronous>, transform_indices = @transform_1, window_bounds = array<i64: 576, 128>}, {pipeline_mode = #tpu.pipeline_mode<synchronous>, transform_indices = @transform_2, window_bounds = array<i64: 1, 128>}, {pipeline_mode = #tpu.pipeline_mode<synchronous>, transform_indices = @transform_3, window_bounds = array<i64: 1, 128>}, {transform_indices = @transform_4, window_bounds = array<i64: 64, 128>}]} {
    %c0 = arith.constant 0 : index
    %c0_0 = arith.constant 0 : index
    %0 = vector.load %arg1[%c0, %c0_0] : memref<64x576xbf16, #tpu.memory_space<vmem>>, vector<64x576xbf16>
    %c0_1 = arith.constant 0 : index
    %c0_2 = arith.constant 0 : index
    %1 = vector.load %arg2[%c0_1, %c0_2] : memref<576x128xbf16, #tpu.memory_space<vmem>>, vector<576x128xbf16>
    %cst = arith.constant dense<0.000000e+00> : vector<64x128xf32>
    %2 = tpu.matmul %0, %1, %cst {dimension_numbers = #tpu.dot_dimension_numbers<[1], [0], [0], [1], [0, 0, 1, 1], [], []>} : vector<64x576xbf16>, vector<576x128xbf16>, vector<64x128xf32> -> vector<64x128xf32>
    %c0_3 = arith.constant 0 : index
    %c0_4 = arith.constant 0 : index
    %3 = vector.load %arg3[%c0_3, %c0_4] : memref<1x128xf32, #tpu.memory_space<vmem>>, vector<1x128xf32>
    %4 = vector.broadcast %3 : vector<1x128xf32> to vector<64x128xf32>
    %5 = arith.mulf %2, %4 : vector<64x128xf32>
    %c0_5 = arith.constant 0 : index
    %c0_6 = arith.constant 0 : index
    %6 = vector.load %arg4[%c0_5, %c0_6] : memref<1x128xf32, #tpu.memory_space<vmem>>, vector<1x128xf32>
    %7 = vector.broadcast %6 : vector<1x128xf32> to vector<64x128xf32>
    %8 = arith.addf %5, %7 : vector<64x128xf32>
    %cst_7 = arith.constant 0.000000e+00 : f32
    %9 = vector.broadcast %cst_7 : f32 to vector<64x128xf32>
    %10 = arith.maximumf %8, %9 : vector<64x128xf32>
    %c0_8 = arith.constant 0 : index
    %c0_9 = arith.constant 0 : index
    %11 = vector.load %arg5[%c0_8, %c0_9] : memref<64x128xf32, #tpu.memory_space<vmem>>, vector<64x128xf32>
    tpu.vector_store %arg5[%c0_8, %c0_9], %10 {strides = array<i32>} : memref<64x128xf32, #tpu.memory_space<vmem>>, vector<64x128xf32>,
    return
  }
  func.func @transform_0(%arg0: i32) -> (i32, i32) {
    %c0_i32 = arith.constant 0 : i32
    %c0_i32_0 = arith.constant 0 : i32
    return %arg0, %c0_i32 : i32, i32
  }
  func.func @transform_1(%arg0: i32) -> (i32, i32) {
    %c0_i32 = arith.constant 0 : i32
    %c0_i32_0 = arith.constant 0 : i32
    %c0_i32_1 = arith.constant 0 : i32
    return %c0_i32, %c0_i32_0 : i32, i32
  }
  func.func @transform_2(%arg0: i32) -> (i32, i32) {
    %c0_i32 = arith.constant 0 : i32
    %c0_i32_0 = arith.constant 0 : i32
    %c0_i32_1 = arith.constant 0 : i32
    return %c0_i32, %c0_i32_0 : i32, i32
  }
  func.func @transform_3(%arg0: i32) -> (i32, i32) {
    %c0_i32 = arith.constant 0 : i32
    %c0_i32_0 = arith.constant 0 : i32
    %c0_i32_1 = arith.constant 0 : i32
    return %c0_i32, %c0_i32_0 : i32, i32
  }
  func.func @transform_4(%arg0: i32) -> (i32, i32) {
    %c0_i32 = arith.constant 0 : i32
    %c0_i32_0 = arith.constant 0 : i32
    return %arg0, %c0_i32 : i32, i32
  }
}

module attributes {stable_mosaic.version = 11 : i64} {
  func.func @_matmul_affine_kernel(%arg0: i32, %arg1: memref<16x256xbf16, #tpu.memory_space<vmem>>, %arg2: memref<256x32xbf16, #tpu.memory_space<vmem>>, %arg3: memref<1x32xf32, #tpu.memory_space<vmem>>, %arg4: memref<1x32xf32, #tpu.memory_space<vmem>>, %arg5: memref<16x32xf32, #tpu.memory_space<vmem>>) attributes {dimension_semantics = [#tpu.dimension_semantics<parallel>], iteration_bounds = array<i64: 1>, scalar_prefetch = 0 : i64, scratch_operands = 0 : i64, tpu.core_type = #tpu.core_type<tc>, window_params = [{transform_indices = @transform_0, window_bounds = array<i64: 16, 256>}, {pipeline_mode = #tpu.pipeline_mode<synchronous>, transform_indices = @transform_1, window_bounds = array<i64: 256, 32>}, {pipeline_mode = #tpu.pipeline_mode<synchronous>, transform_indices = @transform_2, window_bounds = array<i64: 1, 32>}, {pipeline_mode = #tpu.pipeline_mode<synchronous>, transform_indices = @transform_3, window_bounds = array<i64: 1, 32>}, {transform_indices = @transform_4, window_bounds = array<i64: 16, 32>}]} {
    %c0 = arith.constant 0 : index
    %c0_0 = arith.constant 0 : index
    %0 = vector.load %arg1[%c0, %c0_0] : memref<16x256xbf16, #tpu.memory_space<vmem>>, vector<16x256xbf16>
    %c0_1 = arith.constant 0 : index
    %c0_2 = arith.constant 0 : index
    %1 = vector.load %arg2[%c0_1, %c0_2] : memref<256x32xbf16, #tpu.memory_space<vmem>>, vector<256x32xbf16>
    %cst = arith.constant dense<0.000000e+00> : vector<16x32xf32>
    %2 = tpu.matmul %0, %1, %cst {dimension_numbers = #tpu.dot_dimension_numbers<[1], [0], [0], [1], [0, 0, 1, 1], [], []>} : vector<16x256xbf16>, vector<256x32xbf16>, vector<16x32xf32> -> vector<16x32xf32>
    %c0_3 = arith.constant 0 : index
    %c0_4 = arith.constant 0 : index
    %3 = vector.load %arg3[%c0_3, %c0_4] : memref<1x32xf32, #tpu.memory_space<vmem>>, vector<1x32xf32>
    %4 = vector.broadcast %3 : vector<1x32xf32> to vector<16x32xf32>
    %5 = arith.mulf %2, %4 : vector<16x32xf32>
    %c0_5 = arith.constant 0 : index
    %c0_6 = arith.constant 0 : index
    %6 = vector.load %arg4[%c0_5, %c0_6] : memref<1x32xf32, #tpu.memory_space<vmem>>, vector<1x32xf32>
    %7 = vector.broadcast %6 : vector<1x32xf32> to vector<16x32xf32>
    %8 = arith.addf %5, %7 : vector<16x32xf32>
    %c0_7 = arith.constant 0 : index
    %c0_8 = arith.constant 0 : index
    %9 = vector.load %arg5[%c0_7, %c0_8] : memref<16x32xf32, #tpu.memory_space<vmem>>, vector<16x32xf32>
    tpu.vector_store %arg5[%c0_7, %c0_8], %8 {strides = array<i32>} : memref<16x32xf32, #tpu.memory_space<vmem>>, vector<16x32xf32>,
    return
  }
  func.func @transform_0(%arg0: i32) -> (i32, i32) {
    %c0_i32 = arith.constant 0 : i32
    %c0_i32_0 = arith.constant 0 : i32
    return %arg0, %c0_i32 : i32, i32
  }
  func.func @transform_1(%arg0: i32) -> (i32, i32) {
    %c0_i32 = arith.constant 0 : i32
    %c0_i32_0 = arith.constant 0 : i32
    %c0_i32_1 = arith.constant 0 : i32
    return %c0_i32, %c0_i32_0 : i32, i32
  }
  func.func @transform_2(%arg0: i32) -> (i32, i32) {
    %c0_i32 = arith.constant 0 : i32
    %c0_i32_0 = arith.constant 0 : i32
    %c0_i32_1 = arith.constant 0 : i32
    return %c0_i32, %c0_i32_0 : i32, i32
  }
  func.func @transform_3(%arg0: i32) -> (i32, i32) {
    %c0_i32 = arith.constant 0 : i32
    %c0_i32_0 = arith.constant 0 : i32
    %c0_i32_1 = arith.constant 0 : i32
    return %c0_i32, %c0_i32_0 : i32, i32
  }
  func.func @transform_4(%arg0: i32) -> (i32, i32) {
    %c0_i32 = arith.constant 0 : i32
    %c0_i32_0 = arith.constant 0 : i32
    return %arg0, %c0_i32 : i32, i32
  }
}

module attributes {stable_mosaic.version = 11 : i64} {
  func.func @_attn_block_kernel(%arg0: i32, %arg1: memref<1x8x32xf32, #tpu.memory_space<vmem>>, %arg2: memref<4x32x8xbf16, #tpu.memory_space<vmem>>, %arg3: memref<4x32x8xbf16, #tpu.memory_space<vmem>>, %arg4: memref<4x32x8xbf16, #tpu.memory_space<vmem>>, %arg5: memref<4x1x8xf32, #tpu.memory_space<vmem>>, %arg6: memref<4x1x8xf32, #tpu.memory_space<vmem>>, %arg7: memref<4x1x8xf32, #tpu.memory_space<vmem>>, %arg8: memref<4x8x32xbf16, #tpu.memory_space<vmem>>, %arg9: memref<1x32xf32, #tpu.memory_space<vmem>>, %arg10: memref<1x32xf32, #tpu.memory_space<vmem>>, %arg11: memref<1x32xf32, #tpu.memory_space<vmem>>, %arg12: memref<1x8x32xf32, #tpu.memory_space<vmem>>) attributes {dimension_semantics = [#tpu.dimension_semantics<parallel>], iteration_bounds = array<i64: 2>, scalar_prefetch = 0 : i64, scratch_operands = 0 : i64, tpu.core_type = #tpu.core_type<tc>, window_params = [{transform_indices = @transform_0, window_bounds = array<i64: 1, 8, 32>}, {pipeline_mode = #tpu.pipeline_mode<synchronous>, transform_indices = @transform_1, window_bounds = array<i64: 4, 32, 8>}, {pipeline_mode = #tpu.pipeline_mode<synchronous>, transform_indices = @transform_2, window_bounds = array<i64: 4, 32, 8>}, {pipeline_mode = #tpu.pipeline_mode<synchronous>, transform_indices = @transform_3, window_bounds = array<i64: 4, 32, 8>}, {pipeline_mode = #tpu.pipeline_mode<synchronous>, transform_indices = @transform_4, window_bounds = array<i64: 4, 1, 8>}, {pipeline_mode = #tpu.pipeline_mode<synchronous>, transform_indices = @transform_5, window_bounds = array<i64: 4, 1, 8>}, {pipeline_mode = #tpu.pipeline_mode<synchronous>, transform_indices = @transform_6, window_bounds = array<i64: 4, 1, 8>}, {pipeline_mode = #tpu.pipeline_mode<synchronous>, transform_indices = @transform_7, window_bounds = array<i64: 4, 8, 32>}, {pipeline_mode = #tpu.pipeline_mode<synchronous>, transform_indices = @transform_8, window_bounds = array<i64: 1, 32>}, {pipeline_mode = #tpu.pipeline_mode<synchronous>, transform_indices = @transform_9, window_bounds = array<i64: 1, 32>}, {pipeline_mode = #tpu.pipeline_mode<synchronous>, transform_indices = @transform_10, window_bounds = array<i64: 1, 32>}, {transform_indices = @transform_11, window_bounds = array<i64: 1, 8, 32>}]} {
    %c0 = arith.constant 0 : index
    %c0_0 = arith.constant 0 : index
    %c0_1 = arith.constant 0 : index
    %0 = vector.load %arg1[%c0, %c0_0, %c0_1] : memref<1x8x32xf32, #tpu.memory_space<vmem>>, vector<1x8x32xf32>
    %1 = vector.shape_cast %0 : vector<1x8x32xf32> to vector<8x32xf32>
    %2 = arith.truncf %1 : vector<8x32xf32> to vector<8x32xbf16>
    %cst = arith.constant 0.000000e+00 : f32
    %3 = vector.broadcast %cst : f32 to vector<8x32xf32>
    %c0_2 = arith.constant 0 : index
    %c0_3 = arith.constant 0 : index
    %c0_4 = arith.constant 0 : index
    %4 = vector.load %arg2[%c0_2, %c0_3, %c0_4] : memref<4x32x8xbf16, #tpu.memory_space<vmem>>, vector<1x32x8xbf16>
    %5 = vector.shape_cast %4 : vector<1x32x8xbf16> to vector<32x8xbf16>
    %cst_5 = arith.constant dense<0.000000e+00> : vector<8x8xf32>
    %6 = tpu.matmul %2, %5, %cst_5 {dimension_numbers = #tpu.dot_dimension_numbers<[1], [0], [0], [1], [0, 0, 1, 1], [], []>} : vector<8x32xbf16>, vector<32x8xbf16>, vector<8x8xf32> -> vector<8x8xf32>
    %c0_6 = arith.constant 0 : index
    %c0_7 = arith.constant 0 : index
    %c0_8 = arith.constant 0 : index
    %7 = vector.load %arg5[%c0_6, %c0_7, %c0_8] : memref<4x1x8xf32, #tpu.memory_space<vmem>>, vector<1x1x8xf32>
    %8 = vector.shape_cast %7 : vector<1x1x8xf32> to vector<1x8xf32>
    %9 = vector.broadcast %8 : vector<1x8xf32> to vector<8x8xf32>
    %10 = arith.addf %6, %9 : vector<8x8xf32>
    %c0_9 = arith.constant 0 : index
    %c0_10 = arith.constant 0 : index
    %c0_11 = arith.constant 0 : index
    %11 = vector.load %arg3[%c0_9, %c0_10, %c0_11] : memref<4x32x8xbf16, #tpu.memory_space<vmem>>, vector<1x32x8xbf16>
    %12 = vector.shape_cast %11 : vector<1x32x8xbf16> to vector<32x8xbf16>
    %cst_12 = arith.constant dense<0.000000e+00> : vector<8x8xf32>
    %13 = tpu.matmul %2, %12, %cst_12 {dimension_numbers = #tpu.dot_dimension_numbers<[1], [0], [0], [1], [0, 0, 1, 1], [], []>} : vector<8x32xbf16>, vector<32x8xbf16>, vector<8x8xf32> -> vector<8x8xf32>
    %c0_13 = arith.constant 0 : index
    %c0_14 = arith.constant 0 : index
    %c0_15 = arith.constant 0 : index
    %14 = vector.load %arg6[%c0_13, %c0_14, %c0_15] : memref<4x1x8xf32, #tpu.memory_space<vmem>>, vector<1x1x8xf32>
    %15 = vector.shape_cast %14 : vector<1x1x8xf32> to vector<1x8xf32>
    %16 = vector.broadcast %15 : vector<1x8xf32> to vector<8x8xf32>
    %17 = arith.addf %13, %16 : vector<8x8xf32>
    %c0_16 = arith.constant 0 : index
    %c0_17 = arith.constant 0 : index
    %c0_18 = arith.constant 0 : index
    %18 = vector.load %arg4[%c0_16, %c0_17, %c0_18] : memref<4x32x8xbf16, #tpu.memory_space<vmem>>, vector<1x32x8xbf16>
    %19 = vector.shape_cast %18 : vector<1x32x8xbf16> to vector<32x8xbf16>
    %cst_19 = arith.constant dense<0.000000e+00> : vector<8x8xf32>
    %20 = tpu.matmul %2, %19, %cst_19 {dimension_numbers = #tpu.dot_dimension_numbers<[1], [0], [0], [1], [0, 0, 1, 1], [], []>} : vector<8x32xbf16>, vector<32x8xbf16>, vector<8x8xf32> -> vector<8x8xf32>
    %c0_20 = arith.constant 0 : index
    %c0_21 = arith.constant 0 : index
    %c0_22 = arith.constant 0 : index
    %21 = vector.load %arg7[%c0_20, %c0_21, %c0_22] : memref<4x1x8xf32, #tpu.memory_space<vmem>>, vector<1x1x8xf32>
    %22 = vector.shape_cast %21 : vector<1x1x8xf32> to vector<1x8xf32>
    %23 = vector.broadcast %22 : vector<1x8xf32> to vector<8x8xf32>
    %24 = arith.addf %20, %23 : vector<8x8xf32>
    %25 = tpu.transpose %17, [1, 0] : vector<8x8xf32> -> vector<8x8xf32>
    %cst_23 = arith.constant dense<0.000000e+00> : vector<8x8xf32>
    %26 = tpu.matmul %10, %25, %cst_23 {dimension_numbers = #tpu.dot_dimension_numbers<[1], [0], [0], [1], [0, 0, 1, 1], [], []>} : vector<8x8xf32>, vector<8x8xf32>, vector<8x8xf32> -> vector<8x8xf32>
    %cst_24 = arith.constant 0.353553385 : f32
    %27 = vector.broadcast %cst_24 : f32 to vector<8x8xf32>
    %28 = arith.mulf %26, %27 : vector<8x8xf32>
    %cst_25 = arith.constant dense<0xFF800000> : vector<8xf32>
    %29 = vector.multi_reduction <maximumf>, %28, %cst_25 [1] : vector<8x8xf32> to vector<8xf32>
    %30 = vector.shape_cast %29 : vector<8xf32> to vector<8x1xf32>
    %31 = vector.broadcast %30 : vector<8x1xf32> to vector<8x8xf32>
    %32 = arith.subf %28, %31 : vector<8x8xf32>
    %33 = math.exp %32 : vector<8x8xf32>
    %cst_26 = arith.constant dense<0.000000e+00> : vector<8xf32>
    %34 = vector.multi_reduction <add>, %33, %cst_26 [1] : vector<8x8xf32> to vector<8xf32>
    %35 = vector.shape_cast %34 : vector<8xf32> to vector<8x1xf32>
    %36 = tpu.reciprocal %35 {approx = true} : vector<8x1xf32> -> vector<8x1xf32>
    %37 = vector.broadcast %36 : vector<8x1xf32> to vector<8x8xf32>
    %38 = arith.mulf %33, %37 : vector<8x8xf32>
    %cst_27 = arith.constant dense<0.000000e+00> : vector<8x8xf32>
    %39 = tpu.matmul %38, %24, %cst_27 {dimension_numbers = #tpu.dot_dimension_numbers<[1], [0], [0], [1], [0, 0, 1, 1], [], []>} : vector<8x8xf32>, vector<8x8xf32>, vector<8x8xf32> -> vector<8x8xf32>
    %40 = arith.truncf %39 : vector<8x8xf32> to vector<8x8xbf16>
    %c0_28 = arith.constant 0 : index
    %c0_29 = arith.constant 0 : index
    %c0_30 = arith.constant 0 : index
    %41 = vector.load %arg8[%c0_28, %c0_29, %c0_30] : memref<4x8x32xbf16, #tpu.memory_space<vmem>>, vector<1x8x32xbf16>
    %42 = vector.shape_cast %41 : vector<1x8x32xbf16> to vector<8x32xbf16>
    %cst_31 = arith.constant dense<0.000000e+00> : vector<8x32xf32>
    %43 = tpu.matmul %40, %42, %cst_31 {dimension_numbers = #tpu.dot_dimension_numbers<[1], [0], [0], [1], [0, 0, 1, 1], [], []>} : vector<8x8xbf16>, vector<8x32xbf16>, vector<8x32xf32> -> vector<8x32xf32>
    %44 = arith.addf %3, %43 : vector<8x32xf32>
    %c1 = arith.constant 1 : index
    %c0_32 = arith.constant 0 : index
    %c0_33 = arith.constant 0 : index
    %45 = vector.load %arg2[%c1, %c0_32, %c0_33] : memref<4x32x8xbf16, #tpu.memory_space<vmem>>, vector<1x32x8xbf16>
    %46 = vector.shape_cast %45 : vector<1x32x8xbf16> to vector<32x8xbf16>
    %cst_34 = arith.constant dense<0.000000e+00> : vector<8x8xf32>
    %47 = tpu.matmul %2, %46, %cst_34 {dimension_numbers = #tpu.dot_dimension_numbers<[1], [0], [0], [1], [0, 0, 1, 1], [], []>} : vector<8x32xbf16>, vector<32x8xbf16>, vector<8x8xf32> -> vector<8x8xf32>
    %c1_35 = arith.constant 1 : index
    %c0_36 = arith.constant 0 : index
    %c0_37 = arith.constant 0 : index
    %48 = vector.load %arg5[%c1_35, %c0_36, %c0_37] : memref<4x1x8xf32, #tpu.memory_space<vmem>>, vector<1x1x8xf32>
    %49 = vector.shape_cast %48 : vector<1x1x8xf32> to vector<1x8xf32>
    %50 = vector.broadcast %49 : vector<1x8xf32> to vector<8x8xf32>
    %51 = arith.addf %47, %50 : vector<8x8xf32>
    %c1_38 = arith.constant 1 : index
    %c0_39 = arith.constant 0 : index
    %c0_40 = arith.constant 0 : index
    %52 = vector.load %arg3[%c1_38, %c0_39, %c0_40] : memref<4x32x8xbf16, #tpu.memory_space<vmem>>, vector<1x32x8xbf16>
    %53 = vector.shape_cast %52 : vector<1x32x8xbf16> to vector<32x8xbf16>
    %cst_41 = arith.constant dense<0.000000e+00> : vector<8x8xf32>
    %54 = tpu.matmul %2, %53, %cst_41 {dimension_numbers = #tpu.dot_dimension_numbers<[1], [0], [0], [1], [0, 0, 1, 1], [], []>} : vector<8x32xbf16>, vector<32x8xbf16>, vector<8x8xf32> -> vector<8x8xf32>
    %c1_42 = arith.constant 1 : index
    %c0_43 = arith.constant 0 : index
    %c0_44 = arith.constant 0 : index
    %55 = vector.load %arg6[%c1_42, %c0_43, %c0_44] : memref<4x1x8xf32, #tpu.memory_space<vmem>>, vector<1x1x8xf32>
    %56 = vector.shape_cast %55 : vector<1x1x8xf32> to vector<1x8xf32>
    %57 = vector.broadcast %56 : vector<1x8xf32> to vector<8x8xf32>
    %58 = arith.addf %54, %57 : vector<8x8xf32>
    %c1_45 = arith.constant 1 : index
    %c0_46 = arith.constant 0 : index
    %c0_47 = arith.constant 0 : index
    %59 = vector.load %arg4[%c1_45, %c0_46, %c0_47] : memref<4x32x8xbf16, #tpu.memory_space<vmem>>, vector<1x32x8xbf16>
    %60 = vector.shape_cast %59 : vector<1x32x8xbf16> to vector<32x8xbf16>
    %cst_48 = arith.constant dense<0.000000e+00> : vector<8x8xf32>
    %61 = tpu.matmul %2, %60, %cst_48 {dimension_numbers = #tpu.dot_dimension_numbers<[1], [0], [0], [1], [0, 0, 1, 1], [], []>} : vector<8x32xbf16>, vector<32x8xbf16>, vector<8x8xf32> -> vector<8x8xf32>
    %c1_49 = arith.constant 1 : index
    %c0_50 = arith.constant 0 : index
    %c0_51 = arith.constant 0 : index
    %62 = vector.load %arg7[%c1_49, %c0_50, %c0_51] : memref<4x1x8xf32, #tpu.memory_space<vmem>>, vector<1x1x8xf32>
    %63 = vector.shape_cast %62 : vector<1x1x8xf32> to vector<1x8xf32>
    %64 = vector.broadcast %63 : vector<1x8xf32> to vector<8x8xf32>
    %65 = arith.addf %61, %64 : vector<8x8xf32>
    %66 = tpu.transpose %58, [1, 0] : vector<8x8xf32> -> vector<8x8xf32>
    %cst_52 = arith.constant dense<0.000000e+00> : vector<8x8xf32>
    %67 = tpu.matmul %51, %66, %cst_52 {dimension_numbers = #tpu.dot_dimension_numbers<[1], [0], [0], [1], [0, 0, 1, 1], [], []>} : vector<8x8xf32>, vector<8x8xf32>, vector<8x8xf32> -> vector<8x8xf32>
    %cst_53 = arith.constant 0.353553385 : f32
    %68 = vector.broadcast %cst_53 : f32 to vector<8x8xf32>
    %69 = arith.mulf %67, %68 : vector<8x8xf32>
    %cst_54 = arith.constant dense<0xFF800000> : vector<8xf32>
    %70 = vector.multi_reduction <maximumf>, %69, %cst_54 [1] : vector<8x8xf32> to vector<8xf32>
    %71 = vector.shape_cast %70 : vector<8xf32> to vector<8x1xf32>
    %72 = vector.broadcast %71 : vector<8x1xf32> to vector<8x8xf32>
    %73 = arith.subf %69, %72 : vector<8x8xf32>
    %74 = math.exp %73 : vector<8x8xf32>
    %cst_55 = arith.constant dense<0.000000e+00> : vector<8xf32>
    %75 = vector.multi_reduction <add>, %74, %cst_55 [1] : vector<8x8xf32> to vector<8xf32>
    %76 = vector.shape_cast %75 : vector<8xf32> to vector<8x1xf32>
    %77 = tpu.reciprocal %76 {approx = true} : vector<8x1xf32> -> vector<8x1xf32>
    %78 = vector.broadcast %77 : vector<8x1xf32> to vector<8x8xf32>
    %79 = arith.mulf %74, %78 : vector<8x8xf32>
    %cst_56 = arith.constant dense<0.000000e+00> : vector<8x8xf32>
    %80 = tpu.matmul %79, %65, %cst_56 {dimension_numbers = #tpu.dot_dimension_numbers<[1], [0], [0], [1], [0, 0, 1, 1], [], []>} : vector<8x8xf32>, vector<8x8xf32>, vector<8x8xf32> -> vector<8x8xf32>
    %81 = arith.truncf %80 : vector<8x8xf32> to vector<8x8xbf16>
    %c1_57 = arith.constant 1 : index
    %c0_58 = arith.constant 0 : index
    %c0_59 = arith.constant 0 : index
    %82 = vector.load %arg8[%c1_57, %c0_58, %c0_59] : memref<4x8x32xbf16, #tpu.memory_space<vmem>>, vector<1x8x32xbf16>
    %83 = vector.shape_cast %82 : vector<1x8x32xbf16> to vector<8x32xbf16>
    %cst_60 = arith.constant dense<0.000000e+00> : vector<8x32xf32>
    %84 = tpu.matmul %81, %83, %cst_60 {dimension_numbers = #tpu.dot_dimension_numbers<[1], [0], [0], [1], [0, 0, 1, 1], [], []>} : vector<8x8xbf16>, vector<8x32xbf16>, vector<8x32xf32> -> vector<8x32xf32>
    %85 = arith.addf %44, %84 : vector<8x32xf32>
    %c2 = arith.constant 2 : index
    %c0_61 = arith.constant 0 : index
    %c0_62 = arith.constant 0 : index
    %86 = vector.load %arg2[%c2, %c0_61, %c0_62] : memref<4x32x8xbf16, #tpu.memory_space<vmem>>, vector<1x32x8xbf16>
    %87 = vector.shape_cast %86 : vector<1x32x8xbf16> to vector<32x8xbf16>
    %cst_63 = arith.constant dense<0.000000e+00> : vector<8x8xf32>
    %88 = tpu.matmul %2, %87, %cst_63 {dimension_numbers = #tpu.dot_dimension_numbers<[1], [0], [0], [1], [0, 0, 1, 1], [], []>} : vector<8x32xbf16>, vector<32x8xbf16>, vector<8x8xf32> -> vector<8x8xf32>
    %c2_64 = arith.constant 2 : index
    %c0_65 = arith.constant 0 : index
    %c0_66 = arith.constant 0 : index
    %89 = vector.load %arg5[%c2_64, %c0_65, %c0_66] : memref<4x1x8xf32, #tpu.memory_space<vmem>>, vector<1x1x8xf32>
    %90 = vector.shape_cast %89 : vector<1x1x8xf32> to vector<1x8xf32>
    %91 = vector.broadcast %90 : vector<1x8xf32> to vector<8x8xf32>
    %92 = arith.addf %88, %91 : vector<8x8xf32>
    %c2_67 = arith.constant 2 : index
    %c0_68 = arith.constant 0 : index
    %c0_69 = arith.constant 0 : index
    %93 = vector.load %arg3[%c2_67, %c0_68, %c0_69] : memref<4x32x8xbf16, #tpu.memory_space<vmem>>, vector<1x32x8xbf16>
    %94 = vector.shape_cast %93 : vector<1x32x8xbf16> to vector<32x8xbf16>
    %cst_70 = arith.constant dense<0.000000e+00> : vector<8x8xf32>
    %95 = tpu.matmul %2, %94, %cst_70 {dimension_numbers = #tpu.dot_dimension_numbers<[1], [0], [0], [1], [0, 0, 1, 1], [], []>} : vector<8x32xbf16>, vector<32x8xbf16>, vector<8x8xf32> -> vector<8x8xf32>
    %c2_71 = arith.constant 2 : index
    %c0_72 = arith.constant 0 : index
    %c0_73 = arith.constant 0 : index
    %96 = vector.load %arg6[%c2_71, %c0_72, %c0_73] : memref<4x1x8xf32, #tpu.memory_space<vmem>>, vector<1x1x8xf32>
    %97 = vector.shape_cast %96 : vector<1x1x8xf32> to vector<1x8xf32>
    %98 = vector.broadcast %97 : vector<1x8xf32> to vector<8x8xf32>
    %99 = arith.addf %95, %98 : vector<8x8xf32>
    %c2_74 = arith.constant 2 : index
    %c0_75 = arith.constant 0 : index
    %c0_76 = arith.constant 0 : index
    %100 = vector.load %arg4[%c2_74, %c0_75, %c0_76] : memref<4x32x8xbf16, #tpu.memory_space<vmem>>, vector<1x32x8xbf16>
    %101 = vector.shape_cast %100 : vector<1x32x8xbf16> to vector<32x8xbf16>
    %cst_77 = arith.constant dense<0.000000e+00> : vector<8x8xf32>
    %102 = tpu.matmul %2, %101, %cst_77 {dimension_numbers = #tpu.dot_dimension_numbers<[1], [0], [0], [1], [0, 0, 1, 1], [], []>} : vector<8x32xbf16>, vector<32x8xbf16>, vector<8x8xf32> -> vector<8x8xf32>
    %c2_78 = arith.constant 2 : index
    %c0_79 = arith.constant 0 : index
    %c0_80 = arith.constant 0 : index
    %103 = vector.load %arg7[%c2_78, %c0_79, %c0_80] : memref<4x1x8xf32, #tpu.memory_space<vmem>>, vector<1x1x8xf32>
    %104 = vector.shape_cast %103 : vector<1x1x8xf32> to vector<1x8xf32>
    %105 = vector.broadcast %104 : vector<1x8xf32> to vector<8x8xf32>
    %106 = arith.addf %102, %105 : vector<8x8xf32>
    %107 = tpu.transpose %99, [1, 0] : vector<8x8xf32> -> vector<8x8xf32>
    %cst_81 = arith.constant dense<0.000000e+00> : vector<8x8xf32>
    %108 = tpu.matmul %92, %107, %cst_81 {dimension_numbers = #tpu.dot_dimension_numbers<[1], [0], [0], [1], [0, 0, 1, 1], [], []>} : vector<8x8xf32>, vector<8x8xf32>, vector<8x8xf32> -> vector<8x8xf32>
    %cst_82 = arith.constant 0.353553385 : f32
    %109 = vector.broadcast %cst_82 : f32 to vector<8x8xf32>
    %110 = arith.mulf %108, %109 : vector<8x8xf32>
    %cst_83 = arith.constant dense<0xFF800000> : vector<8xf32>
    %111 = vector.multi_reduction <maximumf>, %110, %cst_83 [1] : vector<8x8xf32> to vector<8xf32>
    %112 = vector.shape_cast %111 : vector<8xf32> to vector<8x1xf32>
    %113 = vector.broadcast %112 : vector<8x1xf32> to vector<8x8xf32>
    %114 = arith.subf %110, %113 : vector<8x8xf32>
    %115 = math.exp %114 : vector<8x8xf32>
    %cst_84 = arith.constant dense<0.000000e+00> : vector<8xf32>
    %116 = vector.multi_reduction <add>, %115, %cst_84 [1] : vector<8x8xf32> to vector<8xf32>
    %117 = vector.shape_cast %116 : vector<8xf32> to vector<8x1xf32>
    %118 = tpu.reciprocal %117 {approx = true} : vector<8x1xf32> -> vector<8x1xf32>
    %119 = vector.broadcast %118 : vector<8x1xf32> to vector<8x8xf32>
    %120 = arith.mulf %115, %119 : vector<8x8xf32>
    %cst_85 = arith.constant dense<0.000000e+00> : vector<8x8xf32>
    %121 = tpu.matmul %120, %106, %cst_85 {dimension_numbers = #tpu.dot_dimension_numbers<[1], [0], [0], [1], [0, 0, 1, 1], [], []>} : vector<8x8xf32>, vector<8x8xf32>, vector<8x8xf32> -> vector<8x8xf32>
    %122 = arith.truncf %121 : vector<8x8xf32> to vector<8x8xbf16>
    %c2_86 = arith.constant 2 : index
    %c0_87 = arith.constant 0 : index
    %c0_88 = arith.constant 0 : index
    %123 = vector.load %arg8[%c2_86, %c0_87, %c0_88] : memref<4x8x32xbf16, #tpu.memory_space<vmem>>, vector<1x8x32xbf16>
    %124 = vector.shape_cast %123 : vector<1x8x32xbf16> to vector<8x32xbf16>
    %cst_89 = arith.constant dense<0.000000e+00> : vector<8x32xf32>
    %125 = tpu.matmul %122, %124, %cst_89 {dimension_numbers = #tpu.dot_dimension_numbers<[1], [0], [0], [1], [0, 0, 1, 1], [], []>} : vector<8x8xbf16>, vector<8x32xbf16>, vector<8x32xf32> -> vector<8x32xf32>
    %126 = arith.addf %85, %125 : vector<8x32xf32>
    %c3 = arith.constant 3 : index
    %c0_90 = arith.constant 0 : index
    %c0_91 = arith.constant 0 : index
    %127 = vector.load %arg2[%c3, %c0_90, %c0_91] : memref<4x32x8xbf16, #tpu.memory_space<vmem>>, vector<1x32x8xbf16>
    %128 = vector.shape_cast %127 : vector<1x32x8xbf16> to vector<32x8xbf16>
    %cst_92 = arith.constant dense<0.000000e+00> : vector<8x8xf32>
    %129 = tpu.matmul %2, %128, %cst_92 {dimension_numbers = #tpu.dot_dimension_numbers<[1], [0], [0], [1], [0, 0, 1, 1], [], []>} : vector<8x32xbf16>, vector<32x8xbf16>, vector<8x8xf32> -> vector<8x8xf32>
    %c3_93 = arith.constant 3 : index
    %c0_94 = arith.constant 0 : index
    %c0_95 = arith.constant 0 : index
    %130 = vector.load %arg5[%c3_93, %c0_94, %c0_95] : memref<4x1x8xf32, #tpu.memory_space<vmem>>, vector<1x1x8xf32>
    %131 = vector.shape_cast %130 : vector<1x1x8xf32> to vector<1x8xf32>
    %132 = vector.broadcast %131 : vector<1x8xf32> to vector<8x8xf32>
    %133 = arith.addf %129, %132 : vector<8x8xf32>
    %c3_96 = arith.constant 3 : index
    %c0_97 = arith.constant 0 : index
    %c0_98 = arith.constant 0 : index
    %134 = vector.load %arg3[%c3_96, %c0_97, %c0_98] : memref<4x32x8xbf16, #tpu.memory_space<vmem>>, vector<1x32x8xbf16>
    %135 = vector.shape_cast %134 : vector<1x32x8xbf16> to vector<32x8xbf16>
    %cst_99 = arith.constant dense<0.000000e+00> : vector<8x8xf32>
    %136 = tpu.matmul %2, %135, %cst_99 {dimension_numbers = #tpu.dot_dimension_numbers<[1], [0], [0], [1], [0, 0, 1, 1], [], []>} : vector<8x32xbf16>, vector<32x8xbf16>, vector<8x8xf32> -> vector<8x8xf32>
    %c3_100 = arith.constant 3 : index
    %c0_101 = arith.constant 0 : index
    %c0_102 = arith.constant 0 : index
    %137 = vector.load %arg6[%c3_100, %c0_101, %c0_102] : memref<4x1x8xf32, #tpu.memory_space<vmem>>, vector<1x1x8xf32>
    %138 = vector.shape_cast %137 : vector<1x1x8xf32> to vector<1x8xf32>
    %139 = vector.broadcast %138 : vector<1x8xf32> to vector<8x8xf32>
    %140 = arith.addf %136, %139 : vector<8x8xf32>
    %c3_103 = arith.constant 3 : index
    %c0_104 = arith.constant 0 : index
    %c0_105 = arith.constant 0 : index
    %141 = vector.load %arg4[%c3_103, %c0_104, %c0_105] : memref<4x32x8xbf16, #tpu.memory_space<vmem>>, vector<1x32x8xbf16>
    %142 = vector.shape_cast %141 : vector<1x32x8xbf16> to vector<32x8xbf16>
    %cst_106 = arith.constant dense<0.000000e+00> : vector<8x8xf32>
    %143 = tpu.matmul %2, %142, %cst_106 {dimension_numbers = #tpu.dot_dimension_numbers<[1], [0], [0], [1], [0, 0, 1, 1], [], []>} : vector<8x32xbf16>, vector<32x8xbf16>, vector<8x8xf32> -> vector<8x8xf32>
    %c3_107 = arith.constant 3 : index
    %c0_108 = arith.constant 0 : index
    %c0_109 = arith.constant 0 : index
    %144 = vector.load %arg7[%c3_107, %c0_108, %c0_109] : memref<4x1x8xf32, #tpu.memory_space<vmem>>, vector<1x1x8xf32>
    %145 = vector.shape_cast %144 : vector<1x1x8xf32> to vector<1x8xf32>
    %146 = vector.broadcast %145 : vector<1x8xf32> to vector<8x8xf32>
    %147 = arith.addf %143, %146 : vector<8x8xf32>
    %148 = tpu.transpose %140, [1, 0] : vector<8x8xf32> -> vector<8x8xf32>
    %cst_110 = arith.constant dense<0.000000e+00> : vector<8x8xf32>
    %149 = tpu.matmul %133, %148, %cst_110 {dimension_numbers = #tpu.dot_dimension_numbers<[1], [0], [0], [1], [0, 0, 1, 1], [], []>} : vector<8x8xf32>, vector<8x8xf32>, vector<8x8xf32> -> vector<8x8xf32>
    %cst_111 = arith.constant 0.353553385 : f32
    %150 = vector.broadcast %cst_111 : f32 to vector<8x8xf32>
    %151 = arith.mulf %149, %150 : vector<8x8xf32>
    %cst_112 = arith.constant dense<0xFF800000> : vector<8xf32>
    %152 = vector.multi_reduction <maximumf>, %151, %cst_112 [1] : vector<8x8xf32> to vector<8xf32>
    %153 = vector.shape_cast %152 : vector<8xf32> to vector<8x1xf32>
    %154 = vector.broadcast %153 : vector<8x1xf32> to vector<8x8xf32>
    %155 = arith.subf %151, %154 : vector<8x8xf32>
    %156 = math.exp %155 : vector<8x8xf32>
    %cst_113 = arith.constant dense<0.000000e+00> : vector<8xf32>
    %157 = vector.multi_reduction <add>, %156, %cst_113 [1] : vector<8x8xf32> to vector<8xf32>
    %158 = vector.shape_cast %157 : vector<8xf32> to vector<8x1xf32>
    %159 = tpu.reciprocal %158 {approx = true} : vector<8x1xf32> -> vector<8x1xf32>
    %160 = vector.broadcast %159 : vector<8x1xf32> to vector<8x8xf32>
    %161 = arith.mulf %156, %160 : vector<8x8xf32>
    %cst_114 = arith.constant dense<0.000000e+00> : vector<8x8xf32>
    %162 = tpu.matmul %161, %147, %cst_114 {dimension_numbers = #tpu.dot_dimension_numbers<[1], [0], [0], [1], [0, 0, 1, 1], [], []>} : vector<8x8xf32>, vector<8x8xf32>, vector<8x8xf32> -> vector<8x8xf32>
    %163 = arith.truncf %162 : vector<8x8xf32> to vector<8x8xbf16>
    %c3_115 = arith.constant 3 : index
    %c0_116 = arith.constant 0 : index
    %c0_117 = arith.constant 0 : index
    %164 = vector.load %arg8[%c3_115, %c0_116, %c0_117] : memref<4x8x32xbf16, #tpu.memory_space<vmem>>, vector<1x8x32xbf16>
    %165 = vector.shape_cast %164 : vector<1x8x32xbf16> to vector<8x32xbf16>
    %cst_118 = arith.constant dense<0.000000e+00> : vector<8x32xf32>
    %166 = tpu.matmul %163, %165, %cst_118 {dimension_numbers = #tpu.dot_dimension_numbers<[1], [0], [0], [1], [0, 0, 1, 1], [], []>} : vector<8x8xbf16>, vector<8x32xbf16>, vector<8x32xf32> -> vector<8x32xf32>
    %167 = arith.addf %126, %166 : vector<8x32xf32>
    %c0_119 = arith.constant 0 : index
    %c0_120 = arith.constant 0 : index
    %168 = vector.load %arg9[%c0_119, %c0_120] : memref<1x32xf32, #tpu.memory_space<vmem>>, vector<1x32xf32>
    %169 = vector.broadcast %168 : vector<1x32xf32> to vector<8x32xf32>
    %170 = arith.addf %167, %169 : vector<8x32xf32>
    %171 = arith.addf %1, %170 : vector<8x32xf32>
    %cst_121 = arith.constant dense<0.000000e+00> : vector<8xf32>
    %172 = vector.multi_reduction <add>, %171, %cst_121 [1] : vector<8x32xf32> to vector<8xf32>
    %173 = vector.shape_cast %172 : vector<8xf32> to vector<8x1xf32>
    %cst_122 = arith.constant 3.200000e+01 : f32
    %174 = vector.broadcast %cst_122 : f32 to vector<8x1xf32>
    %175 = arith.divf %173, %174 : vector<8x1xf32>
    %176 = vector.broadcast %175 : vector<8x1xf32> to vector<8x32xf32>
    %177 = arith.subf %171, %176 : vector<8x32xf32>
    %178 = arith.mulf %177, %177 : vector<8x32xf32>
    %cst_123 = arith.constant dense<0.000000e+00> : vector<8xf32>
    %179 = vector.multi_reduction <add>, %178, %cst_123 [1] : vector<8x32xf32> to vector<8xf32>
    %180 = vector.shape_cast %179 : vector<8xf32> to vector<8x1xf32>
    %cst_124 = arith.constant 3.200000e+01 : f32
    %181 = vector.broadcast %cst_124 : f32 to vector<8x1xf32>
    %182 = arith.divf %180, %181 : vector<8x1xf32>
    %183 = vector.broadcast %175 : vector<8x1xf32> to vector<8x32xf32>
    %184 = arith.subf %171, %183 : vector<8x32xf32>
    %cst_125 = arith.constant 9.99999974E-6 : f32
    %185 = vector.broadcast %cst_125 : f32 to vector<8x1xf32>
    %186 = arith.addf %182, %185 : vector<8x1xf32>
    %187 = math.rsqrt %186 : vector<8x1xf32>
    %188 = vector.broadcast %187 : vector<8x1xf32> to vector<8x32xf32>
    %189 = arith.mulf %184, %188 : vector<8x32xf32>
    %c0_126 = arith.constant 0 : index
    %c0_127 = arith.constant 0 : index
    %190 = vector.load %arg10[%c0_126, %c0_127] : memref<1x32xf32, #tpu.memory_space<vmem>>, vector<1x32xf32>
    %191 = vector.broadcast %190 : vector<1x32xf32> to vector<8x32xf32>
    %192 = arith.mulf %189, %191 : vector<8x32xf32>
    %c0_128 = arith.constant 0 : index
    %c0_129 = arith.constant 0 : index
    %193 = vector.load %arg11[%c0_128, %c0_129] : memref<1x32xf32, #tpu.memory_space<vmem>>, vector<1x32xf32>
    %194 = vector.broadcast %193 : vector<1x32xf32> to vector<8x32xf32>
    %195 = arith.addf %192, %194 : vector<8x32xf32>
    %c0_130 = arith.constant 0 : index
    %c0_131 = arith.constant 0 : index
    %c0_132 = arith.constant 0 : index
    %196 = vector.load %arg12[%c0_130, %c0_131, %c0_132] : memref<1x8x32xf32, #tpu.memory_space<vmem>>, vector<1x8x32xf32>
    %197 = vector.shape_cast %196 : vector<1x8x32xf32> to vector<8x32xf32>
    %198 = vector.shape_cast %195 : vector<8x32xf32> to vector<1x8x32xf32>
    tpu.vector_store %arg12[%c0_130, %c0_131, %c0_132], %198 {strides = array<i32>} : memref<1x8x32xf32, #tpu.memory_space<vmem>>, vector<1x8x32xf32>,
    return
  }
  func.func @transform_0(%arg0: i32) -> (i32, i32, i32) {
    %c0_i32 = arith.constant 0 : i32
    %c0_i32_0 = arith.constant 0 : i32
    %c0_i32_1 = arith.constant 0 : i32
    return %arg0, %c0_i32, %c0_i32_0 : i32, i32, i32
  }
  func.func @transform_1(%arg0: i32) -> (i32, i32, i32) {
    %c0_i32 = arith.constant 0 : i32
    %c0_i32_0 = arith.constant 0 : i32
    %c0_i32_1 = arith.constant 0 : i32
    %c0_i32_2 = arith.constant 0 : i32
    return %c0_i32, %c0_i32_0, %c0_i32_1 : i32, i32, i32
  }
  func.func @transform_2(%arg0: i32) -> (i32, i32, i32) {
    %c0_i32 = arith.constant 0 : i32
    %c0_i32_0 = arith.constant 0 : i32
    %c0_i32_1 = arith.constant 0 : i32
    %c0_i32_2 = arith.constant 0 : i32
    return %c0_i32, %c0_i32_0, %c0_i32_1 : i32, i32, i32
  }
  func.func @transform_3(%arg0: i32) -> (i32, i32, i32) {
    %c0_i32 = arith.constant 0 : i32
    %c0_i32_0 = arith.constant 0 : i32
    %c0_i32_1 = arith.constant 0 : i32
    %c0_i32_2 = arith.constant 0 : i32
    return %c0_i32, %c0_i32_0, %c0_i32_1 : i32, i32, i32
  }
  func.func @transform_4(%arg0: i32) -> (i32, i32, i32) {
    %c0_i32 = arith.constant 0 : i32
    %c0_i32_0 = arith.constant 0 : i32
    %c0_i32_1 = arith.constant 0 : i32
    %c0_i32_2 = arith.constant 0 : i32
    return %c0_i32, %c0_i32_0, %c0_i32_1 : i32, i32, i32
  }
  func.func @transform_5(%arg0: i32) -> (i32, i32, i32) {
    %c0_i32 = arith.constant 0 : i32
    %c0_i32_0 = arith.constant 0 : i32
    %c0_i32_1 = arith.constant 0 : i32
    %c0_i32_2 = arith.constant 0 : i32
    return %c0_i32, %c0_i32_0, %c0_i32_1 : i32, i32, i32
  }
  func.func @transform_6(%arg0: i32) -> (i32, i32, i32) {
    %c0_i32 = arith.constant 0 : i32
    %c0_i32_0 = arith.constant 0 : i32
    %c0_i32_1 = arith.constant 0 : i32
    %c0_i32_2 = arith.constant 0 : i32
    return %c0_i32, %c0_i32_0, %c0_i32_1 : i32, i32, i32
  }
  func.func @transform_7(%arg0: i32) -> (i32, i32, i32) {
    %c0_i32 = arith.constant 0 : i32
    %c0_i32_0 = arith.constant 0 : i32
    %c0_i32_1 = arith.constant 0 : i32
    %c0_i32_2 = arith.constant 0 : i32
    return %c0_i32, %c0_i32_0, %c0_i32_1 : i32, i32, i32
  }
  func.func @transform_8(%arg0: i32) -> (i32, i32) {
    %c0_i32 = arith.constant 0 : i32
    %c0_i32_0 = arith.constant 0 : i32
    %c0_i32_1 = arith.constant 0 : i32
    return %c0_i32, %c0_i32_0 : i32, i32
  }
  func.func @transform_9(%arg0: i32) -> (i32, i32) {
    %c0_i32 = arith.constant 0 : i32
    %c0_i32_0 = arith.constant 0 : i32
    %c0_i32_1 = arith.constant 0 : i32
    return %c0_i32, %c0_i32_0 : i32, i32
  }
  func.func @transform_10(%arg0: i32) -> (i32, i32) {
    %c0_i32 = arith.constant 0 : i32
    %c0_i32_0 = arith.constant 0 : i32
    %c0_i32_1 = arith.constant 0 : i32
    return %c0_i32, %c0_i32_0 : i32, i32
  }
  func.func @transform_11(%arg0: i32) -> (i32, i32, i32) {
    %c0_i32 = arith.constant 0 : i32
    %c0_i32_0 = arith.constant 0 : i32
    %c0_i32_1 = arith.constant 0 : i32
    return %arg0, %c0_i32, %c0_i32_0 : i32, i32, i32
  }
}

module attributes {stable_mosaic.version = 11 : i64} {
  func.func @_ffn_block_kernel(%arg0: i32, %arg1: memref<1x8x32xf32, #tpu.memory_space<vmem>>, %arg2: memref<32x2048xbf16, #tpu.memory_space<vmem>>, %arg3: memref<1x2048xf32, #tpu.memory_space<vmem>>, %arg4: memref<2048x32xbf16, #tpu.memory_space<vmem>>, %arg5: memref<1x32xf32, #tpu.memory_space<vmem>>, %arg6: memref<1x32xf32, #tpu.memory_space<vmem>>, %arg7: memref<1x32xf32, #tpu.memory_space<vmem>>, %arg8: memref<1x8x32xf32, #tpu.memory_space<vmem>>) attributes {dimension_semantics = [#tpu.dimension_semantics<parallel>], iteration_bounds = array<i64: 2>, scalar_prefetch = 0 : i64, scratch_operands = 0 : i64, tpu.core_type = #tpu.core_type<tc>, window_params = [{transform_indices = @transform_0, window_bounds = array<i64: 1, 8, 32>}, {pipeline_mode = #tpu.pipeline_mode<synchronous>, transform_indices = @transform_1, window_bounds = array<i64: 32, 2048>}, {pipeline_mode = #tpu.pipeline_mode<synchronous>, transform_indices = @transform_2, window_bounds = array<i64: 1, 2048>}, {pipeline_mode = #tpu.pipeline_mode<synchronous>, transform_indices = @transform_3, window_bounds = array<i64: 2048, 32>}, {pipeline_mode = #tpu.pipeline_mode<synchronous>, transform_indices = @transform_4, window_bounds = array<i64: 1, 32>}, {pipeline_mode = #tpu.pipeline_mode<synchronous>, transform_indices = @transform_5, window_bounds = array<i64: 1, 32>}, {pipeline_mode = #tpu.pipeline_mode<synchronous>, transform_indices = @transform_6, window_bounds = array<i64: 1, 32>}, {transform_indices = @transform_7, window_bounds = array<i64: 1, 8, 32>}]} {
    %c0 = arith.constant 0 : index
    %c0_0 = arith.constant 0 : index
    %c0_1 = arith.constant 0 : index
    %0 = vector.load %arg1[%c0, %c0_0, %c0_1] : memref<1x8x32xf32, #tpu.memory_space<vmem>>, vector<1x8x32xf32>
    %1 = vector.shape_cast %0 : vector<1x8x32xf32> to vector<8x32xf32>
    %2 = arith.truncf %1 : vector<8x32xf32> to vector<8x32xbf16>
    %c0_2 = arith.constant 0 : index
    %c0_3 = arith.constant 0 : index
    %3 = vector.load %arg2[%c0_2, %c0_3] : memref<32x2048xbf16, #tpu.memory_space<vmem>>, vector<32x2048xbf16>
    %cst = arith.constant dense<0.000000e+00> : vector<8x2048xf32>
    %4 = tpu.matmul %2, %3, %cst {dimension_numbers = #tpu.dot_dimension_numbers<[1], [0], [0], [1], [0, 0, 1, 1], [], []>} : vector<8x32xbf16>, vector<32x2048xbf16>, vector<8x2048xf32> -> vector<8x2048xf32>
    %c0_4 = arith.constant 0 : index
    %c0_5 = arith.constant 0 : index
    %5 = vector.load %arg3[%c0_4, %c0_5] : memref<1x2048xf32, #tpu.memory_space<vmem>>, vector<1x2048xf32>
    %6 = vector.broadcast %5 : vector<1x2048xf32> to vector<8x2048xf32>
    %7 = arith.addf %4, %6 : vector<8x2048xf32>
    %cst_6 = arith.constant 0.000000e+00 : f32
    %8 = vector.broadcast %cst_6 : f32 to vector<8x2048xf32>
    %9 = arith.maximumf %7, %8 : vector<8x2048xf32>
    %10 = arith.truncf %9 : vector<8x2048xf32> to vector<8x2048xbf16>
    %c0_7 = arith.constant 0 : index
    %c0_8 = arith.constant 0 : index
    %11 = vector.load %arg4[%c0_7, %c0_8] : memref<2048x32xbf16, #tpu.memory_space<vmem>>, vector<2048x32xbf16>
    %cst_9 = arith.constant dense<0.000000e+00> : vector<8x32xf32>
    %12 = tpu.matmul %10, %11, %cst_9 {dimension_numbers = #tpu.dot_dimension_numbers<[1], [0], [0], [1], [0, 0, 1, 1], [], []>} : vector<8x2048xbf16>, vector<2048x32xbf16>, vector<8x32xf32> -> vector<8x32xf32>
    %c0_10 = arith.constant 0 : index
    %c0_11 = arith.constant 0 : index
    %13 = vector.load %arg5[%c0_10, %c0_11] : memref<1x32xf32, #tpu.memory_space<vmem>>, vector<1x32xf32>
    %14 = vector.broadcast %13 : vector<1x32xf32> to vector<8x32xf32>
    %15 = arith.addf %12, %14 : vector<8x32xf32>
    %16 = arith.addf %1, %15 : vector<8x32xf32>
    %cst_12 = arith.constant dense<0.000000e+00> : vector<8xf32>
    %17 = vector.multi_reduction <add>, %16, %cst_12 [1] : vector<8x32xf32> to vector<8xf32>
    %18 = vector.shape_cast %17 : vector<8xf32> to vector<8x1xf32>
    %cst_13 = arith.constant 3.200000e+01 : f32
    %19 = vector.broadcast %cst_13 : f32 to vector<8x1xf32>
    %20 = arith.divf %18, %19 : vector<8x1xf32>
    %21 = vector.broadcast %20 : vector<8x1xf32> to vector<8x32xf32>
    %22 = arith.subf %16, %21 : vector<8x32xf32>
    %23 = arith.mulf %22, %22 : vector<8x32xf32>
    %cst_14 = arith.constant dense<0.000000e+00> : vector<8xf32>
    %24 = vector.multi_reduction <add>, %23, %cst_14 [1] : vector<8x32xf32> to vector<8xf32>
    %25 = vector.shape_cast %24 : vector<8xf32> to vector<8x1xf32>
    %cst_15 = arith.constant 3.200000e+01 : f32
    %26 = vector.broadcast %cst_15 : f32 to vector<8x1xf32>
    %27 = arith.divf %25, %26 : vector<8x1xf32>
    %28 = vector.broadcast %20 : vector<8x1xf32> to vector<8x32xf32>
    %29 = arith.subf %16, %28 : vector<8x32xf32>
    %cst_16 = arith.constant 9.99999974E-6 : f32
    %30 = vector.broadcast %cst_16 : f32 to vector<8x1xf32>
    %31 = arith.addf %27, %30 : vector<8x1xf32>
    %32 = math.rsqrt %31 : vector<8x1xf32>
    %33 = vector.broadcast %32 : vector<8x1xf32> to vector<8x32xf32>
    %34 = arith.mulf %29, %33 : vector<8x32xf32>
    %c0_17 = arith.constant 0 : index
    %c0_18 = arith.constant 0 : index
    %35 = vector.load %arg6[%c0_17, %c0_18] : memref<1x32xf32, #tpu.memory_space<vmem>>, vector<1x32xf32>
    %36 = vector.broadcast %35 : vector<1x32xf32> to vector<8x32xf32>
    %37 = arith.mulf %34, %36 : vector<8x32xf32>
    %c0_19 = arith.constant 0 : index
    %c0_20 = arith.constant 0 : index
    %38 = vector.load %arg7[%c0_19, %c0_20] : memref<1x32xf32, #tpu.memory_space<vmem>>, vector<1x32xf32>
    %39 = vector.broadcast %38 : vector<1x32xf32> to vector<8x32xf32>
    %40 = arith.addf %37, %39 : vector<8x32xf32>
    %c0_21 = arith.constant 0 : index
    %c0_22 = arith.constant 0 : index
    %c0_23 = arith.constant 0 : index
    %41 = vector.load %arg8[%c0_21, %c0_22, %c0_23] : memref<1x8x32xf32, #tpu.memory_space<vmem>>, vector<1x8x32xf32>
    %42 = vector.shape_cast %41 : vector<1x8x32xf32> to vector<8x32xf32>
    %43 = vector.shape_cast %40 : vector<8x32xf32> to vector<1x8x32xf32>
    tpu.vector_store %arg8[%c0_21, %c0_22, %c0_23], %43 {strides = array<i32>} : memref<1x8x32xf32, #tpu.memory_space<vmem>>, vector<1x8x32xf32>,
    return
  }
  func.func @transform_0(%arg0: i32) -> (i32, i32, i32) {
    %c0_i32 = arith.constant 0 : i32
    %c0_i32_0 = arith.constant 0 : i32
    %c0_i32_1 = arith.constant 0 : i32
    return %arg0, %c0_i32, %c0_i32_0 : i32, i32, i32
  }
  func.func @transform_1(%arg0: i32) -> (i32, i32) {
    %c0_i32 = arith.constant 0 : i32
    %c0_i32_0 = arith.constant 0 : i32
    %c0_i32_1 = arith.constant 0 : i32
    return %c0_i32, %c0_i32_0 : i32, i32
  }
  func.func @transform_2(%arg0: i32) -> (i32, i32) {
    %c0_i32 = arith.constant 0 : i32
    %c0_i32_0 = arith.constant 0 : i32
    %c0_i32_1 = arith.constant 0 : i32
    return %c0_i32, %c0_i32_0 : i32, i32
  }
  func.func @transform_3(%arg0: i32) -> (i32, i32) {
    %c0_i32 = arith.constant 0 : i32
    %c0_i32_0 = arith.constant 0 : i32
    %c0_i32_1 = arith.constant 0 : i32
    return %c0_i32, %c0_i32_0 : i32, i32
  }
  func.func @transform_4(%arg0: i32) -> (i32, i32) {
    %c0_i32 = arith.constant 0 : i32
    %c0_i32_0 = arith.constant 0 : i32
    %c0_i32_1 = arith.constant 0 : i32
    return %c0_i32, %c0_i32_0 : i32, i32
  }
  func.func @transform_5(%arg0: i32) -> (i32, i32) {
    %c0_i32 = arith.constant 0 : i32
    %c0_i32_0 = arith.constant 0 : i32
    %c0_i32_1 = arith.constant 0 : i32
    return %c0_i32, %c0_i32_0 : i32, i32
  }
  func.func @transform_6(%arg0: i32) -> (i32, i32) {
    %c0_i32 = arith.constant 0 : i32
    %c0_i32_0 = arith.constant 0 : i32
    %c0_i32_1 = arith.constant 0 : i32
    return %c0_i32, %c0_i32_0 : i32, i32
  }
  func.func @transform_7(%arg0: i32) -> (i32, i32, i32) {
    %c0_i32 = arith.constant 0 : i32
    %c0_i32_0 = arith.constant 0 : i32
    %c0_i32_1 = arith.constant 0 : i32
    return %arg0, %c0_i32, %c0_i32_0 : i32, i32, i32
  }
}

module attributes {stable_mosaic.version = 11 : i64} {
  func.func @_matmul_affine_kernel(%arg0: i32, %arg1: memref<16x32xbf16, #tpu.memory_space<vmem>>, %arg2: memref<32x3xbf16, #tpu.memory_space<vmem>>, %arg3: memref<1x3xf32, #tpu.memory_space<vmem>>, %arg4: memref<1x3xf32, #tpu.memory_space<vmem>>, %arg5: memref<16x3xf32, #tpu.memory_space<vmem>>) attributes {dimension_semantics = [#tpu.dimension_semantics<parallel>], iteration_bounds = array<i64: 1>, scalar_prefetch = 0 : i64, scratch_operands = 0 : i64, tpu.core_type = #tpu.core_type<tc>, window_params = [{transform_indices = @transform_0, window_bounds = array<i64: 16, 32>}, {pipeline_mode = #tpu.pipeline_mode<synchronous>, transform_indices = @transform_1, window_bounds = array<i64: 32, 3>}, {pipeline_mode = #tpu.pipeline_mode<synchronous>, transform_indices = @transform_2, window_bounds = array<i64: 1, 3>}, {pipeline_mode = #tpu.pipeline_mode<synchronous>, transform_indices = @transform_3, window_bounds = array<i64: 1, 3>}, {transform_indices = @transform_4, window_bounds = array<i64: 16, 3>}]} {
    %c0 = arith.constant 0 : index
    %c0_0 = arith.constant 0 : index
    %0 = vector.load %arg1[%c0, %c0_0] : memref<16x32xbf16, #tpu.memory_space<vmem>>, vector<16x32xbf16>
    %c0_1 = arith.constant 0 : index
    %c0_2 = arith.constant 0 : index
    %1 = vector.load %arg2[%c0_1, %c0_2] : memref<32x3xbf16, #tpu.memory_space<vmem>>, vector<32x3xbf16>
    %cst = arith.constant dense<0.000000e+00> : vector<16x3xf32>
    %2 = tpu.matmul %0, %1, %cst {dimension_numbers = #tpu.dot_dimension_numbers<[1], [0], [0], [1], [0, 0, 1, 1], [], []>} : vector<16x32xbf16>, vector<32x3xbf16>, vector<16x3xf32> -> vector<16x3xf32>
    %c0_3 = arith.constant 0 : index
    %c0_4 = arith.constant 0 : index
    %3 = vector.load %arg3[%c0_3, %c0_4] : memref<1x3xf32, #tpu.memory_space<vmem>>, vector<1x3xf32>
    %4 = vector.broadcast %3 : vector<1x3xf32> to vector<16x3xf32>
    %5 = arith.mulf %2, %4 : vector<16x3xf32>
    %c0_5 = arith.constant 0 : index
    %c0_6 = arith.constant 0 : index
    %6 = vector.load %arg4[%c0_5, %c0_6] : memref<1x3xf32, #tpu.memory_space<vmem>>, vector<1x3xf32>
    %7 = vector.broadcast %6 : vector<1x3xf32> to vector<16x3xf32>
    %8 = arith.addf %5, %7 : vector<16x3xf32>
    %c0_7 = arith.constant 0 : index
    %c0_8 = arith.constant 0 : index
    %9 = vector.load %arg5[%c0_7, %c0_8] : memref<16x3xf32, #tpu.memory_space<vmem>>, vector<16x3xf32>
    tpu.vector_store %arg5[%c0_7, %c0_8], %8 {strides = array<i32>} : memref<16x3xf32, #tpu.memory_space<vmem>>, vector<16x3xf32>,
    return
  }
  func.func @transform_0(%arg0: i32) -> (i32, i32) {
    %c0_i32 = arith.constant 0 : i32
    %c0_i32_0 = arith.constant 0 : i32
    return %arg0, %c0_i32 : i32, i32
  }
  func.func @transform_1(%arg0: i32) -> (i32, i32) {
    %c0_i32 = arith.constant 0 : i32
    %c0_i32_0 = arith.constant 0 : i32
    %c0_i32_1 = arith.constant 0 : i32
    return %c0_i32, %c0_i32_0 : i32, i32
  }
  func.func @transform_2(%arg0: i32) -> (i32, i32) {
    %c0_i32 = arith.constant 0 : i32
    %c0_i32_0 = arith.constant 0 : i32
    %c0_i32_1 = arith.constant 0 : i32
    return %c0_i32, %c0_i32_0 : i32, i32
  }
  func.func @transform_3(%arg0: i32) -> (i32, i32) {
    %c0_i32 = arith.constant 0 : i32
    %c0_i32_0 = arith.constant 0 : i32
    %c0_i32_1 = arith.constant 0 : i32
    return %c0_i32, %c0_i32_0 : i32, i32
  }
  func.func @transform_4(%arg0: i32) -> (i32, i32) {
    %c0_i32 = arith.constant 0 : i32
    %c0_i32_0 = arith.constant 0 : i32
    return %arg0, %c0_i32 : i32, i32
  }
}

</mosaic_0001>

<bundles_post_ra>
// kernel: forward.9
= control target key start
LH: loop header
LB: loop body
LE: loop exit
PB: predicated region body
PF: predicated region fallthrough
CT: control target
= control target key end

     0   :  { %s640_s15 = smov 0   ;;  %s748_s0 = inlined_call_operand.vmem [shape: bf16[256,9], index: 0, kind: input, shape index: {}]   ;;  %s749_s1 = inlined_call_operand.vmem [shape: bf16[9,32], index: 1, kind: input, shape index: {}]   ;;  %s750_s2 = inlined_call_operand.vmem [shape: f32[1,32], index: 2, kind: input, shape index: {}]   ;;  %s751_s3 = inlined_call_operand.vmem [shape: f32[1,32], index: 3, kind: input, shape index: {}]   ;;  %s752_s4 = inlined_call_operand.vmem [shape: f32[256,32], index: 4, kind: output, shape index: {}]  }
   0x1 LB: > { %s529_s16 = sadd.s32 4294967295, %s612_s15   ;;  %p533_p0 = scmp.ge.s32.totalorder %s612_s15, 1  ;;  %s612_s15 = sphi %s640_s15, %s14_s15  }
   0x2   : > { %p163_p1 = scmp.lt.s32.totalorder %s612_s15, 3 }
   0x4   : > { %p164_p2 = pnand %p533_p0, %p163_p1 }
   0x5   : > { %s534_s19 = sshll.u32 (!%p164_p2), %s529_s16, 4 }
   0x6   : > { %167 = sbr.rel (%p164_p2) target bundleno = 235 (0xeb), region = 36  ;;  %p190_p3 = scmp.lt.s32.totalorder (!%p164_p2), %s534_s19, 31 }
   0xb   : > { %v597_v0 = vld [vmem:[%s749_s1] sm:$0x1f]   ;;  %vm290_vm0 = vcmask 1043456   ;;  %vm291_vm1 = vcmask 1044480   ;;  %v614_v1 = vmov 65535   ;;  %s754_s19 = smov (!%p190_p3, %s534_s19), 31 }
   0xc   : > { %v292_v2 = vsel %vm290_vm0, 4294967295, %v614_v1  ;;  %s535_s20 = sshll.u32 %s754_s19, 2  ;;  %vm265_vm2 = vcmask 72704   ;;  %v668_v13 = vld [vmem:[%s750_s2] ss:$0 sm:$0xff]  ;;  %s537_s28 = sshll.u32 %s754_s19, 3 }
   0xd   : > { %v293_v3 = vsel %vm291_vm1, %v292_v2, 0  ;;  %s193_s23 = scalar_lea.vmem %s748_s0, %s535_s20  ;;  %v673_v15 = vld [vmem:[%s751_s3] ss:$0 sm:$0xff]  ;;  %s683_s5 = scalar_lea.vmem %s752_s4, %s537_s28  ;;  %vm456_vm3 = vcmask 261120  }
   0xe   : > { %v295_v4 = vand.u32 %v597_v0, %v293_v3  ;;  %v598_v5 = vld [vmem:[%s193_s23] sm:$0xff]   ;;  %v600_v7 = vld [vmem:[%s193_s23 + $0x8] sm:$0xff]   ;;  %v602_v9 = vld [vmem:[%s193_s23 + $0x10] sm:$0xff]  }
   0xf   : > { %v599_v6 = vld [vmem:[%s193_s23 + $0x20] sm:$0xff]   ;;  %570 = vmatprep.mubr.msk.bf16.mxu0 %vm265_vm2, %v598_v5  ;;  %v601_v8 = vld [vmem:[%s193_s23 + $0x28] sm:$0xff]   ;;  %v603_v10 = vld [vmem:[%s193_s23 + $0x30] sm:$0xff]  }
  0x10   : > { %568 = vmatprep.subr.bf16.mxu0 %v295_v4  ;;  %586 = vmatprep.subr.bf16.mxu1 %v295_v4  ;;  %v604_v11 = vld [vmem:[%s193_s23 + $0x18] sm:$0xff]  }
  0x11   : > { %569 = vmatpush3.bf16.msra.mxu0 %v295_v4  ;;  %587 = vmatpush3.bf16.msra.mxu1 %v295_v4  ;;  %v605_v12 = vld [vmem:[%s193_s23 + $0x38] sm:$0xff]  }
  0x12   : > { %578 = vmatprep.mubr.msk.bf16.mxu1 %vm265_vm2, %v599_v6 }
  0x14   : > { %571 = vmatmul.mubr.msk.bf16.vlgmr.msra.gmra.mxu0 %vm265_vm2, %v600_v7  ;;  %579 = vmatmul.mubr.msk.bf16.vlgmr.msra.gmra.mxu1 %vm265_vm2, %v601_v8 }
  0x15   : > { %574 = vmatprep.mubr.msk.bf16.mxu0 %vm265_vm2, %v602_v9  ;;  %582 = vmatprep.mubr.msk.bf16.mxu1 %vm265_vm2, %v603_v10 }
  0x1c   : > { %575 = vmatmul.mubr.msk.bf16.gmra.mxu0 %vm265_vm2, %v604_v11  ;;  %583 = vmatmul.mubr.msk.bf16.gmra.mxu1 %vm265_vm2, %v605_v12 }
  0xd4   : > { %v572_v14 = vpop.f32.mrf.mxu0  ;;  %v580_v17 = vpop.f32.mrf.mxu1 }
  0xd5   : > { %v403_v16 = vmul.f32 %v572_v14, %v668_v13  ;;  %v411_v18 = vmul.f32 %v580_v17, %v668_v13 }
  0xd6   : > { %v331_v19 = vpop.f32.mrf.mxu0  ;;  %v363_v22 = vpop.f32.mrf.mxu1 }
  0xd7   : > { %v426_v20 = vadd.f32 %v673_v15, %v403_v16  ;;  %v401_v21 = vmul.f32 %v668_v13, %v331_v19  ;;  %v434_v23 = vadd.f32 %v673_v15, %v411_v18  ;;  %v409_v24 = vmul.f32 %v668_v13, %v363_v22 }
  0xd8   : > { %v573_v25 = vpop.f32.mrf.mxu0  ;;  %v581_v29 = vpop.f32.mrf.mxu1 }
  0xd9   : > { %v442_v26 = vmax.f32 %v426_v20, 0.0  ;;  %v424_v27 = vadd.f32 %v673_v15, %v401_v21  ;;  %v404_v28 = vmul.f32 %v573_v25, %v668_v13  ;;  %v450_v30 = vmax.f32 %v434_v23, 0.0 }
  0xda   : > { %v432_v31 = vadd.f32 %v673_v15, %v409_v24  ;;  %v412_v32 = vmul.f32 %v581_v29, %v668_v13  ;;  %v334_v33 = vpop.f32.mrf.mxu0  ;;  %v366_v37 = vpop.f32.mrf.mxu1 }
  0xdb   : > { %459 = vst.msk [vmem:[%s683_s5 + $0x10] sm:$0xff] %vm456_vm3, %v442_v26  ;;  %v440_v34 = vmax.f32 %v424_v27, 0.0  ;;  %v427_v35 = vadd.f32 %v673_v15, %v404_v28  ;;  %v402_v36 = vmul.f32 %v668_v13, %v334_v33  ;;  %467 = vst.msk [vmem:[%s683_s5 + $0x50] sm:$0xff] %vm456_vm3, %v450_v30  ;;  %v410_v40 = vmul.f32 %v668_v13, %v366_v37 }
  0xdc   : > { %v448_v38 = vmax.f32 %v432_v31, 0.0  ;;  %v435_v39 = vadd.f32 %v673_v15, %v412_v32  ;;  %v576_v41 = vpop.f32.mrf.mxu0  ;;  %v584_v45 = vpop.f32.mrf.mxu1 }
  0xdd   : > { %457 = vst.msk [vmem:[%s683_s5] sm:$0xff] %vm456_vm3, %v440_v34  ;;  %v443_v42 = vmax.f32 %v427_v35, 0.0  ;;  %v425_v43 = vadd.f32 %v673_v15, %v402_v36  ;;  %v407_v44 = vmul.f32 %v576_v41, %v668_v13  ;;  %v433_v47 = vadd.f32 %v673_v15, %v410_v40 }
  0xde   : > { %465 = vst.msk [vmem:[%s683_s5 + $0x40] sm:$0xff] %vm456_vm3, %v448_v38  ;;  %v451_v46 = vmax.f32 %v435_v39, 0.0  ;;  %v415_v48 = vmul.f32 %v584_v45, %v668_v13  ;;  %v347_v49 = vpop.f32.mrf.mxu0  ;;  %v379_v53 = vpop.f32.mrf.mxu1 }
  0xdf   : > { %460 = vst.msk [vmem:[%s683_s5 + $0x18] sm:$0xff] %vm456_vm3, %v443_v42  ;;  %v441_v50 = vmax.f32 %v425_v43, 0.0  ;;  %v430_v51 = vadd.f32 %v673_v15, %v407_v44  ;;  %v405_v52 = vmul.f32 %v668_v13, %v347_v49  ;;  %v449_v54 = vmax.f32 %v433_v47, 0.0 }
  0xe0   : > { %468 = vst.msk [vmem:[%s683_s5 + $0x58] sm:$0xff] %vm456_vm3, %v451_v46  ;;  %v438_v55 = vadd.f32 %v673_v15, %v415_v48  ;;  %v413_v56 = vmul.f32 %v668_v13, %v379_v53  ;;  %v577_v57 = vpop.f32.mrf.mxu0  ;;  %v585_v61 = vpop.f32.mrf.mxu1 }
  0xe1   : > { %458 = vst.msk [vmem:[%s683_s5 + $0x8] sm:$0xff] %vm456_vm3, %v441_v50  ;;  %v446_v58 = vmax.f32 %v430_v51, 0.0  ;;  %v428_v59 = vadd.f32 %v673_v15, %v405_v52  ;;  %v408_v60 = vmul.f32 %v577_v57, %v668_v13  ;;  %466 = vst.msk [vmem:[%s683_s5 + $0x48] sm:$0xff] %vm456_vm3, %v449_v54  ;;  %v416_v0 = vmul.f32 %v585_v61, %v668_v13 }
  0xe2   : > { %v454_v62 = vmax.f32 %v438_v55, 0.0  ;;  %v436_v63 = vadd.f32 %v673_v15, %v413_v56  ;;  %v350_v1 = vpop.f32.mrf.mxu0  ;;  %v382_v5 = vpop.f32.mrf.mxu1 }
  0xe3   : > { %463 = vst.msk [vmem:[%s683_s5 + $0x30] sm:$0xff] %vm456_vm3, %v446_v58  ;;  %v444_v2 = vmax.f32 %v428_v59, 0.0  ;;  %v431_v3 = vadd.f32 %v673_v15, %v408_v60  ;;  %v406_v4 = vmul.f32 %v668_v13, %v350_v1  ;;  %v439_v7 = vadd.f32 %v673_v15, %v416_v0 }
  0xe4   : > { %471 = vst.msk [vmem:[%s683_s5 + $0x70] sm:$0xff] %vm456_vm3, %v454_v62  ;;  %v452_v6 = vmax.f32 %v436_v63, 0.0  ;;  %v414_v8 = vmul.f32 %v668_v13, %v382_v5 }
  0xe5   : > { %461 = vst.msk [vmem:[%s683_s5 + $0x20] sm:$0xff] %vm456_vm3, %v444_v2  ;;  %v447_v9 = vmax.f32 %v431_v3, 0.0  ;;  %v429_v10 = vadd.f32 %v673_v15, %v406_v4  ;;  %v455_v11 = vmax.f32 %v439_v7, 0.0 }
  0xe6   : > { %469 = vst.msk [vmem:[%s683_s5 + $0x60] sm:$0xff] %vm456_vm3, %v452_v6  ;;  %v437_v12 = vadd.f32 %v673_v15, %v414_v8 }
  0xe7   : > { %464 = vst.msk [vmem:[%s683_s5 + $0x38] sm:$0xff] %vm456_vm3, %v447_v9  ;;  %v445_v14 = vmax.f32 %v429_v10, 0.0  ;;  %472 = vst.msk [vmem:[%s683_s5 + $0x78] sm:$0xff] %vm456_vm3, %v455_v11 }
  0xe8   : > { %v453_v16 = vmax.f32 %v437_v12, 0.0 }
  0xe9   : > { %462 = vst.msk [vmem:[%s683_s5 + $0x28] sm:$0xff] %vm456_vm3, %v445_v14 }
  0xea   : > { %470 = vst.msk [vmem:[%s683_s5 + $0x68] sm:$0xff] %vm456_vm3, %v453_v16 }
  0xeb PF: > { %s14_s15 = sadd.s32 1, %s612_s15  }
  0xec   : > { %p11_p4 = scmp.ge.s32.totalorder %s14_s15, 4  }
  0xee   :  { %13 = sbr.rel (!%p11_p4) target bundleno = 1 (0x1), region = 66 }

// kernel: forward.10
= control target key start
LH: loop header
LB: loop body
LE: loop exit
PB: predicated region body
PF: predicated region fallthrough
CT: control target
= control target key end

     0   :  { %vm314_vm0 = vcmask 261120   ;;  %vm595_vm1 = vcmask 523264   ;;  %s1117_s1 = inlined_call_operand.vmem [shape: bf16[288,64], index: 1, kind: input, shape index: {}]   ;;  %s1118_s0 = inlined_call_operand.vmem [shape: bf16[128,288], index: 0, kind: input, shape index: {}]   ;;  %s1119_s2 = inlined_call_operand.vmem [shape: f32[1,64], index: 2, kind: input, shape index: {}]   ;;  %s1120_s3 = inlined_call_operand.vmem [shape: f32[1,64], index: 3, kind: input, shape index: {}]   ;;  %s1121_s4 = inlined_call_operand.vmem [shape: f32[128,64], index: 4, kind: output, shape index: {}]  }
   0x1   :  { %v778_v0 = vld [vmem:[%s1117_s1 + $0x78] sm:$0xff]   ;;  %v780_v2 = vld [vmem:[%s1117_s1 + $0x70] sm:$0xff]   ;;  %v782_v4 = vld [vmem:[%s1117_s1 + $0x68] sm:$0xff]  }
   0x2   :  { %v779_v1 = vld [vmem:[%s1117_s1 + $0x38] sm:$0xff]   ;;  %668 = vmatprep.subr.bf16.mxu0 %v778_v0  ;;  %762 = vmatprep.subr.bf16.mxu1 %v778_v0  ;;  %v781_v3 = vld [vmem:[%s1117_s1 + $0x30] sm:$0xff]   ;;  %v783_v5 = vld [vmem:[%s1117_s1 + $0x28] sm:$0xff]  }
   0x3   :  { %669 = vmatpush3.bf16.msra.mxu0 %v779_v1  ;;  %770 = vmatpush3.bf16.msra.mxu1 %v779_v1  ;;  %v784_v6 = vld [vmem:[%s1117_s1 + $0x60] sm:$0xff]   ;;  %v786_v8 = vld [vmem:[%s1117_s1 + $0x58] sm:$0xff]   ;;  %v788_v10 = vld [vmem:[%s1117_s1 + $0x50] sm:$0xff]  }
   0x4   :  { %670 = vmatprep.subr.bf16.mxu0 %v780_v2  ;;  %763 = vmatprep.subr.bf16.mxu1 %v780_v2  ;;  %v785_v7 = vld [vmem:[%s1117_s1 + $0x20] sm:$0xff]   ;;  %v787_v9 = vld [vmem:[%s1117_s1 + $0x18] sm:$0xff]   ;;  %v789_v13 = vld [vmem:[%s1117_s1 + $0x10] sm:$0xff]  }
   0x5   :  { %v796_v11 = vld [vmem:[%s1118_s0 + $0x4] ss:$12 sps:$4 sm:$0xff]   ;;  %v799_v12 = vld [vmem:[%s1118_s0 + $0x94] ss:$12 sps:$4 sm:$0xff]   ;;  %v790_v14 = vld [vmem:[%s1117_s1 + $0x48] sm:$0xff]  }
   0x6   :  { %371 = vmatprep.mubr.bf16.mxu0 %v796_v11  ;;  %419 = vmatprep.mubr.bf16.mxu1 %v799_v12  ;;  %v791_v15 = vld [vmem:[%s1117_s1 + $0x8] sm:$0xff]   ;;  %v792_v16 = vld [vmem:[%s1117_s1 + $0x40] sm:$0xff]   ;;  %v797_v20 = vld [vmem:[%s1118_s0 + $0x90] ss:$12 sps:$4 sm:$0xff]  }
   0x7   :  { %671 = vmatpush3.bf16.msra.mxu0 %v781_v3  ;;  %771 = vmatpush3.bf16.msra.mxu1 %v781_v3  ;;  %v793_v17 = vld [vmem:[%s1117_s1] sm:$0xff]   ;;  %v800_v19 = vld [vmem:[%s1117_s1 + $0x88] sm:$0xff]   ;;  %v811_v28 = vld [vmem:[%s1118_s0 + $0x30] ss:$12 sps:$4 sm:$0xff]  }
   0x8   :  { %672 = vmatprep.subr.bf16.mxu0 %v782_v4  ;;  %764 = vmatprep.subr.bf16.mxu1 %v782_v4  ;;  %v794_v18 = vld [vmem:[%s1118_s0] ss:$12 sps:$4 sm:$0xff]   ;;  %v801_v21 = vld [vmem:[%s1118_s0 + $0x1c] ss:$12 sps:$4 sm:$0xff]   ;;  %v805_v24 = vld [vmem:[%s1118_s0 + $0x18] ss:$12 sps:$4 sm:$0xff]  }
   0x9   :  { %v803_v22 = vld [vmem:[%s1118_s0 + $0xac] ss:$12 sps:$4 sm:$0xff]   ;;  %v807_v23 = vld [vmem:[%s1117_s1 + $0x80] sm:$0xff]   ;;  %v806_v25 = vld [vmem:[%s1118_s0 + $0xa8] ss:$12 sps:$4 sm:$0xff]  }
   0xa   :  { %v808_v26 = vld [vmem:[%s1118_s0 + $0x34] ss:$12 sps:$4 sm:$0xff]   ;;  %v813_v30 = vld [vmem:[%s1118_s0 + $0x4c] ss:$12 sps:$4 sm:$0xff]   ;;  %v817_v33 = vld [vmem:[%s1118_s0 + $0x50] ss:$12 sps:$4 sm:$0xff]  }
   0xb   :  { %673 = vmatpush3.bf16.msra.mxu0 %v783_v5  ;;  %772 = vmatpush3.bf16.msra.mxu1 %v783_v5  ;;  %v810_v27 = vld [vmem:[%s1118_s0 + $0x8] ss:$12 sps:$4 sm:$0xff]   ;;  %v812_v29 = vld [vmem:[%s1118_s0 + $0x20] ss:$12 sps:$4 sm:$0xff]   ;;  %v815_v31 = vld [vmem:[%s1118_s0 + $0x38] ss:$12 sps:$4 sm:$0xff]  }
   0xc   :  { %674 = vmatprep.subr.bf16.mxu0 %v784_v6  ;;  %765 = vmatprep.subr.bf16.mxu1 %v784_v6  ;;  %v816_v32 = vld [vmem:[%s1118_s0 + $0x48] ss:$12 sps:$4 sm:$0xff]   ;;  %v818_v34 = vld [vmem:[%s1118_s0 + $0x64] ss:$12 sps:$4 sm:$0xff]   ;;  %v821_v36 = vld [vmem:[%s1118_s0 + $0x60] ss:$12 sps:$4 sm:$0xff]  }
   0xd   :  { %v820_v35 = vld [vmem:[%s1118_s0 + $0x68] ss:$12 sps:$4 sm:$0xff]   ;;  %v822_v37 = vld [vmem:[%s1118_s0 + $0x80] ss:$12 sps:$4 sm:$0xff]   ;;  %v825_v39 = vld [vmem:[%s1118_s0 + $0x98] ss:$12 sps:$4 sm:$0xff]  }
   0xe   :  { %v823_v38 = vld [vmem:[%s1118_s0 + $0x7c] ss:$12 sps:$4 sm:$0xff]   ;;  %v826_v40 = vld [vmem:[%s1118_s0 + $0x78] ss:$12 sps:$4 sm:$0xff]   ;;  %v1006_v61 = vld [vmem:[%s1119_s2] ss:$0 sm:$0xff] }
   0xf   :  { %675 = vmatpush3.bf16.msra.mxu0 %v785_v7  ;;  %773 = vmatpush3.bf16.msra.mxu1 %v785_v7  ;;  %v827_v41 = vld [vmem:[%s1118_s0 + $0xb0] ss:$12 sps:$4 sm:$0xff]   ;;  %v1011_v0 = vld [vmem:[%s1120_s3] ss:$0 sm:$0xff] }
  0x10   :  { %676 = vmatprep.subr.bf16.mxu0 %v786_v8  ;;  %766 = vmatprep.subr.bf16.mxu1 %v786_v8 }
  0x13   :  { %677 = vmatpush3.bf16.msra.mxu0 %v787_v9  ;;  %774 = vmatpush3.bf16.msra.mxu1 %v787_v9 }
  0x14   :  { %678 = vmatprep.subr.bf16.mxu0 %v788_v10  ;;  %767 = vmatprep.subr.bf16.mxu1 %v788_v10 }
  0x17   :  { %679 = vmatpush3.bf16.msra.mxu0 %v789_v13  ;;  %775 = vmatpush3.bf16.msra.mxu1 %v789_v13 }
  0x18   :  { %680 = vmatprep.subr.bf16.mxu0 %v790_v14  ;;  %768 = vmatprep.subr.bf16.mxu1 %v790_v14 }
  0x1b   :  { %681 = vmatpush3.bf16.msra.mxu0 %v791_v15  ;;  %776 = vmatpush3.bf16.msra.mxu1 %v791_v15 }
  0x1c   :  { %682 = vmatprep.subr.bf16.mxu0 %v792_v16  ;;  %769 = vmatprep.subr.bf16.mxu1 %v792_v16 }
  0x1f   :  { %683 = vmatpush3.bf16.msra.mxu0 %v793_v17  ;;  %777 = vmatpush3.bf16.msra.mxu1 %v793_v17 }
  0x20   :  { %742 = vmatprep.subr.bf16.mxu1 %v800_v19 }
  0x22   :  { %372 = vmatmul.mubr.bf16.vlgmr.msra.gmra.mxu0 %v794_v18  ;;  %420 = vmatmul.mubr.bf16.vlgmr.msra.gmra.mxu1 %v797_v20 }
  0x23   :  { %743 = vmatpush3.bf16.msra.mxu1 %v800_v19  ;;  %379 = vmatprep.mubr.bf16.mxu0 %v801_v21 }
  0x24   :  { %427 = vmatprep.mubr.bf16.mxu1 %v803_v22  ;;  %744 = vmatprep.subr.bf16.mxu1 %v807_v23 }
  0x27   :  { %745 = vmatpush3.bf16.msra.mxu1 %v807_v23 }
  0x2a   :  { %380 = vmatmul.mubr.bf16.gmra.mxu0 %v805_v24  ;;  %428 = vmatmul.mubr.bf16.gmra.mxu1 %v806_v25 }
  0x2b   :  { %387 = vmatprep.mubr.bf16.mxu0 %v808_v26  ;;  %746 = vmatprep.mubr.msk.bf16.mxu1 %vm314_vm0, %v810_v27 }
  0x32   :  { %388 = vmatmul.mubr.bf16.gmra.mxu0 %v811_v28  ;;  %747 = vmatmul.mubr.msk.bf16.vlgmr.msra.gmra.mxu1 %vm314_vm0, %v812_v29 }
  0x33   :  { %395 = vmatprep.mubr.bf16.mxu0 %v813_v30  ;;  %750 = vmatprep.mubr.msk.bf16.mxu1 %vm314_vm0, %v815_v31 }
  0x3a   :  { %396 = vmatmul.mubr.bf16.gmra.mxu0 %v816_v32  ;;  %751 = vmatmul.mubr.msk.bf16.gmra.mxu1 %vm314_vm0, %v817_v33 }
  0x3b   :  { %403 = vmatprep.mubr.bf16.mxu0 %v818_v34  ;;  %754 = vmatprep.mubr.msk.bf16.mxu1 %vm314_vm0, %v820_v35 }
  0x42   :  { %404 = vmatmul.mubr.bf16.gmra.mxu0 %v821_v36  ;;  %755 = vmatmul.mubr.msk.bf16.gmra.mxu1 %vm314_vm0, %v822_v37 }
  0x43   :  { %411 = vmatprep.mubr.bf16.mxu0 %v823_v38  ;;  %758 = vmatprep.mubr.msk.bf16.mxu1 %vm314_vm0, %v825_v39 }
  0x4a   :  { %412 = vmatmul.mubr.bf16.gmra.mxu0 %v826_v40  ;;  %759 = vmatmul.mubr.msk.bf16.gmra.mxu1 %vm314_vm0, %v827_v41 }
  0xe2   :  { %v684_v42 = vpop.f32.mrf.mxu0  ;;  %v987_v43 = vpop.f32.mrf.mxu1 }
  0xe4   :  { %v685_v44 = vpop.f32.mrf.mxu0  ;;  %v989_v45 = vpop.f32.mrf.mxu1 }
  0xe5   :  { %v686_v62 = vadd.f32 %v685_v44, %v684_v42 }
  0xe6   :  { %v687_v46 = vpop.f32.mrf.mxu0  ;;  %v991_v47 = vpop.f32.mrf.mxu1 }
  0xe8   :  { %v688_v48 = vpop.f32.mrf.mxu0  ;;  %v993_v49 = vpop.f32.mrf.mxu1 }
  0xe9   :  { %v689_v11 = vadd.f32 %v688_v48, %v687_v46 }
  0xea   :  { %v690_v50 = vpop.f32.mrf.mxu0  ;;  %v995_v51 = vpop.f32.mrf.mxu1 }
  0xec   :  { %v691_v52 = vpop.f32.mrf.mxu0  ;;  %v997_v53 = vpop.f32.mrf.mxu1 }
  0xed   :  { %v692_v58 = vadd.f32 %v691_v52, %v690_v50 }
  0xee   :  { %v693_v54 = vpop.f32.mrf.mxu0  ;;  %v999_v55 = vpop.f32.mrf.mxu1 }
  0xf0   :  { %v694_v56 = vpop.f32.mrf.mxu0  ;;  %v1001_v57 = vpop.f32.mrf.mxu1 }
  0xf1   :  { %v695_v3 = vadd.f32 %v694_v56, %v693_v54 }
  0xf2   :  { %v696_v59 = vpop.f32.mrf.mxu0  ;;  %v748_v60 = vpop.f32.mrf.mxu1 }
  0xf3   :  { %v479_v63 = vadd.f32 %v748_v60, %v692_v58 }
  0xf4   :  { %v697_v1 = vpop.f32.mrf.mxu0  ;;  %v470_v2 = vpop.f32.mrf.mxu1 }
  0xf5   :  { %v542_v4 = vmul.f32 %v1006_v61, %v479_v63  ;;  %v471_v5 = vadd.f32 %v686_v62, %v470_v2  ;;  %v698_v20 = vadd.f32 %v697_v1, %v696_v59 }
  0xf6   :  { %v699_v6 = vpop.f32.mrf.mxu0  ;;  %v749_v7 = vpop.f32.mrf.mxu1 }
  0xf7   :  { %v565_v8 = vadd.f32 %v1011_v0, %v542_v4  ;;  %v540_v9 = vmul.f32 %v1006_v61, %v471_v5  ;;  %v482_v10 = vadd.f32 %v749_v7, %v695_v3  ;;  %v728_v7 = vadd.f32 %v997_v53, %v995_v51 }
  0xf8   :  { %v700_v12 = vpop.f32.mrf.mxu0  ;;  %v473_v13 = vpop.f32.mrf.mxu1  ;;  %v722_v53 = vadd.f32 %v989_v45, %v987_v43 }
  0xf9   :  { %v581_v14 = vmax.f32 %v565_v8, 0.0  ;;  %v563_v15 = vadd.f32 %v1011_v0, %v540_v9  ;;  %v543_v16 = vmul.f32 %v1006_v61, %v482_v10  ;;  %v474_v17 = vadd.f32 %v689_v11, %v473_v13 }
  0xfa   :  { %v702_v18 = vpop.f32.mrf.mxu0  ;;  %v752_v19 = vpop.f32.mrf.mxu1  ;;  %v701_v32 = vadd.f32 %v700_v12, %v699_v6 }
  0xfb   :  { %598 = vst.msk [vmem:[%s1121_s4 + $0x10] sm:$0xff] %vm595_vm1, %v581_v14  ;;  %v579_v21 = vmax.f32 %v563_v15, 0.0  ;;  %v566_v22 = vadd.f32 %v1011_v0, %v543_v16  ;;  %v541_v23 = vmul.f32 %v1006_v61, %v474_v17  ;;  %v731_v15 = vadd.f32 %v1001_v57, %v999_v55 }
  0xfc   :  { %v703_v24 = vpop.f32.mrf.mxu0  ;;  %v486_v25 = vpop.f32.mrf.mxu1 }
  0xfd   :  { %596 = vst.msk [vmem:[%s1121_s4] sm:$0xff] %vm595_vm1, %v579_v21  ;;  %v582_v26 = vmax.f32 %v566_v22, 0.0  ;;  %v704_v27 = vadd.f32 %v703_v24, %v702_v18  ;;  %v487_v28 = vadd.f32 %v698_v20, %v486_v25  ;;  %v564_v29 = vadd.f32 %v1011_v0, %v541_v23 }
  0xfe   :  { %v705_v30 = vpop.f32.mrf.mxu0  ;;  %v753_v31 = vpop.f32.mrf.mxu1  ;;  %v725_v25 = vadd.f32 %v993_v49, %v991_v47 }
  0xff   :  { %599 = vst.msk [vmem:[%s1121_s4 + $0x18] sm:$0xff] %vm595_vm1, %v582_v26  ;;  %v495_v33 = vadd.f32 %v752_v19, %v704_v27  ;;  %v544_v34 = vmul.f32 %v1006_v61, %v487_v28  ;;  %v580_v35 = vmax.f32 %v564_v29, 0.0 }
 0x100   :  { %v706_v36 = vpop.f32.mrf.mxu0  ;;  %v489_v37 = vpop.f32.mrf.mxu1 }
 0x101   :  { %v546_v38 = vmul.f32 %v1006_v61, %v495_v33  ;;  %v567_v39 = vadd.f32 %v1011_v0, %v544_v34  ;;  %v707_v40 = vadd.f32 %v706_v36, %v705_v30  ;;  %v490_v41 = vadd.f32 %v701_v32, %v489_v37  ;;  %597 = vst.msk [vmem:[%s1121_s4 + $0x8] sm:$0xff] %vm595_vm1, %v580_v35 }
 0x102   :  { %v708_v42 = vpop.f32.mrf.mxu0  ;;  %v756_v44 = vpop.f32.mrf.mxu1 }
 0x103   :  { %v569_v46 = vadd.f32 %v1011_v0, %v546_v38  ;;  %v583_v48 = vmax.f32 %v567_v39, 0.0  ;;  %v498_v50 = vadd.f32 %v753_v31, %v707_v40  ;;  %v545_v52 = vmul.f32 %v1006_v61, %v490_v41 }
 0x104   :  { %v709_v54 = vpop.f32.mrf.mxu0  ;;  %v502_v56 = vpop.f32.mrf.mxu1 }
 0x105   :  { %v585_v58 = vmax.f32 %v569_v46, 0.0  ;;  %600 = vst.msk [vmem:[%s1121_s4 + $0x20] sm:$0xff] %vm595_vm1, %v583_v48  ;;  %v547_v59 = vmul.f32 %v1006_v61, %v498_v50  ;;  %v568_v60 = vadd.f32 %v1011_v0, %v545_v52  ;;  %v710_v62 = vadd.f32 %v709_v54, %v708_v42 }
 0x106   :  { %v711_v63 = vpop.f32.mrf.mxu0  ;;  %v757_v1 = vpop.f32.mrf.mxu1 }
 0x107   :  { %602 = vst.msk [vmem:[%s1121_s4 + $0x30] sm:$0xff] %vm595_vm1, %v585_v58  ;;  %v570_v2 = vadd.f32 %v1011_v0, %v547_v59  ;;  %v584_v3 = vmax.f32 %v568_v60, 0.0  ;;  %v503_v4 = vadd.f32 %v710_v62, %v502_v56 }
 0x108   :  { %v712_v5 = vpop.f32.mrf.mxu0  ;;  %v505_v6 = vpop.f32.mrf.mxu1 }
 0x109   :  { %v586_v8 = vmax.f32 %v570_v2, 0.0  ;;  %601 = vst.msk [vmem:[%s1121_s4 + $0x28] sm:$0xff] %vm595_vm1, %v584_v3  ;;  %v548_v9 = vmul.f32 %v1006_v61, %v503_v4  ;;  %v713_v10 = vadd.f32 %v712_v5, %v711_v63 }
 0x10a   :  { %v714_v11 = vpop.f32.mrf.mxu0  ;;  %v760_v12 = vpop.f32.mrf.mxu1 }
 0x10b   :  { %603 = vst.msk [vmem:[%s1121_s4 + $0x38] sm:$0xff] %vm595_vm1, %v586_v8  ;;  %v571_v13 = vadd.f32 %v1011_v0, %v548_v9  ;;  %v506_v14 = vadd.f32 %v713_v10, %v505_v6  ;;  %v527_v51 = vadd.f32 %v760_v12, %v728_v7 }
 0x10c   :  { %v715_v16 = vpop.f32.mrf.mxu0  ;;  %v518_v17 = vpop.f32.mrf.mxu1 }
 0x10d   :  { %v587_v18 = vmax.f32 %v571_v13, 0.0  ;;  %v549_v19 = vmul.f32 %v1006_v61, %v506_v14  ;;  %v554_v20 = vmul.f32 %v1006_v61, %v527_v51  ;;  %v716_v21 = vadd.f32 %v715_v16, %v714_v11 }
 0x10e   :  { %v519_v22 = vadd.f32 %v722_v53, %v518_v17  ;;  %v717_v23 = vpop.f32.mrf.mxu0  ;;  %v761_v24 = vpop.f32.mrf.mxu1 }
 0x10f   :  { %604 = vst.msk [vmem:[%s1121_s4 + $0x40] sm:$0xff] %vm595_vm1, %v587_v18  ;;  %v572_v43 = vadd.f32 %v1011_v0, %v549_v19  ;;  %v577_v45 = vadd.f32 %v1011_v0, %v554_v20  ;;  %v511_v55 = vadd.f32 %v756_v44, %v716_v21  ;;  %v530_v57 = vadd.f32 %v761_v24, %v731_v15 }
 0x110   :  { %v552_v26 = vmul.f32 %v1006_v61, %v519_v22  ;;  %v718_v27 = vpop.f32.mrf.mxu0  ;;  %v521_v28 = vpop.f32.mrf.mxu1 }
 0x111   :  { %v588_v29 = vmax.f32 %v572_v43, 0.0  ;;  %v593_v30 = vmax.f32 %v577_v45, 0.0  ;;  %v550_v31 = vmul.f32 %v1006_v61, %v511_v55  ;;  %v555_v32 = vmul.f32 %v1006_v61, %v530_v57 }
 0x112   :  { %v575_v33 = vadd.f32 %v1011_v0, %v552_v26  ;;  %v719_v34 = vadd.f32 %v718_v27, %v717_v23  ;;  %v522_v35 = vadd.f32 %v725_v25, %v521_v28 }
 0x113   :  { %605 = vst.msk [vmem:[%s1121_s4 + $0x48] sm:$0xff] %vm595_vm1, %v588_v29  ;;  %610 = vst.msk [vmem:[%s1121_s4 + $0x70] sm:$0xff] %vm595_vm1, %v593_v30  ;;  %v573_v47 = vadd.f32 %v1011_v0, %v550_v31  ;;  %v578_v49 = vadd.f32 %v1011_v0, %v555_v32 }
 0x114   :  { %v591_v36 = vmax.f32 %v575_v33, 0.0  ;;  %v514_v37 = vadd.f32 %v757_v1, %v719_v34  ;;  %v553_v38 = vmul.f32 %v1006_v61, %v522_v35 }
 0x115   :  { %v589_v39 = vmax.f32 %v573_v47, 0.0  ;;  %v594_v40 = vmax.f32 %v578_v49, 0.0 }
 0x116   :  { %608 = vst.msk [vmem:[%s1121_s4 + $0x60] sm:$0xff] %vm595_vm1, %v591_v36  ;;  %v551_v41 = vmul.f32 %v1006_v61, %v514_v37  ;;  %v576_v42 = vadd.f32 %v1011_v0, %v553_v38 }
 0x117   :  { %606 = vst.msk [vmem:[%s1121_s4 + $0x50] sm:$0xff] %vm595_vm1, %v589_v39  ;;  %611 = vst.msk [vmem:[%s1121_s4 + $0x78] sm:$0xff] %vm595_vm1, %v594_v40 }
 0x118   :  { %v574_v44 = vadd.f32 %v1011_v0, %v551_v41  ;;  %v592_v46 = vmax.f32 %v576_v42, 0.0 }
 0x11a   :  { %v590_v48 = vmax.f32 %v574_v44, 0.0  ;;  %609 = vst.msk [vmem:[%s1121_s4 + $0x68] sm:$0xff] %vm595_vm1, %v592_v46 }
 0x11c   :  { %607 = vst.msk [vmem:[%s1121_s4 + $0x58] sm:$0xff] %vm595_vm1, %v590_v48 }

// kernel: forward.11
= control target key start
LH: loop header
LB: loop body
LE: loop exit
PB: predicated region body
PF: predicated region fallthrough
CT: control target
= control target key end

     0   :  { %vm430_vm0 = vcmask 523264   ;;  %s1149_s1 = inlined_call_operand.vmem [shape: bf16[576,128], index: 1, kind: input, shape index: {}]   ;;  %s1150_s0 = inlined_call_operand.vmem [shape: bf16[64,576], index: 0, kind: input, shape index: {}]   ;;  %s1151_s2 = inlined_call_operand.vmem [shape: f32[1,128], index: 2, kind: input, shape index: {}]   ;;  %s1152_s3 = inlined_call_operand.vmem [shape: f32[1,128], index: 3, kind: input, shape index: {}]   ;;  %s1153_s4 = inlined_call_operand.vmem [shape: f32[64,128], index: 4, kind: output, shape index: {}]  }
   0x1   :  { %v862_v0 = vld [vmem:[%s1149_s1 + $0x78] sm:$0xff]   ;;  %v866_v4 = vld [vmem:[%s1149_s1 + $0x70] sm:$0xff]   ;;  %v870_v8 = vld [vmem:[%s1149_s1 + $0x68] sm:$0xff]  }
   0x2   :  { %v863_v1 = vld [vmem:[%s1149_s1 + $0xf8] sm:$0xff]   ;;  %750 = vmatprep.subr.bf16.mxu0 %v862_v0  ;;  %v867_v5 = vld [vmem:[%s1149_s1 + $0xf0] sm:$0xff]   ;;  %v871_v9 = vld [vmem:[%s1149_s1 + $0xe8] sm:$0xff]  }
   0x3   :  { %v864_v2 = vld [vmem:[%s1149_s1 + $0x38] sm:$0xff]   ;;  %790 = vmatprep.subr.bf16.mxu1 %v863_v1  ;;  %v868_v6 = vld [vmem:[%s1149_s1 + $0x30] sm:$0xff]   ;;  %v872_v10 = vld [vmem:[%s1149_s1 + $0x28] sm:$0xff]  }
   0x4   :  { %v865_v3 = vld [vmem:[%s1149_s1 + $0xb8] sm:$0xff]   ;;  %751 = vmatpush3.bf16.msra.mxu0 %v864_v2  ;;  %v869_v7 = vld [vmem:[%s1149_s1 + $0xb0] sm:$0xff]   ;;  %v873_v11 = vld [vmem:[%s1149_s1 + $0xa8] sm:$0xff]  }
   0x5   :  { %791 = vmatpush3.bf16.msra.mxu1 %v865_v3  ;;  %752 = vmatprep.subr.bf16.mxu0 %v866_v4  ;;  %v874_v12 = vld [vmem:[%s1149_s1 + $0x60] sm:$0xff]   ;;  %v878_v16 = vld [vmem:[%s1149_s1 + $0x58] sm:$0xff]   ;;  %v882_v20 = vld [vmem:[%s1149_s1 + $0x50] sm:$0xff]  }
   0x6   :  { %792 = vmatprep.subr.bf16.mxu1 %v867_v5  ;;  %v875_v13 = vld [vmem:[%s1149_s1 + $0xe0] sm:$0xff]   ;;  %v879_v17 = vld [vmem:[%s1149_s1 + $0xd8] sm:$0xff]   ;;  %v883_v21 = vld [vmem:[%s1149_s1 + $0xd0] sm:$0xff]  }
   0x7   :  { %v876_v14 = vld [vmem:[%s1149_s1 + $0x20] sm:$0xff]   ;;  %v880_v18 = vld [vmem:[%s1149_s1 + $0x18] sm:$0xff]   ;;  %v884_v22 = vld [vmem:[%s1149_s1 + $0x10] sm:$0xff]  }
   0x8   :  { %753 = vmatpush3.bf16.msra.mxu0 %v868_v6  ;;  %v877_v15 = vld [vmem:[%s1149_s1 + $0xa0] sm:$0xff]   ;;  %v881_v19 = vld [vmem:[%s1149_s1 + $0x98] sm:$0xff]   ;;  %v885_v23 = vld [vmem:[%s1149_s1 + $0x90] sm:$0xff]  }
   0x9   :  { %793 = vmatpush3.bf16.msra.mxu1 %v869_v7  ;;  %754 = vmatprep.subr.bf16.mxu0 %v870_v8  ;;  %v886_v24 = vld [vmem:[%s1149_s1 + $0x48] sm:$0xff]   ;;  %v890_v28 = vld [vmem:[%s1149_s1 + $0x40] sm:$0xff]   ;;  %v900_v36 = vld [vmem:[%s1149_s1 + $0x118] sm:$0xff]  }
   0xa   :  { %794 = vmatprep.subr.bf16.mxu1 %v871_v9  ;;  %v887_v25 = vld [vmem:[%s1149_s1 + $0xc8] sm:$0xff]   ;;  %v891_v29 = vld [vmem:[%s1149_s1 + $0xc0] sm:$0xff]   ;;  %v907_v39 = vld [vmem:[%s1149_s1 + $0x110] sm:$0xff]  }
   0xb   :  { %v888_v26 = vld [vmem:[%s1149_s1 + $0x8] sm:$0xff]   ;;  %v892_v30 = vld [vmem:[%s1149_s1] sm:$0xff]   ;;  %v910_v43 = vld [vmem:[%s1150_s0 + $0x5c] ss:$20 sps:$4 sm:$0xff]  }
   0xc   :  { %755 = vmatpush3.bf16.msra.mxu0 %v872_v10  ;;  %v889_v27 = vld [vmem:[%s1149_s1 + $0x88] sm:$0xff]   ;;  %v893_v31 = vld [vmem:[%s1149_s1 + $0x80] sm:$0xff]   ;;  %v915_v48 = vld [vmem:[%s1150_s0 + $0x7c] ss:$20 sps:$4 sm:$0xff]  }
   0xd   :  { %795 = vmatpush3.bf16.msra.mxu1 %v873_v11  ;;  %756 = vmatprep.subr.bf16.mxu0 %v874_v12  ;;  %v894_v32 = vld [vmem:[%s1150_s0] ss:$20 sps:$4 sm:$0xff]   ;;  %v896_v33 = vld [vmem:[%s1150_s0 + $0x4] ss:$20 sps:$4 sm:$0xff]   ;;  %v897_v34 = vld [vmem:[%s1150_s0 + $0x8] ss:$20 sps:$4 sm:$0xff]  }
   0xe   :  { %796 = vmatprep.subr.bf16.mxu1 %v875_v13  ;;  %v899_v35 = vld [vmem:[%s1150_s0 + $0xc] ss:$20 sps:$4 sm:$0xff]   ;;  %475 = vmatprep.mubr.bf16.mxu0 %v896_v33  ;;  %v903_v38 = vld [vmem:[%s1150_s0 + $0x34] ss:$20 sps:$4 sm:$0xff]   ;;  %v906_v41 = vld [vmem:[%s1150_s0 + $0x30] ss:$20 sps:$4 sm:$0xff]  }
   0xf   :  { %540 = vmatprep.mubr.bf16.mxu1 %v899_v35  ;;  %v901_v37 = vld [vmem:[%s1150_s0 + $0x2c] ss:$20 sps:$4 sm:$0xff]   ;;  %v905_v40 = vld [vmem:[%s1150_s0 + $0x28] ss:$20 sps:$4 sm:$0xff]   ;;  %v912_v46 = vld [vmem:[%s1150_s0 + $0x50] ss:$20 sps:$4 sm:$0xff]  }
  0x10   :  { %757 = vmatpush3.bf16.msra.mxu0 %v876_v14  ;;  %v908_v42 = vld [vmem:[%s1150_s0 + $0x54] ss:$20 sps:$4 sm:$0xff]   ;;  %v921_v45 = vld [vmem:[%s1149_s1 + $0x100] sm:$0xff]   ;;  %v913_v47 = vld [vmem:[%s1150_s0 + $0x58] ss:$20 sps:$4 sm:$0xff]  }
  0x11   :  { %797 = vmatpush3.bf16.msra.mxu1 %v877_v15  ;;  %758 = vmatprep.subr.bf16.mxu0 %v878_v16  ;;  %v914_v44 = vld [vmem:[%s1149_s1 + $0x108] sm:$0xff]   ;;  %v917_v49 = vld [vmem:[%s1150_s0 + $0x84] ss:$20 sps:$4 sm:$0xff]   ;;  %v920_v51 = vld [vmem:[%s1150_s0 + $0x80] ss:$20 sps:$4 sm:$0xff]  }
  0x12   :  { %798 = vmatprep.subr.bf16.mxu1 %v879_v17  ;;  %v919_v50 = vld [vmem:[%s1150_s0 + $0x78] ss:$20 sps:$4 sm:$0xff]   ;;  %v922_v52 = vld [vmem:[%s1150_s0 + $0x10] ss:$20 sps:$4 sm:$0xff]   ;;  %v923_v53 = vld [vmem:[%s1150_s0 + $0x60] ss:$20 sps:$4 sm:$0xff]  }
  0x13   :  { %v924_v54 = vld [vmem:[%s1150_s0 + $0x38] ss:$20 sps:$4 sm:$0xff]   ;;  %v925_v55 = vld [vmem:[%s1150_s0 + $0x88] ss:$20 sps:$4 sm:$0xff]  }
  0x14   :  { %759 = vmatpush3.bf16.msra.mxu0 %v880_v18 }
  0x15   :  { %799 = vmatpush3.bf16.msra.mxu1 %v881_v19  ;;  %760 = vmatprep.subr.bf16.mxu0 %v882_v20 }
  0x16   :  { %800 = vmatprep.subr.bf16.mxu1 %v883_v21 }
  0x18   :  { %761 = vmatpush3.bf16.msra.mxu0 %v884_v22 }
  0x19   :  { %801 = vmatpush3.bf16.msra.mxu1 %v885_v23  ;;  %762 = vmatprep.subr.bf16.mxu0 %v886_v24 }
  0x1a   :  { %802 = vmatprep.subr.bf16.mxu1 %v887_v25 }
  0x1c   :  { %763 = vmatpush3.bf16.msra.mxu0 %v888_v26 }
  0x1d   :  { %803 = vmatpush3.bf16.msra.mxu1 %v889_v27  ;;  %764 = vmatprep.subr.bf16.mxu0 %v890_v28 }
  0x1e   :  { %804 = vmatprep.subr.bf16.mxu1 %v891_v29 }
  0x20   :  { %765 = vmatpush3.bf16.msra.mxu0 %v892_v30 }
  0x21   :  { %805 = vmatpush3.bf16.msra.mxu1 %v893_v31  ;;  %838 = vmatprep.subr.bf16.mxu0 %v900_v36 }
  0x22   :  { %854 = vmatprep.subr.bf16.mxu1 %v900_v36 }
  0x23   :  { %476 = vmatmul.mubr.bf16.vlgmr.msra.gmra.mxu0 %v894_v32 }
  0x24   :  { %541 = vmatmul.mubr.bf16.vlgmr.msra.gmra.mxu1 %v897_v34  ;;  %839 = vmatpush3.bf16.msra.mxu0 %v900_v36 }
  0x25   :  { %858 = vmatpush3.bf16.msra.mxu1 %v900_v36  ;;  %483 = vmatprep.mubr.bf16.mxu0 %v901_v37 }
  0x26   :  { %548 = vmatprep.mubr.bf16.mxu1 %v903_v38  ;;  %840 = vmatprep.subr.bf16.mxu0 %v907_v39  ;;  %v748_v38 = vld [vmem:[%s1151_s2] ss:$0 sm:$0xff] }
  0x27   :  { %855 = vmatprep.subr.bf16.mxu1 %v907_v39 }
  0x28   :  { %841 = vmatpush3.bf16.msra.mxu0 %v907_v39 }
  0x29   :  { %859 = vmatpush3.bf16.msra.mxu1 %v907_v39  ;;  %842 = vmatprep.subr.bf16.mxu0 %v914_v44 }
  0x2a   :  { %856 = vmatprep.subr.bf16.mxu1 %v914_v44 }
  0x2b   :  { %484 = vmatmul.mubr.bf16.gmra.mxu0 %v905_v40 }
  0x2c   :  { %549 = vmatmul.mubr.bf16.gmra.mxu1 %v906_v41  ;;  %491 = vmatprep.mubr.bf16.mxu0 %v908_v42 }
  0x2d   :  { %556 = vmatprep.mubr.bf16.mxu1 %v910_v43  ;;  %843 = vmatpush3.bf16.msra.mxu0 %v914_v44 }
  0x2e   :  { %860 = vmatpush3.bf16.msra.mxu1 %v914_v44  ;;  %844 = vmatprep.subr.bf16.mxu0 %v921_v45 }
  0x2f   :  { %857 = vmatprep.subr.bf16.mxu1 %v921_v45 }
  0x31   :  { %845 = vmatpush3.bf16.msra.mxu0 %v921_v45 }
  0x32   :  { %861 = vmatpush3.bf16.msra.mxu1 %v921_v45 }
  0x33   :  { %492 = vmatmul.mubr.bf16.gmra.mxu0 %v912_v46 }
  0x34   :  { %557 = vmatmul.mubr.bf16.gmra.mxu1 %v913_v47  ;;  %499 = vmatprep.mubr.bf16.mxu0 %v915_v48  ;;  %v749_v47 = vld [vmem:[%s1152_s3] ss:$0 sm:$0xff] }
  0x35   :  { %564 = vmatprep.mubr.bf16.mxu1 %v917_v49 }
  0x3b   :  { %500 = vmatmul.mubr.bf16.gmra.mxu0 %v919_v50 }
  0x3c   :  { %565 = vmatmul.mubr.bf16.gmra.mxu1 %v920_v51  ;;  %846 = vmatprep.mubr.msk.bf16.mxu0 %vm430_vm0, %v922_v52 }
  0x3d   :  { %850 = vmatprep.mubr.msk.bf16.mxu1 %vm430_vm0, %v923_v53 }
  0x43   :  { %847 = vmatmul.mubr.msk.bf16.vlgmr.msra.gmra.mxu0 %vm430_vm0, %v924_v54 }
  0x44   :  { %851 = vmatmul.mubr.msk.bf16.vlgmr.msra.gmra.mxu1 %vm430_vm0, %v925_v55 }
  0xe3   :  { %v766_v56 = vpop.f32.mrf.mxu0 }
  0xe4   :  { %v806_v57 = vpop.f32.mrf.mxu1 }
  0xe5   :  { %v767_v58 = vpop.f32.mrf.mxu0 }
  0xe6   :  { %v807_v59 = vpop.f32.mrf.mxu1  ;;  %v768_v25 = vadd.f32 %v767_v58, %v766_v56 }
  0xe7   :  { %v769_v60 = vpop.f32.mrf.mxu0  ;;  %v808_v26 = vadd.f32 %v807_v59, %v806_v57 }
  0xe8   :  { %v809_v61 = vpop.f32.mrf.mxu1 }
  0xe9   :  { %v770_v62 = vpop.f32.mrf.mxu0  ;;  %v543_v44 = vadd.f32 %v808_v26, %v768_v25 }
  0xea   :  { %v810_v63 = vpop.f32.mrf.mxu1  ;;  %v771_v40 = vadd.f32 %v770_v62, %v769_v60 }
  0xeb   :  { %v772_v0 = vpop.f32.mrf.mxu0  ;;  %v811_v41 = vadd.f32 %v810_v63, %v809_v61 }
  0xec   :  { %v812_v1 = vpop.f32.mrf.mxu1 }
  0xed   :  { %v773_v2 = vpop.f32.mrf.mxu0  ;;  %v546_v63 = vadd.f32 %v811_v41, %v771_v40 }
  0xee   :  { %v813_v3 = vpop.f32.mrf.mxu1  ;;  %v774_v19 = vadd.f32 %v773_v2, %v772_v0 }
  0xef   :  { %v775_v4 = vpop.f32.mrf.mxu0  ;;  %v814_v20 = vadd.f32 %v813_v3, %v812_v1 }
  0xf0   :  { %v815_v5 = vpop.f32.mrf.mxu1 }
  0xf1   :  { %v776_v6 = vpop.f32.mrf.mxu0  ;;  %v551_v34 = vadd.f32 %v814_v20, %v774_v19 }
  0xf2   :  { %v816_v7 = vpop.f32.mrf.mxu1  ;;  %v777_v31 = vadd.f32 %v776_v6, %v775_v4 }
  0xf3   :  { %v778_v8 = vpop.f32.mrf.mxu0  ;;  %v817_v32 = vadd.f32 %v816_v7, %v815_v5 }
  0xf4   :  { %v818_v9 = vpop.f32.mrf.mxu1 }
  0xf5   :  { %v779_v10 = vpop.f32.mrf.mxu0  ;;  %v554_v54 = vadd.f32 %v817_v32, %v777_v31 }
  0xf6   :  { %v819_v11 = vpop.f32.mrf.mxu1  ;;  %v780_v28 = vadd.f32 %v779_v10, %v778_v8 }
  0xf7   :  { %v781_v12 = vpop.f32.mrf.mxu0  ;;  %v820_v29 = vadd.f32 %v819_v11, %v818_v9 }
  0xf8   :  { %v821_v13 = vpop.f32.mrf.mxu1 }
  0xf9   :  { %v782_v14 = vpop.f32.mrf.mxu0  ;;  %v559_v50 = vadd.f32 %v820_v29, %v780_v28 }
  0xfa   :  { %v822_v15 = vpop.f32.mrf.mxu1  ;;  %v783_v45 = vadd.f32 %v782_v14, %v781_v12 }
  0xfb   :  { %v784_v16 = vpop.f32.mrf.mxu0  ;;  %v823_v46 = vadd.f32 %v822_v15, %v821_v13 }
  0xfc   :  { %v824_v17 = vpop.f32.mrf.mxu1 }
  0xfd   :  { %v785_v18 = vpop.f32.mrf.mxu0  ;;  %v562_v4 = vadd.f32 %v823_v46, %v783_v45 }
  0xfe   :  { %v825_v21 = vpop.f32.mrf.mxu1  ;;  %v786_v22 = vadd.f32 %v785_v18, %v784_v16 }
  0xff   :  { %v826_v23 = vadd.f32 %v825_v21, %v824_v17  ;;  %v787_v24 = vpop.f32.mrf.mxu0 }
 0x100   :  { %v827_v27 = vpop.f32.mrf.mxu1 }
 0x101   :  { %v788_v30 = vpop.f32.mrf.mxu0  ;;  %v567_v39 = vadd.f32 %v826_v23, %v786_v22 }
 0x102   :  { %v828_v33 = vpop.f32.mrf.mxu1  ;;  %v789_v35 = vadd.f32 %v788_v30, %v787_v24 }
 0x103   :  { %v829_v36 = vadd.f32 %v828_v33, %v827_v27  ;;  %v848_v37 = vpop.f32.mrf.mxu0 }
 0x104   :  { %v616_v42 = vadd.f32 %v848_v37, %v551_v34  ;;  %v852_v43 = vpop.f32.mrf.mxu1 }
 0x105   :  { %v632_v48 = vadd.f32 %v852_v43, %v567_v39  ;;  %v607_v49 = vpop.f32.mrf.mxu0  ;;  %v570_v58 = vadd.f32 %v829_v36, %v789_v35 }
 0x106   :  { %v647_v51 = vmul.f32 %v748_v38, %v616_v42  ;;  %v608_v52 = vadd.f32 %v607_v49, %v543_v44  ;;  %v623_v53 = vpop.f32.mrf.mxu1 }
 0x107   :  { %v651_v55 = vmul.f32 %v748_v38, %v632_v48  ;;  %v624_v56 = vadd.f32 %v623_v53, %v559_v50  ;;  %v849_v57 = vpop.f32.mrf.mxu0 }
 0x108   :  { %v662_v59 = vadd.f32 %v749_v47, %v647_v51  ;;  %v645_v60 = vmul.f32 %v748_v38, %v608_v52  ;;  %v619_v61 = vadd.f32 %v849_v57, %v554_v54  ;;  %v853_v62 = vpop.f32.mrf.mxu1 }
 0x109   :  { %v666_v0 = vadd.f32 %v749_v47, %v651_v55  ;;  %v649_v1 = vmul.f32 %v748_v38, %v624_v56  ;;  %v635_v2 = vadd.f32 %v853_v62, %v570_v58  ;;  %v610_v3 = vpop.f32.mrf.mxu0 }
 0x10a   :  { %v670_v5 = vmax.f32 %v662_v59, 0.0  ;;  %v660_v6 = vadd.f32 %v749_v47, %v645_v60  ;;  %v648_v7 = vmul.f32 %v748_v38, %v619_v61  ;;  %v611_v8 = vadd.f32 %v610_v3, %v546_v63  ;;  %v626_v9 = vpop.f32.mrf.mxu1 }
 0x10b   :  { %v674_v10 = vmax.f32 %v666_v0, 0.0  ;;  %v664_v11 = vadd.f32 %v749_v47, %v649_v1  ;;  %v652_v12 = vmul.f32 %v748_v38, %v635_v2  ;;  %v627_v13 = vadd.f32 %v626_v9, %v562_v4 }
 0x10c   :  { %678 = vst [vmem:[%s1153_s4 + $0x10] sm:$0xff] %v670_v5  ;;  %v668_v14 = vmax.f32 %v660_v6, 0.0  ;;  %v663_v15 = vadd.f32 %v749_v47, %v648_v7  ;;  %v646_v16 = vmul.f32 %v748_v38, %v611_v8 }
 0x10d   :  { %682 = vst [vmem:[%s1153_s4 + $0x30] sm:$0xff] %v674_v10  ;;  %v672_v17 = vmax.f32 %v664_v11, 0.0  ;;  %v667_v18 = vadd.f32 %v749_v47, %v652_v12  ;;  %v650_v19 = vmul.f32 %v748_v38, %v627_v13 }
 0x10e   :  { %676 = vst [vmem:[%s1153_s4] sm:$0xff] %v668_v14  ;;  %v671_v20 = vmax.f32 %v663_v15, 0.0  ;;  %v661_v21 = vadd.f32 %v749_v47, %v646_v16 }
 0x10f   :  { %680 = vst [vmem:[%s1153_s4 + $0x20] sm:$0xff] %v672_v17  ;;  %v675_v22 = vmax.f32 %v667_v18, 0.0  ;;  %v665_v23 = vadd.f32 %v749_v47, %v650_v19 }
 0x110   :  { %679 = vst [vmem:[%s1153_s4 + $0x18] sm:$0xff] %v671_v20  ;;  %v669_v24 = vmax.f32 %v661_v21, 0.0 }
 0x111   :  { %683 = vst [vmem:[%s1153_s4 + $0x38] sm:$0xff] %v675_v22  ;;  %v673_v25 = vmax.f32 %v665_v23, 0.0 }
 0x112   :  { %677 = vst [vmem:[%s1153_s4 + $0x8] sm:$0xff] %v669_v24 }
 0x113   :  { %681 = vst [vmem:[%s1153_s4 + $0x28] sm:$0xff] %v673_v25 }

// kernel: forward.12
= control target key start
LH: loop header
LB: loop body
LE: loop exit
PB: predicated region body
PF: predicated region fallthrough
CT: control target
= control target key end

     0   :  { %vm217_vm0 = vcmask 261120   ;;  %s376_s1 = inlined_call_operand.vmem [shape: bf16[256,32], index: 1, kind: input, shape index: {}]   ;;  %s377_s0 = inlined_call_operand.vmem [shape: bf16[16,256], index: 0, kind: input, shape index: {}]   ;;  %s378_s2 = inlined_call_operand.vmem [shape: f32[1,32], index: 2, kind: input, shape index: {}]   ;;  %s379_s3 = inlined_call_operand.vmem [shape: f32[1,32], index: 3, kind: input, shape index: {}]   ;;  %s380_s4 = inlined_call_operand.vmem [shape: f32[16,32], index: 4, kind: output, shape index: {}]  }
   0x1   :  { %v266_v0 = vld [vmem:[%s376_s1 + $0x78] sm:$0xff]   ;;  %v268_v2 = vld [vmem:[%s376_s1 + $0x70] sm:$0xff]   ;;  %v270_v4 = vld [vmem:[%s376_s1 + $0x68] sm:$0xff]  }
   0x2   :  { %v267_v1 = vld [vmem:[%s376_s1 + $0x38] sm:$0xff]   ;;  %244 = vmatprep.subr.bf16.mxu0 %v266_v0  ;;  %v269_v3 = vld [vmem:[%s376_s1 + $0x30] sm:$0xff]   ;;  %v271_v5 = vld [vmem:[%s376_s1 + $0x28] sm:$0xff]  }
   0x3   :  { %245 = vmatpush3.bf16.msra.mxu0 %v267_v1  ;;  %v272_v6 = vld [vmem:[%s376_s1 + $0x60] sm:$0xff]   ;;  %v274_v8 = vld [vmem:[%s376_s1 + $0x58] sm:$0xff]   ;;  %v276_v10 = vld [vmem:[%s376_s1 + $0x50] sm:$0xff]  }
   0x4   :  { %246 = vmatprep.subr.bf16.mxu0 %v268_v2  ;;  %v273_v7 = vld [vmem:[%s376_s1 + $0x20] sm:$0xff]   ;;  %v275_v9 = vld [vmem:[%s376_s1 + $0x18] sm:$0xff]   ;;  %v277_v12 = vld [vmem:[%s376_s1 + $0x10] sm:$0xff]  }
   0x5   :  { %v284_v11 = vld [vmem:[%s377_s0 + $0x4] ss:$8 sps:$4 sm:$0xff]   ;;  %v282_v17 = vld [vmem:[%s377_s0] ss:$8 sps:$4 sm:$0xff]  }
   0x6   :  { %190 = vmatprep.mubr.bf16.mxu0 %v284_v11  ;;  %v278_v13 = vld [vmem:[%s376_s1 + $0x48] sm:$0xff]   ;;  %v280_v15 = vld [vmem:[%s376_s1 + $0x40] sm:$0xff]  }
   0x7   :  { %247 = vmatpush3.bf16.msra.mxu0 %v269_v3  ;;  %v279_v14 = vld [vmem:[%s376_s1 + $0x8] sm:$0xff]   ;;  %v281_v16 = vld [vmem:[%s376_s1] sm:$0xff]  }
   0x8   :  { %248 = vmatprep.subr.bf16.mxu0 %v270_v4  ;;  %v242_v20 = vld [vmem:[%s378_s2] ss:$0 sm:$0xff] }
   0x9   :  { %v243_v22 = vld [vmem:[%s379_s3] ss:$0 sm:$0xff] }
   0xb   :  { %249 = vmatpush3.bf16.msra.mxu0 %v271_v5 }
   0xc   :  { %250 = vmatprep.subr.bf16.mxu0 %v272_v6 }
   0xf   :  { %251 = vmatpush3.bf16.msra.mxu0 %v273_v7 }
  0x10   :  { %252 = vmatprep.subr.bf16.mxu0 %v274_v8 }
  0x13   :  { %253 = vmatpush3.bf16.msra.mxu0 %v275_v9 }
  0x14   :  { %254 = vmatprep.subr.bf16.mxu0 %v276_v10 }
  0x17   :  { %255 = vmatpush3.bf16.msra.mxu0 %v277_v12 }
  0x18   :  { %256 = vmatprep.subr.bf16.mxu0 %v278_v13 }
  0x1b   :  { %257 = vmatpush3.bf16.msra.mxu0 %v279_v14 }
  0x1c   :  { %258 = vmatprep.subr.bf16.mxu0 %v280_v15 }
  0x1f   :  { %259 = vmatpush3.bf16.msra.mxu0 %v281_v16 }
  0x22   :  { %191 = vmatmul.mubr.bf16.vlgmr.msra.gmra.mxu0 %v282_v17 }
  0xe2   :  { %v260_v18 = vpop.f32.mrf.mxu0 }
  0xe4   :  { %v261_v19 = vpop.f32.mrf.mxu0 }
  0xe5   :  { %v262_v21 = vadd.f32 %v261_v19, %v260_v18 }
  0xe6   :  { %v263_v23 = vpop.f32.mrf.mxu0 }
  0xe7   :  { %v206_v24 = vmul.f32 %v262_v21, %v242_v20 }
  0xe8   :  { %v264_v25 = vpop.f32.mrf.mxu0 }
  0xe9   :  { %v215_v26 = vadd.f32 %v243_v22, %v206_v24  ;;  %v265_v27 = vadd.f32 %v264_v25, %v263_v23 }
  0xeb   :  { %218 = vst.msk [vmem:[%s380_s4] sm:$0xff] %vm217_vm0, %v215_v26  ;;  %v207_v28 = vmul.f32 %v265_v27, %v242_v20 }
  0xed   :  { %v216_v29 = vadd.f32 %v243_v22, %v207_v28 }
  0xef   :  { %219 = vst.msk [vmem:[%s380_s4 + $0x8] sm:$0xff] %vm217_vm0, %v216_v29 }

// kernel: forward.17
= control target key start
LH: loop header
LB: loop body
LE: loop exit
PB: predicated region body
PF: predicated region fallthrough
CT: control target
= control target key end

     0   :  { %v133_v0 = vmov 0.0   ;;  %vm134_vm0 = vmmov 0   ;;  %vm41_vm1 = vcmask 261120   ;;  %vm104_vm2 = vcmask 23552   ;;  %s181_s1 = inlined_call_operand.vmem [shape: bf16[32,3], index: 1, kind: input, shape index: {}]   ;;  %s182_s0 = inlined_call_operand.vmem [shape: bf16[16,32], index: 0, kind: input, shape index: {}]   ;;  %s183_s2 = inlined_call_operand.vmem [shape: f32[1,3], index: 2, kind: input, shape index: {}]   ;;  %s184_s3 = inlined_call_operand.vmem [shape: f32[1,3], index: 3, kind: input, shape index: {}]   ;;  %s185_s4 = inlined_call_operand.vmem [shape: f32[16,3], index: 4, kind: output, shape index: {}]  }
   0x1   :  { %120 = vmatprep.subr.bf16.mxu0 %v133_v0  ;;  %v130_v1 = vld [vmem:[%s181_s1 + $0x8] sm:$0xff]   ;;  %124 = vmatprep.mubr.msk.bf16.mxu0 %vm134_vm0, %v133_v0  ;;  %v131_v2 = vld [vmem:[%s181_s1] sm:$0xff]  }
   0x2   :  { %121 = vmatpush3.bf16.msra.mxu0 %v130_v1  ;;  %v132_v3 = vld [vmem:[%s182_s0] sm:$0xff]  }
   0x3   :  { %122 = vmatprep.subr.bf16.mxu0 %v133_v0  ;;  %v115_v4 = vld [vmem:[%s183_s2] ss:$0 sm:$0xff] }
   0x4   :  { %v116_v6 = vld [vmem:[%s184_s3] ss:$0 sm:$0xff] }
   0x6   :  { %123 = vmatpush3.bf16.msra.mxu0 %v131_v2 }
   0x9   :  { %125 = vmatmul.mubr.msk.bf16.vlgmr.msra.gmra.mxu0 %vm41_vm1, %v132_v3 }
  0xc9   :  { %v79_v5 = vpop.f32.mrf.mxu0 }
  0xca   :  { %v93_v7 = vmul.f32 %v115_v4, %v79_v5 }
  0xcb   :  { %v126_v8 = vpop.f32.mrf.mxu0 }
  0xcc   :  { %v102_v9 = vadd.f32 %v116_v6, %v93_v7 }
  0xcd   :  { %v82_v10 = vpop.f32.mrf.mxu0 }
  0xce   :  { %105 = vst.msk [vmem:[%s185_s4] sm:$0xff] %vm104_vm2, %v102_v9  ;;  %v94_v11 = vmul.f32 %v115_v4, %v82_v10 }
  0xcf   :  { %v127_v12 = vpop.f32.mrf.mxu0 }
  0xd0   :  { %v103_v13 = vadd.f32 %v116_v6, %v94_v11 }
  0xd2   :  { %106 = vst.msk [vmem:[%s185_s4 + $0x8] sm:$0xff] %vm104_vm2, %v103_v13 }

// kernel: forward.13
= control target key start
LH: loop header
LB: loop body
LE: loop exit
PB: predicated region body
PF: predicated region fallthrough
CT: control target
= control target key end

     0   :  { %s2565_s17 = smov 0   ;;  %s2870_s0 = inlined_call_operand.vmem [shape: f32[2,8,32], index: 0, kind: input, shape index: {}]   ;;  %s2871_s1 = inlined_call_operand.vmem [shape: bf16[4,32,8], index: 1, kind: input, shape index: {}]   ;;  %s2872_s2 = inlined_call_operand.vmem [shape: bf16[4,32,8], index: 2, kind: input, shape index: {}]   ;;  %s2873_s3 = inlined_call_operand.vmem [shape: bf16[4,32,8], index: 3, kind: input, shape index: {}]   ;;  %s2874_s4 = inlined_call_operand.vmem [shape: f32[4,1,8], index: 4, kind: input, shape index: {}]   ;;  %s2875_s5 = inlined_call_operand.vmem [shape: f32[4,1,8], index: 5, kind: input, shape index: {}]   ;;  %s2876_s6 = inlined_call_operand.vmem [shape: f32[4,1,8], index: 6, kind: input, shape index: {}]   ;;  %s2877_s7 = inlined_call_operand.vmem [shape: bf16[4,8,32], index: 7, kind: input, shape index: {}]   ;;  %s2878_s8 = inlined_call_operand.vmem [shape: f32[1,32], index: 8, kind: input, shape index: {}]   ;;  %s2879_s9 = inlined_call_operand.vmem [shape: f32[1,32], index: 9, kind: input, shape index: {}]   ;;  %s2880_s10 = inlined_call_operand.vmem [shape: f32[1,32], index: 10, kind: input, shape index: {}]   ;;  %s2881_s11 = inlined_call_operand.vmem [shape: f32[2,8,32], index: 11, kind: output, shape index: {}]  }
   0x1 LB: > { %s2099_s18 = sadd.s32 4294967295, %s2501_s17   ;;  %p2103_p0 = scmp.ge.s32.totalorder %s2501_s17, 1  ;;  %s2501_s17 = sphi %s2565_s17, %s21_s17  }
   0x2   : > { %p336_p1 = scmp.lt.s32.totalorder %s2501_s17, 3 }
   0x4   : > { %p337_p2 = pnand %p2103_p0, %p336_p1 }
   0x5   : > { %p374_p3 = scmp.lt.s32.totalorder (!%p337_p2), %s2099_s18, 1 }
   0x6   : > { %340 = sbr.rel (%p337_p2) target bundleno = 3955 (0xf73), region = 64 }
   0xb   : > { %v2453_v0 = vld [vmem:[%s2871_s1 + $0x8] sm:$0xff]   ;;  %v2503_v1 = vmov 0.0   ;;  %v2455_v3 = vld [vmem:[%s2871_s1] sm:$0xff]   ;;  %vm2504_vm0 = vmmov 0   ;;  %s2883_s18 = smov (!%p374_p3, %s2099_s18), 1  ;;  %vm408_vm1 = vcmask 261120  }
   0xc   : > { %2283 = vmatprep.subr.bf16.mxu0 %v2503_v1  ;;  %2291 = vmatprep.subr.bf16.mxu1 %v2503_v1  ;;  %v2454_v2 = vld [vmem:[%s2872_s2 + $0x8] sm:$0xff]   ;;  %v2456_v4 = vld [vmem:[%s2872_s2] sm:$0xff]   ;;  %s2104_s27 = sshll.u32 %s2883_s18, 3  ;;  %vm578_vm2 = vcmask 64512   ;;  %v2459_v32 = vld [vmem:[%s2871_s1 + $0x18] sm:$0xff]   ;;  %vm1104_vm3 = vcmask 1043456  }
   0xd   : > { %2284 = vmatpush3.bf16.msra.mxu0 %v2453_v0  ;;  %2287 = vmatprep.mubr.msk.bf16.mxu0 %vm2504_vm0, %v2503_v1  ;;  %s377_s30 = scalar_lea.vmem %s2870_s0, %s2104_s27  ;;  %v2110_v7 = vld [vmem:[%s2875_s5] ss:$0 sm:$0xff]  ;;  %v2457_v19 = vld [vmem:[%s2873_s3 + $0x8] sm:$0xff]   ;;  %v2461_v37 = vld [vmem:[%s2871_s1 + $0x10] sm:$0xff]   ;;  %s381_s12 = scalar_lea.vmem %s2881_s11, %s2104_s27 }
   0xe   : > { %2292 = vmatpush3.bf16.msra.mxu1 %v2454_v2  ;;  %2285 = vmatprep.subr.bf16.mxu0 %v2503_v1  ;;  %v2602_v5 = vld [vmem:[%s377_s30] sm:$0xff]  ;;  %v2463_v38 = vld [vmem:[%s2873_s3 + $0x18] sm:$0xff]   ;;  %v2464_v39 = vld [vmem:[%s2873_s3 + $0x10] sm:$0xff]  }
   0xf   : > { %2293 = vmatprep.subr.bf16.mxu1 %v2503_v1  ;;  %2295 = vmatprep.mubr.msk.bf16.mxu1 %vm2504_vm0, %v2503_v1  ;;  %v2607_v6 = vpack.c.bf16 %v2602_v5, %v2602_v5  ;;  %v2106_v8 = vld [vmem:[%s2874_s4] ss:$0 sm:$0xff]  ;;  %v2460_v42 = vld [vmem:[%s2872_s2 + $0x18] sm:$0xff]   ;;  %v2462_v44 = vld [vmem:[%s2872_s2 + $0x10] sm:$0xff]  }
  0x10   : > { %v2458_v20 = vld [vmem:[%s2873_s3] sm:$0xff]  }
  0x11   : > { %2286 = vmatpush3.bf16.msra.mxu0 %v2455_v3  ;;  %v2114_v30 = vld [vmem:[%s2876_s6] ss:$0 sm:$0xff]  ;;  %v2135_v58 = vld [vmem:[%s2875_s5 + $0x1] ss:$0 sm:$0xff] }
  0x12   : > { %2294 = vmatpush3.bf16.msra.mxu1 %v2456_v4  ;;  %2299 = vmatprep.subr.bf16.mxu0 %v2503_v1  ;;  %v741_v45 = vld [vmem:[%s2877_s7] sm:$0xf] }
  0x13   : > { %2307 = vmatprep.subr.mxu1 %v2503_v1  ;;  %v1152_v46 = vsel %vm1104_vm3, %v741_v45, 0  ;;  %v2126_v59 = vld [vmem:[%s2874_s4 + $0x1] ss:$0 sm:$0xff] }
  0x14   : > { %2288 = vmatmul.mubr.msk.bf16.vlgmr.msra.gmra.mxu0 %vm408_vm1, %v2607_v6  ;;  %v2144_v61 = vld [vmem:[%s2876_s6 + $0x1] ss:$0 sm:$0xff] }
  0x15   : > { %2296 = vmatmul.mubr.msk.bf16.vlgmr.msra.gmra.mxu1 %vm408_vm1, %v2607_v6  ;;  %2303 = vmatprep.mubr.msk.bf16.mxu0 %vm2504_vm0, %v2503_v1 }
  0x16   : > { %2309 = vmatprep.mubr.msk.f32.mxu1 %vm2504_vm0, %v2503_v1  ;;  %2300 = vmatpush3.bf16.msra.mxu0 %v2457_v19 }
  0x17   : > { %2301 = vmatprep.subr.bf16.mxu0 %v2503_v1 }
  0x1a   : > { %2302 = vmatpush3.bf16.msra.mxu0 %v2458_v20  ;;  %v2465_v20 = vld [vmem:[%s2872_s2 + $0x28] sm:$0xff]  }
  0x1b   : > { %2317 = vmatprep.subr.bf16.mxu0 %v2503_v1 }
  0x1d   : > { %2304 = vmatmul.mubr.msk.bf16.vlgmr.msra.gmra.mxu0 %vm408_vm1, %v2607_v6 }
  0x1e   : > { %2321 = vmatprep.mubr.msk.bf16.mxu0 %vm2504_vm0, %v2503_v1  ;;  %2318 = vmatpush3.bf16.msra.mxu0 %v2459_v32 }
  0x1f   : > { %2319 = vmatprep.subr.bf16.mxu0 %v2503_v1 }
  0x22   : > { %2320 = vmatpush3.bf16.msra.mxu0 %v2461_v37  ;;  %v2468_v37 = vld [vmem:[%s2871_s1 + $0x20] sm:$0xff]  }
  0x23   : > { %2333 = vmatprep.subr.bf16.mxu0 %v2503_v1 }
  0x25   : > { %2322 = vmatmul.mubr.msk.bf16.vlgmr.msra.gmra.mxu0 %vm408_vm1, %v2607_v6 }
  0x26   : > { %2337 = vmatprep.mubr.msk.bf16.mxu0 %vm2504_vm0, %v2503_v1  ;;  %2334 = vmatpush3.bf16.msra.mxu0 %v2463_v38 }
  0x27   : > { %2335 = vmatprep.subr.bf16.mxu0 %v2503_v1 }
  0x2a   : > { %2336 = vmatpush3.bf16.msra.mxu0 %v2464_v39 }
  0x2b   : > { %2357 = vmatprep.subr.bf16.mxu0 %v2503_v1 }
  0x2d   : > { %2338 = vmatmul.mubr.msk.bf16.vlgmr.msra.gmra.mxu0 %vm408_vm1, %v2607_v6 }
  0x2e   : > { %2359 = vmatprep.mubr.msk.bf16.mxu0 %vm2504_vm0, %v2503_v1  ;;  %2358 = vmatpush3.bf16.msra.mxu0 %v1152_v46 }
  0x2f   : > { %2371 = vmatprep.subr.bf16.mxu0 %v2503_v1 }
  0xd4   : > { %v446_v9 = vpop.f32.mrf.mxu0 }
  0xd5   : > { %v509_v10 = vpop.f32.mrf.mxu1  ;;  %v447_v12 = vadd.f32 %v2106_v8, %v446_v9 }
  0xd6   : > { %v510_v11 = vadd.f32 %v2110_v7, %v509_v10  ;;  %v2289_v13 = vpop.f32.mrf.mxu0 }
  0xd7   : > { %v2297_v14 = vpop.f32.mrf.mxu1 }
  0xd8   : > { %2308 = vmatpush3.xpose.msk.msra.mxu1 %vm578_vm2, %v510_v11  ;;  %v449_v15 = vpop.f32.mrf.mxu0 }
  0xd9   : > { %v512_v16 = vpop.f32.mrf.mxu1  ;;  %2312 = vmatprep.subr.mxu1 %v2503_v1 }
  0xda   : > { %v2290_v17 = vpop.f32.mrf.mxu0 }
  0xdb   : > { %v2298_v18 = vpop.f32.mrf.mxu1  ;;  %2310 = vmatmul.mubr.msk.f32.vlgmr.msra.gmra.mxu1 %vm578_vm2, %v447_v12 }
  0xdc   : > { %2314 = vmatprep.mubr.msk.f32.mxu1 %vm2504_vm0, %v2503_v1 }
  0xdd   : > { %v572_v31 = vpop.f32.mrf.mxu0 }
  0xde   : > { %v573_v33 = vadd.f32 %v2114_v30, %v572_v31 }
  0xdf   : > { %v2305_v34 = vpop.f32.mrf.mxu0 }
  0xe0   : > { %2313 = vmatpush3.msra.mxu1 %v573_v33  ;;  %v2467_v34 = vld [vmem:[%s2871_s1 + $0x28] sm:$0xff]  }
  0xe1   : > { %v575_v35 = vpop.f32.mrf.mxu0  ;;  %2325 = vmatprep.subr.bf16.mxu1 %v2503_v1 }
  0xe3   : > { %v2306_v36 = vpop.f32.mrf.mxu0 }
  0xe5   : > { %v801_v47 = vpop.f32.mrf.mxu0 }
  0xe6   : > { %v802_v63 = vadd.f32 %v2126_v59, %v801_v47  ;;  %v2177_v59 = vld [vmem:[%s2876_s6 + $0x2] ss:$0 sm:$0xff] }
  0xe7   : > { %v2323_v48 = vpop.f32.mrf.mxu0 }
  0xe8   : > { %v2469_v48 = vld [vmem:[%s2873_s3 + $0x28] sm:$0xff]  }
  0xe9   : > { %v804_v49 = vpop.f32.mrf.mxu0 }
  0xea   : > { %v2470_v49 = vld [vmem:[%s2873_s3 + $0x20] sm:$0xff]  }
  0xeb   : > { %v2324_v50 = vpop.f32.mrf.mxu0 }
  0xed   : > { %v931_v51 = vpop.f32.mrf.mxu0 }
  0xee   : > { %v932_v2 = vadd.f32 %v2144_v61, %v931_v51 }
  0xef   : > { %v2339_v52 = vpop.f32.mrf.mxu0 }
  0xf1   : > { %v934_v53 = vpop.f32.mrf.mxu0 }
  0xf3   : > { %v2340_v54 = vpop.f32.mrf.mxu0 }
 0x19b   : > { %v651_v21 = vpop.f32.mrf.mxu1 }
 0x19c   : > { %v655_v22 = vmul.f32 0.35355338, %v651_v21  ;;  %v2466_v21 = vld [vmem:[%s2872_s2 + $0x20] sm:$0xff]  }
 0x19d   : > { %v2311_v23 = vpop.f32.mrf.mxu1 }
 0x19e   : > { %v656_v24 = vsel %vm578_vm2, %v655_v22, -inf }
 0x19f   : > { %657 = vmax.xlane.f32.xlu0 %v656_v24 }
 0x228   : > { %v658_v25 = vpop.xlane.xlu0 %657 }
 0x229   : > { %v659_v26 = vsub.f32 %v655_v22, %v658_v25  ;;  %v2151_v25 = vld [vmem:[%s2877_s7 + $0x4] sm:$0xf] }
 0x22b   : > { %v660_v27 = vmul.f32 1.442695, %v659_v26  ;;  %v1106_v26 = vsel %vm1104_vm3, %v2151_v25, 0 }
 0x22d   : > { %2477 = vpow2.f32 %v660_v27  ;;  %v2168_v27 = vld [vmem:[%s2875_s5 + $0x2] ss:$0 sm:$0xff] }
 0x23a   : > { %v2478_v28 = vpop.eup %2477 }
 0x23b   : > { %v662_v29 = vsel %vm578_vm2, %v2478_v28, 0.0 }
 0x23c   : > { %663 = vadd.xlane.f32.xlu0 %v662_v29 }
 0x2c5   : > { %v664_v40 = vpop.xlane.xlu0 %663 }
 0x2c6   : > { %2479 = vrcp.f32 %v664_v40 }
 0x2d3   : > { %v2480_v41 = vpop.eup %2479 }
 0x2d4   : > { %v666_v43 = vmul.f32 %v2480_v41, %v2478_v28 }
 0x2d6   : > { %2315 = vmatmul.mubr.msk.f32.vlgmr.msra.gmra.mxu1 %vm578_vm2, %v666_v43 }
 0x2d7   : > { %2326 = vmatpush3.bf16.msra.mxu1 %v2460_v42  ;;  %2329 = vmatprep.mubr.msk.bf16.mxu1 %vm2504_vm0, %v2503_v1  ;;  %v2159_v42 = vld [vmem:[%s2874_s4 + $0x2] ss:$0 sm:$0xff] }
 0x2d8   : > { %2327 = vmatprep.subr.bf16.mxu1 %v2503_v1 }
 0x2db   : > { %2328 = vmatpush3.bf16.msra.mxu1 %v2462_v44 }
 0x2dc   : > { %2341 = vmatprep.subr.mxu1 %v2503_v1 }
 0x2de   : > { %2330 = vmatmul.mubr.msk.bf16.vlgmr.msra.gmra.mxu1 %vm408_vm1, %v2607_v6 }
 0x2df   : > { %2343 = vmatprep.mubr.msk.f32.mxu1 %vm2504_vm0, %v2503_v1 }
 0x396   : > { %v736_v55 = vpop.f32.mrf.mxu1 }
 0x397   : > { %v740_v56 = vpack.c.bf16 %v736_v55, %v736_v55 }
 0x398   : > { %v2316_v57 = vpop.f32.mrf.mxu1 }
 0x399   : > { %2360 = vmatmul.mubr.msk.bf16.vlgmr.msra.gmra.mxu0 %vm578_vm2, %v740_v56 }
 0x39a   : > { %2375 = vmatprep.mubr.msk.bf16.mxu0 %vm2504_vm0, %v2503_v1  ;;  %2372 = vmatpush3.bf16.msra.mxu0 %v2465_v20 }
 0x39b   : > { %2373 = vmatprep.subr.bf16.mxu0 %v2503_v1 }
 0x39e   : > { %v866_v60 = vpop.f32.mrf.mxu1  ;;  %2374 = vmatpush3.bf16.msra.mxu0 %v2466_v21 }
 0x39f   : > { %v867_v62 = vadd.f32 %v2135_v58, %v866_v60  ;;  %2387 = vmatprep.subr.mxu0 %v2503_v1 }
 0x3a0   : > { %v2331_v0 = vpop.f32.mrf.mxu1 }
 0x3a1   : > { %2342 = vmatpush3.xpose.msk.msra.mxu1 %vm578_vm2, %v867_v62  ;;  %2376 = vmatmul.mubr.msk.bf16.vlgmr.msra.gmra.mxu0 %vm408_vm1, %v2607_v6 }
 0x3a2   : > { %v869_v3 = vpop.f32.mrf.mxu1  ;;  %2346 = vmatprep.subr.mxu1 %v2503_v1  ;;  %2389 = vmatprep.mubr.msk.f32.mxu0 %vm2504_vm0, %v2503_v1 }
 0x3a4   : > { %v2332_v4 = vpop.f32.mrf.mxu1  ;;  %2344 = vmatmul.mubr.msk.f32.vlgmr.msra.gmra.mxu1 %vm578_vm2, %v802_v63 }
 0x3a5   : > { %2347 = vmatpush3.msra.mxu1 %v932_v2  ;;  %2348 = vmatprep.mubr.msk.f32.mxu1 %vm2504_vm0, %v2503_v1 }
 0x3a6   : > { %2351 = vmatprep.subr.bf16.mxu1 %v2503_v1 }
 0x459   : > { %v2708_v7 = vpop.f32.mrf.mxu0 }
 0x45b   : > { %v2361_v8 = vpop.f32.mrf.mxu0 }
 0x45c   : > { %v2184_v8 = vld [vmem:[%s2877_s7 + $0x8] sm:$0xf] }
 0x45d   : > { %v1191_v9 = vpop.f32.mrf.mxu0 }
 0x45e   : > { %v1557_v9 = vsel %vm1104_vm3, %v2184_v8, 0 }
 0x45f   : > { %v2362_v10 = vpop.f32.mrf.mxu0 }
 0x460   : > { %v2472_v10 = vld [vmem:[%s2871_s1 + $0x38] sm:$0xff]  }
 0x461   : > { %v1318_v28 = vpop.f32.mrf.mxu0 }
 0x462   : > { %v1319_v29 = vadd.f32 %v2168_v27, %v1318_v28  ;;  %v2200_v27 = vld [vmem:[%s2875_s5 + $0x3] ss:$0 sm:$0xff] }
 0x463   : > { %v2377_v30 = vpop.f32.mrf.mxu0  ;;  %v2191_v28 = vld [vmem:[%s2874_s4 + $0x3] ss:$0 sm:$0xff] }
 0x464   : > { %v1009_v11 = vpop.f32.mrf.mxu1  ;;  %2388 = vmatpush3.xpose.msk.msra.mxu0 %vm578_vm2, %v1319_v29 }
 0x465   : > { %v1013_v12 = vmul.f32 0.35355338, %v1009_v11  ;;  %v1321_v31 = vpop.f32.mrf.mxu0  ;;  %2392 = vmatprep.subr.mxu0 %v2503_v1  ;;  %v2474_v11 = vld [vmem:[%s2871_s1 + $0x30] sm:$0xff]  }
 0x466   : > { %v2345_v13 = vpop.f32.mrf.mxu1 }
 0x467   : > { %v1014_v14 = vsel %vm578_vm2, %v1013_v12, -inf  ;;  %v2378_v32 = vpop.f32.mrf.mxu0  ;;  %v2471_v13 = vld [vmem:[%s2872_s2 + $0x38] sm:$0xff]  }
 0x468   : > { %1015 = vmax.xlane.f32.xlu1 %v1014_v14 }
 0x4f1   : > { %v1016_v15 = vpop.xlane.xlu1 %1015 }
 0x4f2   : > { %v1017_v16 = vsub.f32 %v1013_v12, %v1016_v15 }
 0x4f4   : > { %v1018_v17 = vmul.f32 1.442695, %v1017_v16  ;;  %v2473_v16 = vld [vmem:[%s2872_s2 + $0x30] sm:$0xff]  }
 0x4f6   : > { %2481 = vpow2.f32 %v1018_v17 }
 0x503   : > { %v2482_v18 = vpop.eup %2481 }
 0x504   : > { %v1020_v19 = vsel %vm578_vm2, %v2482_v18, 0.0 }
 0x505   : > { %1021 = vadd.xlane.f32.xlu1 %v1020_v19 }
 0x58e   : > { %v1022_v22 = vpop.xlane.xlu1 %1021 }
 0x58f   : > { %2483 = vrcp.f32 %v1022_v22 }
 0x59c   : > { %v2484_v23 = vpop.eup %2483 }
 0x59d   : > { %v1024_v24 = vmul.f32 %v2484_v23, %v2482_v18 }
 0x59f   : > { %2349 = vmatmul.mubr.msk.f32.vlgmr.msra.gmra.mxu1 %vm578_vm2, %v1024_v24 }
 0x5a0   : > { %2353 = vmatprep.mubr.msk.bf16.mxu1 %vm2504_vm0, %v2503_v1  ;;  %2352 = vmatpush3.bf16.msra.mxu1 %v1106_v26 }
 0x5a1   : > { %2363 = vmatprep.subr.bf16.mxu1 %v2503_v1 }
 0x65f   : > { %v1094_v33 = vpop.f32.mrf.mxu1 }
 0x660   : > { %v1098_v35 = vpack.c.bf16 %v1094_v33, %v1094_v33 }
 0x661   : > { %v2350_v36 = vpop.f32.mrf.mxu1 }
 0x662   : > { %2354 = vmatmul.mubr.msk.bf16.vlgmr.msra.gmra.mxu1 %vm578_vm2, %v1098_v35  ;;  %v2476_v35 = vld [vmem:[%s2873_s3 + $0x30] sm:$0xff]  }
 0x663   : > { %2364 = vmatpush3.bf16.msra.mxu1 %v2467_v34  ;;  %2367 = vmatprep.mubr.msk.bf16.mxu1 %vm2504_vm0, %v2503_v1  ;;  %v2475_v34 = vld [vmem:[%s2873_s3 + $0x38] sm:$0xff]  }
 0x664   : > { %2365 = vmatprep.subr.bf16.mxu1 %v2503_v1 }
 0x667   : > { %2366 = vmatpush3.bf16.msra.mxu1 %v2468_v37 }
 0x668   : > { %2379 = vmatprep.subr.bf16.mxu1 %v2503_v1 }
 0x66a   : > { %2368 = vmatmul.mubr.msk.bf16.vlgmr.msra.gmra.mxu1 %vm408_vm1, %v2607_v6 }
 0x66b   : > { %2383 = vmatprep.mubr.msk.bf16.mxu1 %vm2504_vm0, %v2503_v1  ;;  %2380 = vmatpush3.bf16.msra.mxu1 %v2469_v48 }
 0x66c   : > { %2381 = vmatprep.subr.bf16.mxu1 %v2503_v1 }
 0x66f   : > { %2382 = vmatpush3.bf16.msra.mxu1 %v2470_v49 }
 0x670   : > { %2397 = vmatprep.subr.bf16.mxu1 %v2503_v1 }
 0x672   : > { %2384 = vmatmul.mubr.msk.bf16.vlgmr.msra.gmra.mxu1 %vm408_vm1, %v2607_v6 }
 0x673   : > { %2399 = vmatprep.mubr.msk.bf16.mxu1 %vm2504_vm0, %v2503_v1  ;;  %2398 = vmatpush3.bf16.msra.mxu1 %v1557_v9 }
 0x674   : > { %2411 = vmatprep.subr.bf16.mxu1 %v2503_v1 }
 0x722   : > { %v2752_v38 = vpop.f32.mrf.mxu1 }
 0x723   : > { %v1189_v21 = vadd.f32 %v2708_v7, %v2752_v38 }
 0x724   : > { %v2355_v39 = vpop.f32.mrf.mxu1 }
 0x726   : > { %v1145_v40 = vpop.f32.mrf.mxu1 }
 0x728   : > { %v2356_v41 = vpop.f32.mrf.mxu1 }
 0x72a   : > { %v1253_v43 = vpop.f32.mrf.mxu1 }
 0x72b   : > { %v1254_v44 = vadd.f32 %v2159_v42, %v1253_v43 }
 0x72c   : > { %v2369_v45 = vpop.f32.mrf.mxu1 }
 0x72d   : > { %2390 = vmatmul.mubr.msk.f32.vlgmr.msra.gmra.mxu0 %vm578_vm2, %v1254_v44 }
 0x72e   : > { %v1256_v46 = vpop.f32.mrf.mxu1  ;;  %2394 = vmatprep.mubr.msk.f32.mxu0 %vm2504_vm0, %v2503_v1 }
 0x730   : > { %v2370_v47 = vpop.f32.mrf.mxu1 }
 0x732   : > { %v1383_v60 = vpop.f32.mrf.mxu1 }
 0x733   : > { %v1384_v61 = vadd.f32 %v2177_v59, %v1383_v60 }
 0x734   : > { %v2385_v62 = vpop.f32.mrf.mxu1 }
 0x735   : > { %2393 = vmatpush3.msra.mxu0 %v1384_v61 }
 0x736   : > { %v1386_v63 = vpop.f32.mrf.mxu1  ;;  %2403 = vmatprep.subr.bf16.mxu0 %v2503_v1 }
 0x738   : > { %v2386_v0 = vpop.f32.mrf.mxu1 }
 0x7ed   : > { %v1461_v50 = vpop.f32.mrf.mxu0 }
 0x7ee   : > { %v1465_v51 = vmul.f32 0.35355338, %v1461_v50 }
 0x7ef   : > { %v2391_v52 = vpop.f32.mrf.mxu0 }
 0x7f0   : > { %v1466_v53 = vsel %vm578_vm2, %v1465_v51, -inf  ;;  %v2216_v52 = vld [vmem:[%s2877_s7 + $0xc] sm:$0xf] }
 0x7f1   : > { %1467 = vmax.xlane.f32.xlu0 %v1466_v53  ;;  %v1963_v53 = vsel %vm1104_vm3, %v2216_v52, 0 }
 0x87a   : > { %v1468_v54 = vpop.xlane.xlu0 %1467 }
 0x87b   : > { %v1469_v55 = vsub.f32 %v1465_v51, %v1468_v54 }
 0x87d   : > { %v1470_v56 = vmul.f32 1.442695, %v1469_v55 }
 0x87f   : > { %2485 = vpow2.f32 %v1470_v56 }
 0x88c   : > { %v2486_v57 = vpop.eup %2485 }
 0x88d   : > { %v1472_v58 = vsel %vm578_vm2, %v2486_v57, 0.0 }
 0x88e   : > { %1473 = vadd.xlane.f32.xlu1 %v1472_v58  ;;  %v2218_v58 = vld [vmem:[%s2878_s8] ss:$0 sm:$0xff] }
 0x917   : > { %v1474_v2 = vpop.xlane.xlu1 %1473 }
 0x918   : > { %2487 = vrcp.f32 %v1474_v2 }
 0x925   : > { %v2488_v3 = vpop.eup %2487 }
 0x926   : > { %v1476_v4 = vmul.f32 %v2488_v3, %v2486_v57 }
 0x928   : > { %2395 = vmatmul.mubr.msk.f32.vlgmr.msra.gmra.mxu0 %vm578_vm2, %v1476_v4 }
 0x929   : > { %2407 = vmatprep.mubr.msk.bf16.mxu0 %vm2504_vm0, %v2503_v1  ;;  %2404 = vmatpush3.bf16.msra.mxu0 %v2472_v10 }
 0x92a   : > { %2405 = vmatprep.subr.bf16.mxu0 %v2503_v1 }
 0x92d   : > { %2406 = vmatpush3.bf16.msra.mxu0 %v2474_v11 }
 0x92e   : > { %2419 = vmatprep.subr.bf16.mxu0 %v2503_v1 }
 0x930   : > { %2408 = vmatmul.mubr.msk.bf16.vlgmr.msra.gmra.mxu0 %vm408_vm1, %v2607_v6 }
 0x931   : > { %2423 = vmatprep.mubr.msk.bf16.mxu0 %vm2504_vm0, %v2503_v1  ;;  %2420 = vmatpush3.bf16.msra.mxu0 %v2475_v34 }
 0x932   : > { %2421 = vmatprep.subr.bf16.mxu0 %v2503_v1 }
 0x935   : > { %2422 = vmatpush3.bf16.msra.mxu0 %v2476_v35 }
 0x936   : > { %2437 = vmatprep.subr.bf16.mxu0 %v2503_v1 }
 0x938   : > { %2424 = vmatmul.mubr.msk.bf16.vlgmr.msra.gmra.mxu0 %vm408_vm1, %v2607_v6 }
 0x939   : > { %2439 = vmatprep.mubr.msk.bf16.mxu0 %vm2504_vm0, %v2503_v1  ;;  %2438 = vmatpush3.bf16.msra.mxu0 %v1963_v53 }
 0x9e8   : > { %v1546_v12 = vpop.f32.mrf.mxu0 }
 0x9e9   : > { %v1550_v14 = vpack.c.bf16 %v1546_v12, %v1546_v12 }
 0x9ea   : > { %v2396_v15 = vpop.f32.mrf.mxu0 }
 0x9eb   : > { %2400 = vmatmul.mubr.msk.bf16.vlgmr.msra.gmra.mxu1 %vm578_vm2, %v1550_v14 }
 0x9ec   : > { %2412 = vmatpush3.bf16.msra.mxu1 %v2471_v13  ;;  %2415 = vmatprep.mubr.msk.bf16.mxu1 %vm2504_vm0, %v2503_v1 }
 0x9ed   : > { %2413 = vmatprep.subr.bf16.mxu1 %v2503_v1 }
 0x9f0   : > { %2414 = vmatpush3.bf16.msra.mxu1 %v2473_v16  ;;  %v1659_v17 = vpop.f32.mrf.mxu0  ;;  %v2220_v16 = vld [vmem:[%s2880_s10] ss:$0 sm:$0xff] }
 0x9f1   : > { %2427 = vmatprep.subr.mxu1 %v2503_v1  ;;  %v1660_v31 = vadd.f32 %v2191_v28, %v1659_v17 }
 0x9f2   : > { %v2409_v18 = vpop.f32.mrf.mxu0 }
 0x9f3   : > { %2416 = vmatmul.mubr.msk.bf16.vlgmr.msra.gmra.mxu1 %vm408_vm1, %v2607_v6  ;;  %v2209_v6 = vld [vmem:[%s2876_s6 + $0x3] ss:$0 sm:$0xff] }
 0x9f4   : > { %2429 = vmatprep.mubr.msk.f32.mxu1 %vm2504_vm0, %v2503_v1  ;;  %v1662_v19 = vpop.f32.mrf.mxu0 }
 0x9f6   : > { %v2410_v20 = vpop.f32.mrf.mxu0 }
 0x9f8   : > { %v1789_v45 = vpop.f32.mrf.mxu0 }
 0x9fa   : > { %v2425_v46 = vpop.f32.mrf.mxu0 }
 0x9fc   : > { %v1792_v47 = vpop.f32.mrf.mxu0 }
 0x9fe   : > { %v2426_v48 = vpop.f32.mrf.mxu0 }
 0xaab   : > { %v1593_v22 = vpop.f32.mrf.mxu1 }
 0xaac   : > { %v1599_v23 = vadd.f32 %v1593_v22, %v1189_v21 }
 0xaad   : > { %v2401_v24 = vpop.f32.mrf.mxu1 }
 0xaaf   : > { %v1596_v25 = vpop.f32.mrf.mxu1 }
 0xab1   : > { %v2402_v26 = vpop.f32.mrf.mxu1 }
 0xab3   : > { %v1724_v29 = vpop.f32.mrf.mxu1 }
 0xab4   : > { %v1725_v30 = vadd.f32 %v2200_v27, %v1724_v29 }
 0xab5   : > { %v2417_v32 = vpop.f32.mrf.mxu1 }
 0xab6   : > { %2428 = vmatpush3.xpose.msk.msra.mxu1 %vm578_vm2, %v1725_v30 }
 0xab7   : > { %v1727_v7 = vpop.f32.mrf.mxu1  ;;  %2432 = vmatprep.subr.mxu1 %v2503_v1 }
 0xab9   : > { %v2418_v33 = vpop.f32.mrf.mxu1  ;;  %2430 = vmatmul.mubr.msk.f32.vlgmr.msra.gmra.mxu1 %vm578_vm2, %v1660_v31 }
 0xaba   : > { %2434 = vmatprep.mubr.msk.f32.mxu1 %vm2504_vm0, %v2503_v1  ;;  %v1790_v1 = vadd.f32 %v2209_v6, %v1789_v45 }
 0xabc   : > { %2433 = vmatpush3.msra.mxu1 %v1790_v1 }
 0xb79   : > { %v1867_v36 = vpop.f32.mrf.mxu1 }
 0xb7a   : > { %v1871_v37 = vmul.f32 0.35355338, %v1867_v36 }
 0xb7b   : > { %v2431_v38 = vpop.f32.mrf.mxu1 }
 0xb7c   : > { %v1872_v39 = vsel %vm578_vm2, %v1871_v37, -inf }
 0xb7d   : > { %1873 = vmax.xlane.f32.xlu0 %v1872_v39 }
 0xc06   : > { %v1874_v40 = vpop.xlane.xlu0 %1873 }
 0xc07   : > { %v1875_v41 = vsub.f32 %v1871_v37, %v1874_v40 }
 0xc09   : > { %v1876_v42 = vmul.f32 1.442695, %v1875_v41 }
 0xc0b   : > { %2489 = vpow2.f32 %v1876_v42 }
 0xc18   : > { %v2490_v43 = vpop.eup %2489 }
 0xc19   : > { %v1878_v44 = vsel %vm578_vm2, %v2490_v43, 0.0 }
 0xc1a   : > { %1879 = vadd.xlane.f32.xlu1 %v1878_v44 }
 0xca3   : > { %v1880_v49 = vpop.xlane.xlu1 %1879 }
 0xca4   : > { %2491 = vrcp.f32 %v1880_v49 }
 0xcb1   : > { %v2492_v50 = vpop.eup %2491 }
 0xcb2   : > { %v1882_v51 = vmul.f32 %v2492_v50, %v2490_v43 }
 0xcb4   : > { %2435 = vmatmul.mubr.msk.f32.vlgmr.msra.gmra.mxu1 %vm578_vm2, %v1882_v51 }
 0xd74   : > { %v1952_v54 = vpop.f32.mrf.mxu1 }
 0xd75   : > { %v1956_v55 = vpack.c.bf16 %v1952_v54, %v1952_v54 }
 0xd76   : > { %v2436_v56 = vpop.f32.mrf.mxu1 }
 0xd77   : > { %2440 = vmatmul.mubr.msk.bf16.vlgmr.msra.gmra.mxu0 %vm578_vm2, %v1956_v55 }
 0xe37   : > { %v1999_v57 = vpop.f32.mrf.mxu0 }
 0xe38   : > { %v2005_v59 = vadd.f32 %v1999_v57, %v1599_v23 }
 0xe39   : > { %v2441_v60 = vpop.f32.mrf.mxu0 }
 0xe3a   : > { %v2013_v61 = vadd.f32 %v2218_v58, %v2005_v59 }
 0xe3b   : > { %v2002_v62 = vpop.f32.mrf.mxu0 }
 0xe3c   : > { %v2014_v63 = vadd.f32 %v2013_v61, %v2602_v5  ;;  %v2219_v5 = vld [vmem:[%s2879_s9] ss:$0 sm:$0xff] }
 0xe3d   : > { %v2442_v0 = vpop.f32.mrf.mxu0 }
 0xe3e   : > { %v2015_v2 = vsel %vm408_vm1, %v2014_v63, 0.0 }
 0xe3f   : > { %2016 = vadd.xlane.f32.xlu0 %v2015_v2 }
 0xec8   : > { %v2017_v3 = vpop.xlane.xlu0 %2016 }
 0xec9   : > { %v2019_v4 = vmul.f32 0.03125, %v2017_v3 }
 0xecb   : > { %v2020_v8 = vsub.f32 %v2014_v63, %v2019_v4 }
 0xecd   : > { %v2021_v9 = vmul.f32 %v2020_v8, %v2020_v8 }
 0xecf   : > { %v2022_v10 = vsel %vm408_vm1, %v2021_v9, 0.0 }
 0xed0   : > { %2023 = vadd.xlane.f32.xlu1 %v2022_v10 }
 0xf59   : > { %v2024_v11 = vpop.xlane.xlu1 %2023 }
 0xf5a   : > { %v2025_v12 = vmul.f32 0.03125, %v2024_v11 }
 0xf5c   : > { %v2026_v13 = vadd.f32 1e-05, %v2025_v12 }
 0xf5e   : > { %2493 = vrsqrt.f32 %v2026_v13 }
 0xf6b   : > { %v2494_v14 = vpop.eup %2493 }
 0xf6c   : > { %v2028_v15 = vmul.f32 %v2494_v14, %v2020_v8 }
 0xf6e   : > { %v2036_v17 = vmul.f32 %v2219_v5, %v2028_v15 }
 0xf70   : > { %v2044_v18 = vadd.f32 %v2220_v16, %v2036_v17 }
 0xf72   : > { %2045 = vst.msk [vmem:[%s381_s12] sm:$0xff] %vm408_vm1, %v2044_v18 }
 0xf73 PF: > { %s21_s17 = sadd.s32 1, %s2501_s17  }
 0xf74   : > { %p18_p4 = scmp.ge.s32.totalorder %s21_s17, 4  }
 0xf76   :  { %20 = sbr.rel (!%p18_p4) target bundleno = 1 (0x1), region = 115 }

// kernel: forward.14
= control target key start
LH: loop header
LB: loop body
LE: loop exit
PB: predicated region body
PF: predicated region fallthrough
CT: control target
= control target key end

     0   :  { %s2898_s24 = smov 0   ;;  %s3534_s0 = inlined_call_operand.vmem [shape: f32[2,8,32], index: 0, kind: input, shape index: {}]   ;;  %s3535_s1 = inlined_call_operand.vmem [shape: bf16[32,2048], index: 1, kind: input, shape index: {}]   ;;  %s3536_s2 = inlined_call_operand.vmem [shape: f32[1,2048], index: 2, kind: input, shape index: {}]   ;;  %s3537_s3 = inlined_call_operand.vmem [shape: bf16[2048,32], index: 3, kind: input, shape index: {}]   ;;  %s3538_s4 = inlined_call_operand.vmem [shape: f32[1,32], index: 4, kind: input, shape index: {}]   ;;  %s3539_s5 = inlined_call_operand.vmem [shape: f32[1,32], index: 5, kind: input, shape index: {}]   ;;  %s3540_s6 = inlined_call_operand.vmem [shape: f32[1,32], index: 6, kind: input, shape index: {}]   ;;  %s3541_s7 = inlined_call_operand.vmem [shape: f32[2,8,32], index: 7, kind: output, shape index: {}]  }
   0x1 LB: > { %s2353_s25 = sadd.s32 4294967295, %s2855_s24   ;;  %p2357_p0 = scmp.ge.s32.totalorder %s2855_s24, 1  ;;  %s2855_s24 = sphi %s2898_s24, %s17_s24  }
   0x2   : > { %p236_p1 = scmp.lt.s32.totalorder %s2855_s24, 3 }
   0x4   : > { %p237_p2 = pnand %p2357_p0, %p236_p1 }
   0x5   : > { %p2915_p3 = scmp.lt.s32.totalorder (!%p237_p2), %s2353_s25, 1 }
   0x6   : > { %240 = sbr.rel (%p237_p2) target bundleno = 833 (0x341), region = 48 }
   0xb   : > { %v293_v0 = vld [vmem:[%s3535_s1 + $0x80] sm:$0xff]  ;;  %v294_v2 = vld [vmem:[%s3535_s1 + $0x88] sm:$0xff]  ;;  %v2857_v8 = vmov 0   ;;  %s3544_s25 = smov (!%p2915_p3, %s2353_s25), 1  ;;  %v295_v14 = vld [vmem:[%s3535_s1 + $0x90] sm:$0xff]  ;;  %vm553_vm0 = vcmask 261120  }
   0xc   : > { %v301_v1 = vld [vmem:[%s3535_s1 + $0xc0] sm:$0xff]  ;;  %v302_v4 = vld [vmem:[%s3535_s1 + $0xc8] sm:$0xff]  ;;  %589 = vmatprep.mubr.bf16.mxu0 %v2857_v8  ;;  %630 = vmatprep.mubr.bf16.mxu1 %v2857_v8  ;;  %v303_v16 = vld [vmem:[%s3535_s1 + $0xd0] sm:$0xff]  ;;  %s2358_s30 = sshll.u32 %s3544_s25, 3 }
   0xd   : > { %v2377_v3 = vcombine.high %v293_v0, %v301_v1  ;;  %v2376_v5 = vcombine.low %v293_v0, %v301_v1  ;;  %v277_v6 = vld [vmem:[%s3535_s1] sm:$0xff]  ;;  %v2379_v9 = vcombine.high %v294_v2, %v302_v4  ;;  %v2378_v10 = vcombine.low %v294_v2, %v302_v4  ;;  %v278_v12 = vld [vmem:[%s3535_s1 + $0x8] sm:$0xff]  ;;  %v296_v17 = vld [vmem:[%s3535_s1 + $0x98] sm:$0xff]  ;;  %s2958_s10 = scalar_lea.vmem %s3534_s0, %s2358_s30  ;;  %s273_s14 = scalar_lea.vmem %s3541_s7, %s2358_s30 }
   0xe   : > { %v285_v7 = vld [vmem:[%s3535_s1 + $0x40] sm:$0xff]  ;;  %v286_v13 = vld [vmem:[%s3535_s1 + $0x48] sm:$0xff]  ;;  %v304_v18 = vld [vmem:[%s3535_s1 + $0xd8] sm:$0xff]  ;;  %v2381_v21 = vcombine.high %v295_v14, %v303_v16  ;;  %v2380_v29 = vcombine.low %v295_v14, %v303_v16 }
   0xf   : > { %v2361_v11 = vcombine.high %v277_v6, %v285_v7  ;;  %569 = vmatprep.subr.bf16.mxu0 %v2377_v3  ;;  %v2363_v15 = vcombine.high %v278_v12, %v286_v13  ;;  %610 = vmatprep.subr.bf16.mxu1 %v2379_v9  ;;  %v2360_v19 = vcombine.low %v277_v6, %v285_v7  ;;  %v275_v22 = vld [vmem:[%s2958_s10] sm:$0xff]  ;;  %v279_v24 = vld [vmem:[%s3535_s1 + $0x10] sm:$0xff]  ;;  %v280_v27 = vld [vmem:[%s3535_s1 + $0x18] sm:$0xff] }
  0x10   : > { %570 = vmatpush1.bf16.msra.mxu0 %v2376_v5  ;;  %611 = vmatpush1.bf16.msra.mxu1 %v2378_v10  ;;  %v2362_v20 = vcombine.low %v278_v12, %v286_v13  ;;  %v2383_v23 = vcombine.high %v296_v17, %v304_v18  ;;  %v287_v25 = vld [vmem:[%s3535_s1 + $0x50] sm:$0xff]  ;;  %v2967_v26 = vpack.c.bf16 %v275_v22, %v275_v22  ;;  %v288_v28 = vld [vmem:[%s3535_s1 + $0x58] sm:$0xff]  ;;  %v297_v33 = vld [vmem:[%s3535_s1 + $0xa0] sm:$0xff] }
  0x11   : > { %571 = vmatprep.subr.bf16.mxu0 %v2361_v11  ;;  %612 = vmatprep.subr.bf16.mxu1 %v2363_v15  ;;  %v2382_v30 = vcombine.low %v296_v17, %v304_v18  ;;  %v2365_v31 = vcombine.high %v279_v24, %v287_v25  ;;  %v2367_v32 = vcombine.high %v280_v27, %v288_v28  ;;  %v305_v34 = vld [vmem:[%s3535_s1 + $0xe0] sm:$0xff]  ;;  %v298_v35 = vld [vmem:[%s3535_s1 + $0xa8] sm:$0xff]  ;;  %v299_v46 = vld [vmem:[%s3535_s1 + $0xb0] sm:$0xff] }
  0x12   : > { %v306_v36 = vld [vmem:[%s3535_s1 + $0xe8] sm:$0xff]  ;;  %v2364_v37 = vcombine.low %v279_v24, %v287_v25  ;;  %v281_v38 = vld [vmem:[%s3535_s1 + $0x20] sm:$0xff]  ;;  %v2366_v39 = vcombine.low %v280_v27, %v288_v28  ;;  %v2385_v40 = vcombine.high %v297_v33, %v305_v34  ;;  %v2384_v45 = vcombine.low %v297_v33, %v305_v34  ;;  %v307_v49 = vld [vmem:[%s3535_s1 + $0xf0] sm:$0xff] }
  0x13   : > { %v289_v41 = vld [vmem:[%s3535_s1 + $0x60] sm:$0xff]  ;;  %v2387_v42 = vcombine.high %v298_v35, %v306_v36  ;;  %v282_v43 = vld [vmem:[%s3535_s1 + $0x28] sm:$0xff]  ;;  %v2386_v47 = vcombine.low %v298_v35, %v306_v36  ;;  %v300_v51 = vld [vmem:[%s3535_s1 + $0xb8] sm:$0xff]  ;;  %v2389_v56 = vcombine.high %v299_v46, %v307_v49  ;;  %v2388_v61 = vcombine.low %v299_v46, %v307_v49 }
  0x14   : > { %572 = vmatpush1.bf16.msra.mxu0 %v2360_v19  ;;  %613 = vmatpush1.bf16.msra.mxu1 %v2362_v20  ;;  %v290_v44 = vld [vmem:[%s3535_s1 + $0x68] sm:$0xff]  ;;  %v2369_v48 = vcombine.high %v281_v38, %v289_v41  ;;  %v308_v52 = vld [vmem:[%s3535_s1 + $0xf8] sm:$0xff]  ;;  %v2368_v53 = vcombine.low %v281_v38, %v289_v41  ;;  %v283_v54 = vld [vmem:[%s3535_s1 + $0x30] sm:$0xff] }
  0x15   : > { %651 = vmatprep.subr.bf16.mxu0 %v2381_v21  ;;  %692 = vmatprep.subr.bf16.mxu1 %v2383_v23  ;;  %v2371_v50 = vcombine.high %v282_v43, %v290_v44  ;;  %v2370_v55 = vcombine.low %v282_v43, %v290_v44  ;;  %v291_v57 = vld [vmem:[%s3535_s1 + $0x70] sm:$0xff]  ;;  %v2391_v58 = vcombine.high %v300_v51, %v308_v52  ;;  %v284_v59 = vld [vmem:[%s3535_s1 + $0x38] sm:$0xff]  ;;  %v2726_v11 = vld [vmem:[%s3537_s3 + $0x68] sm:$0xff]  }
  0x16   : > { %v292_v60 = vld [vmem:[%s3535_s1 + $0x78] sm:$0xff]  ;;  %v2390_v62 = vcombine.low %v300_v51, %v308_v52  ;;  %v2373_v63 = vcombine.high %v283_v54, %v291_v57  ;;  %v2372_v1 = vcombine.low %v283_v54, %v291_v57  ;;  %v2722_v7 = vld [vmem:[%s3537_s3 + $0x70] sm:$0xff]   ;;  %v2727_v12 = vld [vmem:[%s3537_s3 + $0xe8] sm:$0xff]  }
  0x17   : > { %2392 = vmatmul.mubr.msk.bf16.vlgmr.msra.gmra.mxu0 %vm553_vm0, %v2967_v26  ;;  %2393 = vmatmul.mubr.msk.bf16.vlgmr.msra.gmra.mxu1 %vm553_vm0, %v2967_v26  ;;  %v2375_v0 = vcombine.high %v284_v59, %v292_v60  ;;  %v2718_v2 = vld [vmem:[%s3537_s3 + $0x78] sm:$0xff]   ;;  %v2374_v3 = vcombine.low %v284_v59, %v292_v60  ;;  %v2723_v9 = vld [vmem:[%s3537_s3 + $0xf0] sm:$0xff]   ;;  %v2728_v13 = vld [vmem:[%s3537_s3 + $0x28] sm:$0xff]  }
  0x18   : > { %652 = vmatpush1.bf16.msra.mxu0 %v2380_v29  ;;  %693 = vmatpush1.bf16.msra.mxu1 %v2382_v30  ;;  %v2719_v4 = vld [vmem:[%s3537_s3 + $0xf8] sm:$0xff]   ;;  %v2725_v10 = vld [vmem:[%s3537_s3 + $0xb0] sm:$0xff]   ;;  %v2729_v14 = vld [vmem:[%s3537_s3 + $0xa8] sm:$0xff]  }
  0x19   : > { %653 = vmatprep.subr.bf16.mxu0 %v2365_v31  ;;  %694 = vmatprep.subr.bf16.mxu1 %v2367_v32  ;;  %v2720_v5 = vld [vmem:[%s3537_s3 + $0x38] sm:$0xff]   ;;  %v2730_v15 = vld [vmem:[%s3537_s3 + $0x60] sm:$0xff]   ;;  %v2738_v23 = vld [vmem:[%s3537_s3 + $0x50] sm:$0xff]  }
  0x1a   : > { %671 = vmatprep.mubr.bf16.mxu0 %v2857_v8  ;;  %712 = vmatprep.mubr.bf16.mxu1 %v2857_v8  ;;  %v2721_v6 = vld [vmem:[%s3537_s3 + $0xb8] sm:$0xff]   ;;  %v2731_v16 = vld [vmem:[%s3537_s3 + $0xe0] sm:$0xff]   ;;  %v2739_v24 = vld [vmem:[%s3537_s3 + $0xd0] sm:$0xff]  }
  0x1b   : > { %v2732_v17 = vld [vmem:[%s3537_s3 + $0x20] sm:$0xff]   ;;  %v2734_v19 = vld [vmem:[%s3537_s3 + $0x58] sm:$0xff]   ;;  %v2740_v25 = vld [vmem:[%s3537_s3 + $0x10] sm:$0xff]  }
  0x1c   : > { %654 = vmatpush1.bf16.msra.mxu0 %v2364_v37  ;;  %695 = vmatpush1.bf16.msra.mxu1 %v2366_v39  ;;  %v2733_v18 = vld [vmem:[%s3537_s3 + $0xa0] sm:$0xff]   ;;  %v2735_v20 = vld [vmem:[%s3537_s3 + $0xd8] sm:$0xff]   ;;  %v2742_v27 = vld [vmem:[%s3537_s3 + $0x48] sm:$0xff]   ;;  %v313_v37 = vlaneseq }
  0x1d   : > { %733 = vmatprep.subr.bf16.mxu0 %v2385_v40  ;;  %774 = vmatprep.subr.bf16.mxu1 %v2387_v42  ;;  %v2736_v21 = vld [vmem:[%s3537_s3 + $0x18] sm:$0xff]   ;;  %v2743_v28 = vld [vmem:[%s3537_s3 + $0xc8] sm:$0xff]   ;;  %v2746_v31 = vld [vmem:[%s3537_s3 + $0x40] sm:$0xff]  }
  0x1e   : > { %v2737_v22 = vld [vmem:[%s3537_s3 + $0x98] sm:$0xff]   ;;  %v2744_v29 = vld [vmem:[%s3537_s3 + $0x8] sm:$0xff]   ;;  %v2747_v32 = vld [vmem:[%s3537_s3 + $0xc0] sm:$0xff]   ;;  %v3147_v38 = vshrl.u32 %v313_v37, 7 }
  0x1f   : > { %2394 = vmatmul.mubr.msk.bf16.vlgmr.msra.gmra.mxu0 %vm553_vm0, %v2967_v26  ;;  %2395 = vmatmul.mubr.msk.bf16.vlgmr.msra.gmra.mxu1 %vm553_vm0, %v2967_v26  ;;  %v2745_v30 = vld [vmem:[%s3537_s3 + $0x88] sm:$0xff]   ;;  %v2748_v33 = vld [vmem:[%s3537_s3] sm:$0xff]   ;;  %v2750_v35 = vld [vmem:[%s3537_s3 + $0x178] sm:$0xff]  }
  0x20   : > { %734 = vmatpush1.bf16.msra.mxu0 %v2384_v45  ;;  %775 = vmatpush1.bf16.msra.mxu1 %v2386_v47  ;;  %v2749_v34 = vld [vmem:[%s3537_s3 + $0x80] sm:$0xff]   ;;  %v2751_v36 = vld [vmem:[%s3537_s3 + $0x1f8] sm:$0xff]   ;;  %v315_v39 = vsub.s32 0, %v3147_v38  ;;  %v323_v41 = vsub.s32 2, %v3147_v38  ;;  %v319_v42 = vsub.s32 1, %v3147_v38  ;;  %v327_v43 = vsub.s32 3, %v3147_v38 }
  0x21   : > { %735 = vmatprep.subr.bf16.mxu0 %v2369_v48  ;;  %776 = vmatprep.subr.bf16.mxu1 %v2371_v50  ;;  %v3153_v40 = vld [vmem:[%s3536_s2] sm:$0xff]  ;;  %v343_v60 = vsub.s32 7, %v3147_v38 }
  0x22   : > { %753 = vmatprep.mubr.bf16.mxu0 %v2857_v8  ;;  %794 = vmatprep.mubr.bf16.mxu1 %v2857_v8  ;;  %v316_v44 = vrot.slane %v3153_v40, %v315_v39  ;;  %v324_v45 = vrot.slane %v3153_v40, %v323_v41  ;;  %v320_v46 = vrot.slane %v3153_v40, %v319_v42  ;;  %v2764_v37 = vld [vmem:[%s3537_s3 + $0x120] sm:$0xff]  }
  0x23   : > { %v328_v48 = vrot.slane %v3153_v40, %v327_v43 }
  0x24   : > { %736 = vmatpush1.bf16.msra.mxu0 %v2368_v53  ;;  %777 = vmatpush1.bf16.msra.mxu1 %v2370_v55  ;;  %v335_v55 = vsub.s32 5, %v3147_v38 }
  0x25   : > { %815 = vmatprep.subr.bf16.mxu0 %v2389_v56  ;;  %856 = vmatprep.subr.bf16.mxu1 %v2391_v58 }
  0x27   : > { %2396 = vmatmul.mubr.msk.bf16.vlgmr.msra.gmra.mxu0 %vm553_vm0, %v2967_v26  ;;  %2397 = vmatmul.mubr.msk.bf16.vlgmr.msra.gmra.mxu1 %vm553_vm0, %v2967_v26 }
  0x28   : > { %816 = vmatpush1.bf16.msra.mxu0 %v2388_v61  ;;  %857 = vmatpush1.bf16.msra.mxu1 %v2390_v62 }
  0x29   : > { %817 = vmatprep.subr.bf16.mxu0 %v2373_v63  ;;  %858 = vmatprep.subr.bf16.mxu1 %v2375_v0 }
  0x2a   : > { %835 = vmatprep.mubr.bf16.mxu0 %v2857_v8  ;;  %876 = vmatprep.mubr.bf16.mxu1 %v2857_v8  ;;  %v2724_v8 = vld [vmem:[%s3537_s3 + $0x30] sm:$0xff]  }
  0x2c   : > { %818 = vmatpush1.bf16.msra.mxu0 %v2372_v1  ;;  %859 = vmatpush1.bf16.msra.mxu1 %v2374_v3 }
  0x2d   : > { %2533 = vmatprep.subr.bf16.mxu0 %v2718_v2  ;;  %2555 = vmatprep.subr.bf16.mxu1 %v2719_v4  ;;  %v2752_v4 = vld [vmem:[%s3537_s3 + $0x138] sm:$0xff]  }
  0x2f   : > { %2398 = vmatmul.mubr.msk.bf16.vlgmr.msra.gmra.mxu0 %vm553_vm0, %v2967_v26  ;;  %2399 = vmatmul.mubr.msk.bf16.vlgmr.msra.gmra.mxu1 %vm553_vm0, %v2967_v26  ;;  %v2741_v26 = vld [vmem:[%s3537_s3 + $0x90] sm:$0xff]  }
  0x30   : > { %2534 = vmatpush3.bf16.msra.mxu0 %v2720_v5  ;;  %2556 = vmatpush3.bf16.msra.mxu1 %v2721_v6  ;;  %v336_v5 = vrot.slane %v3153_v40, %v335_v55 }
  0x31   : > { %2535 = vmatprep.subr.bf16.mxu0 %v2722_v7  ;;  %2557 = vmatprep.subr.bf16.mxu1 %v2723_v9  ;;  %v2753_v9 = vld [vmem:[%s3537_s3 + $0x1b8] sm:$0xff]  }
  0x34   : > { %2536 = vmatpush3.bf16.msra.mxu0 %v2724_v8  ;;  %2558 = vmatpush3.bf16.msra.mxu1 %v2725_v10  ;;  %v2754_v8 = vld [vmem:[%s3537_s3 + $0x170] sm:$0xff]  }
  0x35   : > { %2537 = vmatprep.subr.bf16.mxu0 %v2726_v11  ;;  %2559 = vmatprep.subr.bf16.mxu1 %v2727_v12  ;;  %v344_v11 = vrot.slane %v3153_v40, %v343_v60  ;;  %v2755_v12 = vld [vmem:[%s3537_s3 + $0x1f0] sm:$0xff]  }
  0x38   : > { %2538 = vmatpush3.bf16.msra.mxu0 %v2728_v13  ;;  %2560 = vmatpush3.bf16.msra.mxu1 %v2729_v14 }
  0x39   : > { %2539 = vmatprep.subr.bf16.mxu0 %v2730_v15  ;;  %2561 = vmatprep.subr.bf16.mxu1 %v2731_v16  ;;  %v2756_v15 = vld [vmem:[%s3537_s3 + $0x130] sm:$0xff]  }
  0x3c   : > { %2540 = vmatpush3.bf16.msra.mxu0 %v2732_v17  ;;  %2562 = vmatpush3.bf16.msra.mxu1 %v2733_v18  ;;  %v2757_v18 = vld [vmem:[%s3537_s3 + $0x1b0] sm:$0xff]  }
  0x3d   : > { %2541 = vmatprep.subr.bf16.mxu0 %v2734_v19  ;;  %2563 = vmatprep.subr.bf16.mxu1 %v2735_v20  ;;  %v2758_v19 = vld [vmem:[%s3537_s3 + $0x168] sm:$0xff]  }
  0x40   : > { %2542 = vmatpush3.bf16.msra.mxu0 %v2736_v21  ;;  %2564 = vmatpush3.bf16.msra.mxu1 %v2737_v22  ;;  %v2759_v22 = vld [vmem:[%s3537_s3 + $0x1e8] sm:$0xff]  }
  0x41   : > { %2543 = vmatprep.subr.bf16.mxu0 %v2738_v23  ;;  %2565 = vmatprep.subr.bf16.mxu1 %v2739_v24 }
  0x44   : > { %2544 = vmatpush3.bf16.msra.mxu0 %v2740_v25  ;;  %2566 = vmatpush3.bf16.msra.mxu1 %v2741_v26 }
  0x45   : > { %2545 = vmatprep.subr.bf16.mxu0 %v2742_v27  ;;  %2567 = vmatprep.subr.bf16.mxu1 %v2743_v28  ;;  %v2760_v27 = vld [vmem:[%s3537_s3 + $0x128] sm:$0xff]  }
  0x48   : > { %2546 = vmatpush3.bf16.msra.mxu0 %v2744_v29  ;;  %2568 = vmatpush3.bf16.msra.mxu1 %v2745_v30  ;;  %v2761_v30 = vld [vmem:[%s3537_s3 + $0x1a8] sm:$0xff]  }
  0x49   : > { %2547 = vmatprep.subr.bf16.mxu0 %v2746_v31  ;;  %2569 = vmatprep.subr.bf16.mxu1 %v2747_v32  ;;  %v2762_v31 = vld [vmem:[%s3537_s3 + $0x160] sm:$0xff]  }
  0x4c   : > { %2548 = vmatpush3.bf16.msra.mxu0 %v2748_v33  ;;  %2570 = vmatpush3.bf16.msra.mxu1 %v2749_v34  ;;  %v2763_v34 = vld [vmem:[%s3537_s3 + $0x1e0] sm:$0xff]  }
  0x4d   : > { %2577 = vmatprep.subr.bf16.mxu0 %v2750_v35  ;;  %2599 = vmatprep.subr.bf16.mxu1 %v2751_v36 }
  0xd7   : > { %v591_v47 = vpop.f32.mrf.mxu0  ;;  %v632_v50 = vpop.f32.mrf.mxu1 }
  0xd8   : > { %v592_v49 = vadd.f32 %v591_v47, %v316_v44  ;;  %v633_v51 = vadd.f32 %v632_v50, %v324_v45  ;;  %v331_v44 = vsub.s32 4, %v3147_v38  ;;  %v2766_v47 = vld [vmem:[%s3537_s3 + $0x158] sm:$0xff]  }
  0xd9   : > { %v593_v52 = vpop.f32.mrf.mxu0  ;;  %v634_v54 = vpop.f32.mrf.mxu1 }
  0xda   : > { %v594_v53 = vadd.f32 %v593_v52, %v320_v46  ;;  %v885_v56 = vmax.f32 %v592_v49, 0.0  ;;  %v887_v57 = vmax.f32 %v633_v51, 0.0  ;;  %v635_v58 = vadd.f32 %v634_v54, %v328_v48  ;;  %v2765_v46 = vld [vmem:[%s3537_s3 + $0x1a0] sm:$0xff]   ;;  %v3236_v49 = vld [vmem:[%s3536_s2 + $0x8] sm:$0xff]  ;;  %v2767_v51 = vld [vmem:[%s3537_s3 + $0x1d8] sm:$0xff]  }
  0xdb   : > { %v595_v59 = vpop.f32.mrf.mxu0  ;;  %v636_v62 = vpop.f32.mrf.mxu1  ;;  %v339_v48 = vsub.s32 6, %v3147_v38  ;;  %v2810_v38 = vld [vmem:[%s3537_s3 + $0x240] sm:$0xff]  }
  0xdc   : > { %v886_v61 = vmax.f32 %v594_v53, 0.0  ;;  %v888_v63 = vmax.f32 %v635_v58, 0.0  ;;  %v903_v1 = vpack.c.bf16 %v887_v57, %v887_v57  ;;  %v901_v6 = vpack.c.bf16 %v885_v56, %v885_v56  ;;  %v2768_v57 = vld [vmem:[%s3537_s3 + $0x118] sm:$0xff]  }
  0xdd   : > { %v596_v0 = vpop.f32.mrf.mxu0  ;;  %v637_v3 = vpop.f32.mrf.mxu1  ;;  %v364_v53 = vrot.slane %v3236_v49, %v331_v44  ;;  %v372_v56 = vrot.slane %v3236_v49, %v339_v48  ;;  %v2769_v59 = vld [vmem:[%s3537_s3 + $0x198] sm:$0xff]  }
  0xde   : > { %v902_v2 = vpack.c.bf16 %v886_v61, %v886_v61  ;;  %v904_v7 = vpack.c.bf16 %v888_v63, %v888_v63  ;;  %v2770_v61 = vld [vmem:[%s3537_s3 + $0x150] sm:$0xff]  }
  0xdf   : > { %v3184_v10 = vpop.f32.mrf.mxu0  ;;  %v3192_v13 = vpop.f32.mrf.mxu1  ;;  %v2771_v63 = vld [vmem:[%s3537_s3 + $0x1d0] sm:$0xff]  }
  0xe0   : > { %1980 = vmatprep.mubr.bf16.mxu0 %v902_v2  ;;  %2020 = vmatprep.mubr.bf16.mxu1 %v904_v7  ;;  %v332_v7 = vrot.slane %v3153_v40, %v331_v44 }
  0xe1   : > { %1981 = vmatmul.mubr.bf16.vlgmr.msra.gmra.mxu0 %v901_v6  ;;  %v675_v14 = vpop.f32.mrf.mxu0  ;;  %2021 = vmatmul.mubr.bf16.vlgmr.msra.gmra.mxu1 %v903_v1  ;;  %v716_v17 = vpop.f32.mrf.mxu1 }
  0xe2   : > { %2578 = vmatpush3.bf16.msra.mxu0 %v2752_v4  ;;  %v676_v16 = vadd.f32 %v675_v14, %v336_v5  ;;  %2600 = vmatpush3.bf16.msra.mxu1 %v2753_v9  ;;  %v717_v21 = vadd.f32 %v716_v17, %v344_v11  ;;  %v340_v4 = vrot.slane %v3153_v40, %v339_v48  ;;  %v2772_v5 = vld [vmem:[%s3537_s3 + $0x110] sm:$0xff]   ;;  %v2790_v48 = vld [vmem:[%s3537_s3 + $0x268] sm:$0xff]  }
  0xe3   : > { %2579 = vmatprep.subr.bf16.mxu0 %v2754_v8  ;;  %v677_v20 = vpop.f32.mrf.mxu0  ;;  %2601 = vmatprep.subr.bf16.mxu1 %v2755_v12  ;;  %v718_v24 = vpop.f32.mrf.mxu1  ;;  %v2773_v9 = vld [vmem:[%s3537_s3 + $0x190] sm:$0xff]   ;;  %v2774_v8 = vld [vmem:[%s3537_s3 + $0x148] sm:$0xff]   ;;  %v352_v40 = vrot.slane %v3236_v49, %v319_v42 }
  0xe4   : > { %v890_v23 = vmax.f32 %v676_v16, 0.0  ;;  %v892_v25 = vmax.f32 %v717_v21, 0.0  ;;  %v2775_v12 = vld [vmem:[%s3537_s3 + $0x1c8] sm:$0xff]   ;;  %v715_v17 = vadd.f32 %v3192_v13, %v340_v4  ;;  %v674_v20 = vadd.f32 %v3184_v10, %v332_v7  ;;  %v2779_v13 = vld [vmem:[%s3537_s3 + $0x1c0] sm:$0xff]  }
  0xe5   : > { %v678_v26 = vpop.f32.mrf.mxu0  ;;  %v719_v29 = vpop.f32.mrf.mxu1  ;;  %v2777_v42 = vld [vmem:[%s3537_s3 + $0x188] sm:$0xff]   ;;  %v2780_v10 = vld [vmem:[%s3537_s3 + $0x100] sm:$0xff]   ;;  %v356_v4 = vrot.slane %v3236_v49, %v323_v41  ;;  %v348_v7 = vrot.slane %v3236_v49, %v315_v39  ;;  %v376_v39 = vrot.slane %v3236_v49, %v343_v60 }
  0xe6   : > { %2580 = vmatpush3.bf16.msra.mxu0 %v2756_v15  ;;  %v906_v28 = vpack.c.bf16 %v890_v23, %v890_v23  ;;  %2602 = vmatpush3.bf16.msra.mxu1 %v2757_v18  ;;  %v908_v32 = vpack.c.bf16 %v892_v25, %v892_v25  ;;  %v360_v15 = vrot.slane %v3236_v49, %v327_v43  ;;  %v2776_v18 = vld [vmem:[%s3537_s3 + $0x108] sm:$0xff]   ;;  %v2778_v43 = vld [vmem:[%s3537_s3 + $0x140] sm:$0xff]   ;;  %v891_v23 = vmax.f32 %v715_v17, 0.0  ;;  %v2782_v26 = vld [vmem:[%s3537_s3 + $0x278] sm:$0xff]  }
  0xe7   : > { %2581 = vmatprep.subr.bf16.mxu0 %v2758_v19  ;;  %v3215_v33 = vpop.f32.mrf.mxu0  ;;  %2603 = vmatprep.subr.bf16.mxu1 %v2759_v22  ;;  %v3220_v35 = vpop.f32.mrf.mxu1  ;;  %v889_v24 = vmax.f32 %v674_v20, 0.0  ;;  %v2781_v25 = vld [vmem:[%s3537_s3 + $0x180] sm:$0xff]   ;;  %v2807_v41 = vld [vmem:[%s3537_s3 + $0x2c8] sm:$0xff]  }
  0xe8   : > { %2060 = vmatprep.mubr.bf16.mxu0 %v906_v28  ;;  %2100 = vmatprep.mubr.bf16.mxu1 %v908_v32  ;;  %v2813_v17 = vld [vmem:[%s3537_s3 + $0x280] sm:$0xff]  }
  0xe9   : > { %v757_v36 = vpop.f32.mrf.mxu0  ;;  %v798_v45 = vpop.f32.mrf.mxu1  ;;  %v905_v32 = vpack.c.bf16 %v889_v24, %v889_v24  ;;  %v2820_v24 = vld [vmem:[%s3537_s3 + $0x330] sm:$0xff]  }
  0xea   : > { %2582 = vmatpush3.bf16.msra.mxu0 %v2760_v27  ;;  %2604 = vmatpush3.bf16.msra.mxu1 %v2761_v30  ;;  %v758_v21 = vadd.f32 %v757_v36, %v352_v40  ;;  %v799_v22 = vadd.f32 %v798_v45, %v360_v15  ;;  %v2783_v27 = vld [vmem:[%s3537_s3 + $0x2f8] sm:$0xff]   ;;  %v907_v30 = vpack.c.bf16 %v891_v23, %v891_v23  ;;  %v2786_v36 = vld [vmem:[%s3537_s3 + $0x270] sm:$0xff]   ;;  %v2808_v40 = vld [vmem:[%s3537_s3 + $0x208] sm:$0xff]  }
  0xeb   : > { %2583 = vmatprep.subr.bf16.mxu0 %v2762_v31  ;;  %v759_v50 = vpop.f32.mrf.mxu0  ;;  %2605 = vmatprep.subr.bf16.mxu1 %v2763_v34  ;;  %v800_v52 = vpop.f32.mrf.mxu1  ;;  %v2784_v31 = vld [vmem:[%s3537_s3 + $0x238] sm:$0xff]   ;;  %v2809_v15 = vld [vmem:[%s3537_s3 + $0x288] sm:$0xff]  }
  0xec   : > { %v894_v28 = vmax.f32 %v758_v21, 0.0  ;;  %v896_v29 = vmax.f32 %v799_v22, 0.0  ;;  %v2785_v34 = vld [vmem:[%s3537_s3 + $0x2b8] sm:$0xff]   ;;  %v2791_v50 = vld [vmem:[%s3537_s3 + $0x2e8] sm:$0xff]   ;;  %v2818_v21 = vld [vmem:[%s3537_s3 + $0x370] sm:$0xff]  }
  0xed   : > { %v760_v54 = vpop.f32.mrf.mxu0  ;;  %v801_v58 = vpop.f32.mrf.mxu1  ;;  %v2793_v52 = vld [vmem:[%s3537_s3 + $0x2a8] sm:$0xff]   ;;  %v2819_v22 = vld [vmem:[%s3537_s3 + $0x3f0] sm:$0xff]  }
  0xee   : > { %2584 = vmatpush3.bf16.msra.mxu0 %v2764_v37  ;;  %2606 = vmatpush3.bf16.msra.mxu1 %v2765_v46  ;;  %v2787_v37 = vld [vmem:[%s3537_s3 + $0x2f0] sm:$0xff]   ;;  %v910_v44 = vpack.c.bf16 %v894_v28, %v894_v28  ;;  %v912_v45 = vpack.c.bf16 %v896_v29, %v896_v29  ;;  %v2795_v54 = vld [vmem:[%s3537_s3 + $0x2e0] sm:$0xff]   ;;  %v2798_v58 = vld [vmem:[%s3537_s3 + $0x258] sm:$0xff]  }
  0xef   : > { %2585 = vmatprep.subr.bf16.mxu0 %v2766_v47  ;;  %v837_v62 = vpop.f32.mrf.mxu0  ;;  %2607 = vmatprep.subr.bf16.mxu1 %v2767_v51  ;;  %v878_v1 = vpop.f32.mrf.mxu1  ;;  %v2788_v46 = vld [vmem:[%s3537_s3 + $0x230] sm:$0xff]   ;;  %v2792_v51 = vld [vmem:[%s3537_s3 + $0x228] sm:$0xff]  }
  0xf0   : > { %v3255_v0 = vadd.f32 %v837_v62, %v364_v53  ;;  %v3259_v3 = vadd.f32 %v878_v1, %v372_v56  ;;  %v2789_v47 = vld [vmem:[%s3537_s3 + $0x2b0] sm:$0xff]   ;;  %v2794_v53 = vld [vmem:[%s3537_s3 + $0x260] sm:$0xff]   ;;  %v2801_v62 = vld [vmem:[%s3537_s3 + $0x298] sm:$0xff]  }
  0xf1   : > { %v3257_v2 = vpop.f32.mrf.mxu0  ;;  %v3265_v6 = vpop.f32.mrf.mxu1  ;;  %v2796_v56 = vld [vmem:[%s3537_s3 + $0x220] sm:$0xff]   ;;  %v2803_v1 = vld [vmem:[%s3537_s3 + $0x2d0] sm:$0xff]   ;;  %v2824_v28 = vld [vmem:[%s3537_s3 + $0x328] sm:$0xff]  }
  0xf2   : > { %2586 = vmatpush3.bf16.msra.mxu0 %v2768_v57  ;;  %2608 = vmatpush3.bf16.msra.mxu1 %v2769_v59  ;;  %v2797_v57 = vld [vmem:[%s3537_s3 + $0x2a0] sm:$0xff]   ;;  %v2799_v59 = vld [vmem:[%s3537_s3 + $0x2d8] sm:$0xff]   ;;  %v2825_v29 = vld [vmem:[%s3537_s3 + $0x3a8] sm:$0xff]  }
  0xf3   : > { %2587 = vmatprep.subr.bf16.mxu0 %v2770_v61  ;;  %v841_v11 = vpop.f32.mrf.mxu0  ;;  %2609 = vmatprep.subr.bf16.mxu1 %v2771_v63  ;;  %v882_v14 = vpop.f32.mrf.mxu1  ;;  %v2800_v61 = vld [vmem:[%s3537_s3 + $0x218] sm:$0xff]   ;;  %v2802_v63 = vld [vmem:[%s3537_s3 + $0x250] sm:$0xff]  }
  0xf4   : > { %v368_v11 = vrot.slane %v3236_v49, %v335_v55  ;;  %v756_v14 = vadd.f32 %v3215_v33, %v348_v7  ;;  %v2811_v55 = vld [vmem:[%s3537_s3 + $0x2c0] sm:$0xff]  }
  0xf5   : > { %v842_v16 = vpop.f32.mrf.mxu0  ;;  %v883_v19 = vpop.f32.mrf.mxu1  ;;  %v2812_v49 = vld [vmem:[%s3537_s3 + $0x200] sm:$0xff]  }
  0xf6   : > { %2588 = vmatpush3.bf16.msra.mxu0 %v2772_v5  ;;  %2610 = vmatpush3.bf16.msra.mxu1 %v2773_v9  ;;  %v2804_v5 = vld [vmem:[%s3537_s3 + $0x210] sm:$0xff]   ;;  %v840_v60 = vadd.f32 %v3257_v2, %v368_v11  ;;  %v893_v16 = vmax.f32 %v756_v14, 0.0  ;;  %v2815_v2 = vld [vmem:[%s3537_s3 + $0x3f8] sm:$0xff]  }
  0xf7   : > { %2589 = vmatprep.subr.bf16.mxu0 %v2774_v8  ;;  %2611 = vmatprep.subr.bf16.mxu1 %v2775_v12  ;;  %v2805_v9 = vld [vmem:[%s3537_s3 + $0x290] sm:$0xff]   ;;  %v2806_v8 = vld [vmem:[%s3537_s3 + $0x248] sm:$0xff]   ;;  %v797_v12 = vadd.f32 %v3220_v35, %v356_v4  ;;  %v881_v35 = vadd.f32 %v3265_v6, %v376_v39 }
  0xf8   : > { %v898_v6 = vmax.f32 %v840_v60, 0.0 }
  0xf9   : > { %v895_v33 = vmax.f32 %v797_v12, 0.0  ;;  %v900_v19 = vmax.f32 %v881_v35, 0.0 }
  0xfa   : > { %2590 = vmatpush3.bf16.msra.mxu0 %v2776_v18  ;;  %2612 = vmatpush3.bf16.msra.mxu1 %v2777_v42  ;;  %v2814_v18 = vld [vmem:[%s3537_s3 + $0x378] sm:$0xff]   ;;  %v914_v23 = vpack.c.bf16 %v898_v6, %v898_v6 }
  0xfb   : > { %2591 = vmatprep.subr.bf16.mxu0 %v2778_v43  ;;  %2613 = vmatprep.subr.bf16.mxu1 %v2779_v13  ;;  %v911_v20 = vpack.c.bf16 %v895_v33, %v895_v33  ;;  %v2816_v42 = vld [vmem:[%s3537_s3 + $0x338] sm:$0xff]   ;;  %v909_v43 = vpack.c.bf16 %v893_v16, %v893_v16 }
  0xfc   : > { %v2817_v13 = vld [vmem:[%s3537_s3 + $0x3b8] sm:$0xff]  }
  0xfe   : > { %2592 = vmatpush3.bf16.msra.mxu0 %v2780_v10  ;;  %2614 = vmatpush3.bf16.msra.mxu1 %v2781_v25  ;;  %v916_v10 = vpack.c.bf16 %v900_v19, %v900_v19  ;;  %v2821_v25 = vld [vmem:[%s3537_s3 + $0x3b0] sm:$0xff]  }
  0xff   : > { %2621 = vmatprep.subr.bf16.mxu0 %v2782_v26  ;;  %2643 = vmatprep.subr.bf16.mxu1 %v2783_v27  ;;  %v2822_v26 = vld [vmem:[%s3537_s3 + $0x368] sm:$0xff]  }
 0x100   : > { %v2823_v27 = vld [vmem:[%s3537_s3 + $0x3e8] sm:$0xff]  }
 0x101   : > { %2061 = vmatmul.mubr.bf16.vlgmr.msra.gmra.mxu0 %v905_v32  ;;  %2101 = vmatmul.mubr.bf16.vlgmr.msra.gmra.mxu1 %v907_v30  ;;  %v2826_v30 = vld [vmem:[%s3537_s3 + $0x360] sm:$0xff]  }
 0x102   : > { %2622 = vmatpush3.bf16.msra.mxu0 %v2784_v31  ;;  %2644 = vmatpush3.bf16.msra.mxu1 %v2785_v34  ;;  %v2827_v31 = vld [vmem:[%s3537_s3 + $0x3e0] sm:$0xff]  }
 0x103   : > { %2623 = vmatprep.subr.bf16.mxu0 %v2786_v36  ;;  %2645 = vmatprep.subr.bf16.mxu1 %v2787_v37  ;;  %v2828_v32 = vld [vmem:[%s3537_s3 + $0x320] sm:$0xff]   ;;  %v2830_v36 = vld [vmem:[%s3537_s3 + $0x358] sm:$0xff]  }
 0x104   : > { %2140 = vmatprep.mubr.bf16.mxu0 %v910_v44  ;;  %2180 = vmatprep.mubr.bf16.mxu1 %v912_v45  ;;  %v2829_v34 = vld [vmem:[%s3537_s3 + $0x3a0] sm:$0xff]   ;;  %v2831_v37 = vld [vmem:[%s3537_s3 + $0x3d8] sm:$0xff]  }
 0x105   : > { %v2832_v44 = vld [vmem:[%s3537_s3 + $0x318] sm:$0xff]  }
 0x106   : > { %2624 = vmatpush3.bf16.msra.mxu0 %v2788_v46  ;;  %2646 = vmatpush3.bf16.msra.mxu1 %v2789_v47  ;;  %v2833_v45 = vld [vmem:[%s3537_s3 + $0x398] sm:$0xff]   ;;  %v2834_v46 = vld [vmem:[%s3537_s3 + $0x350] sm:$0xff]  }
 0x107   : > { %2625 = vmatprep.subr.bf16.mxu0 %v2790_v48  ;;  %2647 = vmatprep.subr.bf16.mxu1 %v2791_v50  ;;  %v2835_v47 = vld [vmem:[%s3537_s3 + $0x3d0] sm:$0xff]  }
 0x108   : > { %v2836_v48 = vld [vmem:[%s3537_s3 + $0x310] sm:$0xff]  }
 0x109   : > { %v2837_v50 = vld [vmem:[%s3537_s3 + $0x390] sm:$0xff]  }
 0x10a   : > { %2626 = vmatpush3.bf16.msra.mxu0 %v2792_v51  ;;  %2648 = vmatpush3.bf16.msra.mxu1 %v2793_v52  ;;  %v2838_v51 = vld [vmem:[%s3537_s3 + $0x348] sm:$0xff]  }
 0x10b   : > { %2627 = vmatprep.subr.bf16.mxu0 %v2794_v53  ;;  %2649 = vmatprep.subr.bf16.mxu1 %v2795_v54  ;;  %v2839_v52 = vld [vmem:[%s3537_s3 + $0x3c8] sm:$0xff]  }
 0x10c   : > { %v2840_v53 = vld [vmem:[%s3537_s3 + $0x308] sm:$0xff]  }
 0x10d   : > { %v2841_v54 = vld [vmem:[%s3537_s3 + $0x388] sm:$0xff]  }
 0x10e   : > { %2628 = vmatpush3.bf16.msra.mxu0 %v2796_v56  ;;  %2650 = vmatpush3.bf16.msra.mxu1 %v2797_v57  ;;  %v2842_v56 = vld [vmem:[%s3537_s3 + $0x340] sm:$0xff]  }
 0x10f   : > { %2629 = vmatprep.subr.bf16.mxu0 %v2798_v58  ;;  %2651 = vmatprep.subr.bf16.mxu1 %v2799_v59  ;;  %v2843_v57 = vld [vmem:[%s3537_s3 + $0x3c0] sm:$0xff]   ;;  %v899_v58 = vmax.f32 %v3259_v3, 0.0 }
 0x110   : > { %v2844_v59 = vld [vmem:[%s3537_s3 + $0x300] sm:$0xff]  }
 0x112   : > { %2630 = vmatpush3.bf16.msra.mxu0 %v2800_v61  ;;  %2652 = vmatpush3.bf16.msra.mxu1 %v2801_v62  ;;  %v897_v61 = vmax.f32 %v3255_v0, 0.0  ;;  %v2845_v62 = vld [vmem:[%s3537_s3 + $0x380] sm:$0xff]  }
 0x113   : > { %2631 = vmatprep.subr.bf16.mxu0 %v2802_v63  ;;  %2653 = vmatprep.subr.bf16.mxu1 %v2803_v1  ;;  %v915_v63 = vpack.c.bf16 %v899_v58, %v899_v58 }
 0x114   : > { %v913_v1 = vpack.c.bf16 %v897_v61, %v897_v61 }
 0x116   : > { %2632 = vmatpush3.bf16.msra.mxu0 %v2804_v5  ;;  %2654 = vmatpush3.bf16.msra.mxu1 %v2805_v9  ;;  %v2400_v5 = vld [vmem:[%s3538_s4] ss:$0 sm:$0xff] }
 0x117   : > { %2633 = vmatprep.subr.bf16.mxu0 %v2806_v8  ;;  %2655 = vmatprep.subr.bf16.mxu1 %v2807_v41 }
 0x11a   : > { %2634 = vmatpush3.bf16.msra.mxu0 %v2808_v40  ;;  %2656 = vmatpush3.bf16.msra.mxu1 %v2809_v15 }
 0x11b   : > { %2635 = vmatprep.subr.bf16.mxu0 %v2810_v38  ;;  %2657 = vmatprep.subr.bf16.mxu1 %v2811_v55 }
 0x11e   : > { %2636 = vmatpush3.bf16.msra.mxu0 %v2812_v49  ;;  %2658 = vmatpush3.bf16.msra.mxu1 %v2813_v17 }
 0x11f   : > { %2665 = vmatprep.subr.bf16.mxu0 %v2814_v18  ;;  %2687 = vmatprep.subr.bf16.mxu1 %v2815_v2 }
 0x121   : > { %2141 = vmatmul.mubr.bf16.vlgmr.msra.gmra.mxu0 %v909_v43  ;;  %2181 = vmatmul.mubr.bf16.vlgmr.msra.gmra.mxu1 %v911_v20 }
 0x122   : > { %2666 = vmatpush3.bf16.msra.mxu0 %v2816_v42  ;;  %2688 = vmatpush3.bf16.msra.mxu1 %v2817_v13 }
 0x123   : > { %2667 = vmatprep.subr.bf16.mxu0 %v2818_v21  ;;  %2689 = vmatprep.subr.bf16.mxu1 %v2819_v22 }
 0x124   : > { %2220 = vmatprep.mubr.bf16.mxu0 %v914_v23  ;;  %2260 = vmatprep.mubr.bf16.mxu1 %v916_v10 }
 0x126   : > { %2668 = vmatpush3.bf16.msra.mxu0 %v2820_v24  ;;  %2690 = vmatpush3.bf16.msra.mxu1 %v2821_v25 }
 0x127   : > { %2669 = vmatprep.subr.bf16.mxu0 %v2822_v26  ;;  %2691 = vmatprep.subr.bf16.mxu1 %v2823_v27 }
 0x12a   : > { %2670 = vmatpush3.bf16.msra.mxu0 %v2824_v28  ;;  %2692 = vmatpush3.bf16.msra.mxu1 %v2825_v29 }
 0x12b   : > { %2671 = vmatprep.subr.bf16.mxu0 %v2826_v30  ;;  %2693 = vmatprep.subr.bf16.mxu1 %v2827_v31 }
 0x12e   : > { %2672 = vmatpush3.bf16.msra.mxu0 %v2828_v32  ;;  %2694 = vmatpush3.bf16.msra.mxu1 %v2829_v34 }
 0x12f   : > { %2673 = vmatprep.subr.bf16.mxu0 %v2830_v36  ;;  %2695 = vmatprep.subr.bf16.mxu1 %v2831_v37 }
 0x132   : > { %2674 = vmatpush3.bf16.msra.mxu0 %v2832_v44  ;;  %2696 = vmatpush3.bf16.msra.mxu1 %v2833_v45 }
 0x133   : > { %2675 = vmatprep.subr.bf16.mxu0 %v2834_v46  ;;  %2697 = vmatprep.subr.bf16.mxu1 %v2835_v47  ;;  %v2848_v47 = vld [vmem:[%s2958_s10] sm:$0xff] }
 0x136   : > { %2676 = vmatpush3.bf16.msra.mxu0 %v2836_v48  ;;  %2698 = vmatpush3.bf16.msra.mxu1 %v2837_v50 }
 0x137   : > { %2677 = vmatprep.subr.bf16.mxu0 %v2838_v51  ;;  %2699 = vmatprep.subr.bf16.mxu1 %v2839_v52 }
 0x13a   : > { %2678 = vmatpush3.bf16.msra.mxu0 %v2840_v53  ;;  %2700 = vmatpush3.bf16.msra.mxu1 %v2841_v54 }
 0x13b   : > { %2679 = vmatprep.subr.bf16.mxu0 %v2842_v56  ;;  %2701 = vmatprep.subr.bf16.mxu1 %v2843_v57 }
 0x13e   : > { %2680 = vmatpush3.bf16.msra.mxu0 %v2844_v59  ;;  %2702 = vmatpush3.bf16.msra.mxu1 %v2845_v62  ;;  %v2529_v62 = vld [vmem:[%s3539_s5] ss:$0 sm:$0xff] }
 0x141   : > { %2221 = vmatmul.mubr.bf16.vlgmr.msra.gmra.mxu0 %v913_v1  ;;  %2261 = vmatmul.mubr.bf16.vlgmr.msra.gmra.mxu1 %v915_v63  ;;  %v2530_v1 = vld [vmem:[%s3540_s6] ss:$0 sm:$0xff] }
 0x1a1   : > { %v2549_v3 = vpop.f32.mrf.mxu0  ;;  %v2571_v4 = vpop.f32.mrf.mxu1 }
 0x1a3   : > { %v2550_v0 = vpop.f32.mrf.mxu0  ;;  %v2572_v9 = vpop.f32.mrf.mxu1 }
 0x1a4   : > { %v2551_v7 = vadd.f32 %v2550_v0, %v2549_v3  ;;  %v2573_v8 = vadd.f32 %v2572_v9, %v2571_v4 }
 0x1a5   : > { %v2552_v41 = vpop.f32.mrf.mxu0  ;;  %v2574_v39 = vpop.f32.mrf.mxu1 }
 0x1a6   : > { %v1983_v11 = vadd.f32 %v2551_v7, %v2400_v5 }
 0x1a7   : > { %v2553_v12 = vpop.f32.mrf.mxu0  ;;  %v2575_v14 = vpop.f32.mrf.mxu1 }
 0x1a8   : > { %v2023_v40 = vadd.f32 %v2573_v8, %v1983_v11 }
 0x1c1   : > { %v2593_v15 = vpop.f32.mrf.mxu0  ;;  %v2615_v38 = vpop.f32.mrf.mxu1 }
 0x1c3   : > { %v2594_v55 = vpop.f32.mrf.mxu0  ;;  %v2616_v60 = vpop.f32.mrf.mxu1 }
 0x1c4   : > { %v2595_v13 = vadd.f32 %v2594_v55, %v2593_v15  ;;  %v2617_v22 = vadd.f32 %v2616_v60, %v2615_v38 }
 0x1c5   : > { %v2596_v35 = vpop.f32.mrf.mxu0  ;;  %v2618_v33 = vpop.f32.mrf.mxu1 }
 0x1c6   : > { %v2063_v21 = vadd.f32 %v2595_v13, %v2023_v40 }
 0x1c7   : > { %v2597_v49 = vpop.f32.mrf.mxu0  ;;  %v2619_v16 = vpop.f32.mrf.mxu1 }
 0x1c8   : > { %v2103_v10 = vadd.f32 %v2617_v22, %v2063_v21 }
 0x1e1   : > { %v2637_v17 = vpop.f32.mrf.mxu0  ;;  %v2659_v18 = vpop.f32.mrf.mxu1 }
 0x1e3   : > { %v2638_v2 = vpop.f32.mrf.mxu0  ;;  %v2660_v6 = vpop.f32.mrf.mxu1 }
 0x1e4   : > { %v2639_v23 = vadd.f32 %v2638_v2, %v2637_v17  ;;  %v2661_v26 = vadd.f32 %v2660_v6, %v2659_v18 }
 0x1e5   : > { %v2640_v19 = vpop.f32.mrf.mxu0  ;;  %v2662_v20 = vpop.f32.mrf.mxu1 }
 0x1e6   : > { %v2143_v24 = vadd.f32 %v2639_v23, %v2103_v10 }
 0x1e7   : > { %v2641_v42 = vpop.f32.mrf.mxu0  ;;  %v2663_v43 = vpop.f32.mrf.mxu1 }
 0x1e8   : > { %v2183_v29 = vadd.f32 %v2661_v26, %v2143_v24 }
 0x201   : > { %v2681_v25 = vpop.f32.mrf.mxu0  ;;  %v2703_v27 = vpop.f32.mrf.mxu1 }
 0x203   : > { %v2682_v28 = vpop.f32.mrf.mxu0  ;;  %v2704_v31 = vpop.f32.mrf.mxu1 }
 0x204   : > { %v2683_v30 = vadd.f32 %v2682_v28, %v2681_v25  ;;  %v2705_v36 = vadd.f32 %v2704_v31, %v2703_v27 }
 0x205   : > { %v2684_v32 = vpop.f32.mrf.mxu0  ;;  %v2706_v37 = vpop.f32.mrf.mxu1 }
 0x206   : > { %v2223_v34 = vadd.f32 %v2683_v30, %v2183_v29 }
 0x207   : > { %v2685_v44 = vpop.f32.mrf.mxu0  ;;  %v2707_v46 = vpop.f32.mrf.mxu1 }
 0x208   : > { %v2263_v45 = vadd.f32 %v2705_v36, %v2223_v34 }
 0x20a   : > { %v2268_v48 = vadd.f32 %v2848_v47, %v2263_v45 }
 0x20c   : > { %v2269_v50 = vsel %vm553_vm0, %v2268_v48, 0.0 }
 0x20d   : > { %2270 = vadd.xlane.f32.xlu0 %v2269_v50 }
 0x296   : > { %v2271_v51 = vpop.xlane.xlu0 %2270 }
 0x297   : > { %v2273_v52 = vmul.f32 0.03125, %v2271_v51 }
 0x299   : > { %v2274_v53 = vsub.f32 %v2268_v48, %v2273_v52 }
 0x29b   : > { %v2275_v54 = vmul.f32 %v2274_v53, %v2274_v53 }
 0x29d   : > { %v2276_v56 = vsel %vm553_vm0, %v2275_v54, 0.0 }
 0x29e   : > { %2277 = vadd.xlane.f32.xlu0 %v2276_v56 }
 0x327   : > { %v2278_v57 = vpop.xlane.xlu0 %2277 }
 0x328   : > { %v2279_v58 = vmul.f32 0.03125, %v2278_v57 }
 0x32a   : > { %v2280_v59 = vadd.f32 1e-05, %v2279_v58 }
 0x32c   : > { %2846 = vrsqrt.f32 %v2280_v59 }
 0x339   : > { %v2847_v61 = vpop.eup %2846 }
 0x33a   : > { %v2282_v63 = vmul.f32 %v2847_v61, %v2274_v53 }
 0x33c   : > { %v2290_v3 = vmul.f32 %v2529_v62, %v2282_v63 }
 0x33e   : > { %v2298_v4 = vadd.f32 %v2530_v1, %v2290_v3 }
 0x340   : > { %2299 = vst.msk [vmem:[%s273_s14] sm:$0xff] %vm553_vm0, %v2298_v4 }
 0x341 PF: > { %s17_s24 = sadd.s32 1, %s2855_s24  }
 0x342   : > { %p14_p4 = scmp.ge.s32.totalorder %s17_s24, 4  }
 0x344   :  { %16 = sbr.rel (!%p14_p4) target bundleno = 1 (0x1), region = 78 }

</bundles_post_ra>
